<compile_context>
chip_gen: v6e
topology: v6e:2x2x1
jax: 0.10.0
libtpu: 0.0.40
codegen_flags: <defaults>
</compile_context>

<pallas_src>
import functools

import jax
import jax.numpy as jnp
from jax.experimental import pallas as pl
from jax.experimental.pallas import tpu as pltpu

_BF16 = jnp.bfloat16
_F32 = jnp.float32


def _tnet_kernel(d, n_tiles,
                 xnd_ref, xdn_ref,
                 w1_ref, b1_ref, w2_ref, b2_ref, w3_ref, b3_ref,
                 wf1_ref, bf1_ref, wf2_ref, bf2_ref, wf3r_ref, bf3r_ref,
                 t_ref, out_ref,
                 g_sc, t_sc):
    k = pl.program_id(1)
    K = n_tiles

    @pl.when(k == 0)
    def _init():
        g_sc[...] = jnp.full(g_sc.shape, -jnp.inf, dtype=g_sc.dtype)

    # ---- phase 1: pointwise MLP on this tile of points + running max-pool ----
    @pl.when(k < K)
    def _mlp_tile():
        x = xnd_ref[0]                                                   # (tn, d)
        # layer 1 stays f32 (tiny K=d contraction, negligible FLOPs)
        h = jnp.dot(x, w1_ref[...], preferred_element_type=_F32) + b1_ref[...]
        h = jnp.maximum(h, 0.0)
        # heavy layers: bf16 operands on the MXU, f32 accumulation
        h = jnp.dot(h.astype(_BF16), w2_ref[...],
                    preferred_element_type=_F32) + b2_ref[...]
        h = jnp.maximum(h, 0.0)
        h = jnp.dot(h.astype(_BF16), w3_ref[...],
                    preferred_element_type=_F32) + b3_ref[...]
        h = jnp.maximum(h, 0.0)                                          # (tn, 1024)
        g_sc[...] = jnp.maximum(g_sc[...], jnp.max(h, axis=0, keepdims=True))

    # ---- last phase-1 step: fc tail -> transform t (identity folded into bias) ----
    @pl.when(k == K - 1)
    def _fc_tail():
        g = g_sc[...]                                                    # (1, 1024)
        f = jnp.dot(g.astype(_BF16), wf1_ref[...],
                    preferred_element_type=_F32) + bf1_ref[...]
        f = jnp.maximum(f, 0.0)
        f = jnp.dot(f.astype(_BF16), wf2_ref[...],
                    preferred_element_type=_F32) + bf2_ref[...]
        f = jnp.maximum(f, 0.0)                                          # (1, 265)
        # Final linear, one (1, d)-row slab at a time; eye(d) is already in bf3r.
        for i in range(d):
            row = jnp.dot(f, wf3r_ref[i],
                          preferred_element_type=_F32) + bf3r_ref[i]     # (1, d)
            t_sc[pl.ds(i, 1), :] = row
        t_ref[0] = t_sc[...]

    # ---- phase 2: out tile = t @ x tile, as d broadcast-FMAs on the VPU ----
    @pl.when(k >= K)
    def _bmm_tile():
        t = t_sc[...]                                                    # (d, d)
        x = xdn_ref[0]                                                   # (d, tn)
        acc = t[:, 0:1] * x[0:1, :]
        for j in range(1, d):
            acc = acc + t[:, j:j + 1] * x[j:j + 1, :]
        out_ref[0] = acc.astype(out_ref.dtype)


def _pick_point_tile(n, max_tile):
    if n <= max_tile:
        return n
    for cand in (512, 384, 256, 128):
        if cand <= max_tile and n % cand == 0:
            return cand
    # N not a multiple of 128: fall back to a single (untiled) pass.
    return n


def tnet_forward(x, params, *, max_tile=512):
    """x: (B, in_dim, N) float32 (PyTorch NCW layout). Returns (t, out)."""
    B, d, n = x.shape
    (w1, b1, w2, b2, w3, b3, wf1, bf1, wf2, bf2, wf3, bf3) = params

    tn = _pick_point_tile(n, max_tile)
    K = n // tn

    x_dn = x                                                # (B, d, N)  phase-2 layout
    x_nd = jnp.transpose(x, (0, 2, 1))                      # (B, N, d)  phase-1 layout

    # Heavy matmul weights in bf16 (kernel accumulates in f32); first/last stay f32.
    w2b, w3b, wf1b, wf2b = (w.astype(_BF16) for w in (w2, w3, wf1, wf2))

    # Final fc layer as per-output-row slabs; fold the identity into the bias.
    wf3r = jnp.transpose(wf3.reshape(265, d, d), (1, 0, 2))                  # (d, 265, d)
    bf3r = (bf3.reshape(d, d) + jnp.eye(d, dtype=_F32))[:, None, :]          # (d, 1, d)

    def const_spec(a):
        r = a.ndim
        return pl.BlockSpec(a.shape, lambda b, k, _r=r: (0,) * _r)

    in_specs = [
        # phase-1 input; pinned at its last tile during phase 2 (no re-fetch)
        pl.BlockSpec((1, tn, d), lambda b, k: (b, jnp.minimum(k, K - 1), 0)),
        # phase-2 input; pinned at tile 0 during phase 1
        pl.BlockSpec((1, d, tn), lambda b, k: (b, 0, jnp.maximum(k - K, 0))),
        const_spec(w1), const_spec(b1),
        const_spec(w2b), const_spec(b2),
        const_spec(w3b), const_spec(b3),
        const_spec(wf1b), const_spec(bf1),
        const_spec(wf2b), const_spec(bf2),
        const_spec(wf3r), const_spec(bf3r),
    ]
    out_specs = [
        pl.BlockSpec((1, d, d), lambda b, k: (b, 0, 0)),
        pl.BlockSpec((1, d, tn), lambda b, k: (b, 0, jnp.maximum(k - K, 0))),
    ]
    out_shape = (
        jax.ShapeDtypeStruct((B, d, d), _F32),
        jax.ShapeDtypeStruct((B, d, n), _F32),
    )

    kernel = functools.partial(_tnet_kernel, d, K)
    return pl.pallas_call(
        kernel,
        out_shape=out_shape,
        grid_spec=pltpu.PrefetchScalarGridSpec(
            num_scalar_prefetch=0,
            grid=(B, 2 * K),
            in_specs=in_specs,
            out_specs=out_specs,
            scratch_shapes=[
                pltpu.VMEM((1, 1024), _F32),   # running max-pool accumulator
                pltpu.VMEM((d, d), _F32),      # transform t, carried into phase 2
            ],
        ),
        compiler_params=pltpu.CompilerParams(
            # Batch axis parallel (megacore); the point-tile axis carries the
            # running max and t, so it must stay "arbitrary".
            # (For B == 1 on v7x one could additionally shard phase-1 tiles
            #  across the two TensorCores and combine partial maxes.)
            dimension_semantics=("parallel", "arbitrary"),
            # Footprint: ~1.6 MiB weights + ~3 MiB per-tile activations; keep the
            # request well under v7x's 64 MiB physical VMEM.
            vmem_limit_bytes=32 << 20,
        ),
    )(x_nd, x_dn, w1, b1, w2b, b2, w3b, b3, wf1b, bf1, wf2b, bf2, wf3r, bf3r)


def _init_params(key, d):
    """Deterministic synthetic parameters; BN (eval mode) folded into weights."""
    def linear(k, cin, cout):
        kw, kb = jax.random.split(k)
        w = jax.random.normal(kw, (cin, cout), _F32) / jnp.sqrt(float(cin))
        b = 0.01 * jax.random.normal(kb, (cout,), _F32)
        return w, b

    def bn_fold(k, w, b, eps=1e-5):
        kg, kb = jax.random.split(k)
        c = w.shape[1]
        gamma = 1.0 + 0.1 * jax.random.normal(kg, (c,), _F32)
        beta = 0.1 * jax.random.normal(kb, (c,), _F32)
        mean = jnp.zeros((c,), _F32)     # eval-mode running stats
        var = jnp.ones((c,), _F32)
        scale = gamma / jnp.sqrt(var + eps)
        return w * scale[None, :], (b - mean) * scale + beta

    keys = jax.random.split(key, 12)
    dims = [(d, 64), (64, 128), (128, 1024),        # mlp (conv1d k=1), BN+ReLU
            (1024, 512), (512, 265)]                # fc layers with BN+ReLU
    params = []
    for i, (cin, cout) in enumerate(dims):
        w, b = linear(keys[2 * i], cin, cout)
        w, b = bn_fold(keys[2 * i + 1], w, b)
        params += [w, b.reshape(1, cout)]
    # last fc layer: 265 -> d*d, no BN, no ReLU (use_tail=False)
    w, b = linear(keys[10], 265, d * d)
    params += [w, b.reshape(1, d * d)]
    return tuple(params)


def _tnet_reference(x, params):
    """Pure-JAX reference mirroring the kernel's bf16-operand / f32-accum math.

    (vs. pure f32 PyTorch math the bf16 cast of the heavy layers introduces
     ~0.5-1% relative error, which is the intended TPU trade-off.)
    """
    B, d, n = x.shape
    (w1, b1, w2, b2, w3, b3, wf1, bf1, wf2, bf2, wf3, bf3) = params
    xt = jnp.transpose(x, (0, 2, 1))                                # (B, N, d)
    h = jax.nn.relu(jnp.einsum('bnk,kc->bnc', xt, w1,
                               preferred_element_type=_F32) + b1)
    h = jax.nn.relu(jnp.einsum('bnk,kc->bnc', h.astype(_BF16), w2.astype(_BF16),
                               preferred_element_type=_F32) + b2)
    h = jax.nn.relu(jnp.einsum('bnk,kc->bnc', h.astype(_BF16), w3.astype(_BF16),
                               preferred_element_type=_F32) + b3)
    g = jnp.max(h, axis=1)                                          # (B, 1024)
    f = jax.nn.relu(jnp.einsum('bk,kc->bc', g.astype(_BF16), wf1.astype(_BF16),
                               preferred_element_type=_F32) + bf1)
    f = jax.nn.relu(jnp.einsum('bk,kc->bc', f.astype(_BF16), wf2.astype(_BF16),
                               preferred_element_type=_F32) + bf2)
    t = (f @ wf3 + bf3).reshape(B, d, d) + jnp.eye(d, dtype=_F32)
    out = jnp.einsum('bij,bjn->bin', t, x)
    return t, out


if __name__ == "__main__":
    key = jax.random.PRNGKey(0)
    kx, kp, kx2 = jax.random.split(key, 3)

    B, in_dim, N = 2, 4, 16
    params = _init_params(kp, in_dim)

    # --- small shape (single point-tile, K=1) ---
    x = jax.random.normal(kx, (B, in_dim, N), _F32)          # PyTorch NCW: (B, C, N)
    t, out = tnet_forward(x, params)
    jax.block_until_ready((t, out))
    t_ref, out_ref = _tnet_reference(x, params)
    assert t.shape == (B, in_dim, in_dim) and out.shape == (B, in_dim, N)
    assert jnp.allclose(t, t_ref, atol=5e-3, rtol=5e-3)
    assert jnp.allclose(out, out_ref, atol=5e-3, rtol=5e-3)

    # --- exercise the tiled-N / two-phase path (K=2) ---
    N2 = 256
    x2 = jax.random.normal(kx2, (B, in_dim, N2), _F32)
    t2, out2 = tnet_forward(x2, params, max_tile=128)
    jax.block_until_ready((t2, out2))
    t2_ref, out2_ref = _tnet_reference(x2, params)
    assert jnp.allclose(t2, t2_ref, atol=5e-3, rtol=5e-3)
    assert jnp.allclose(out2, out2_ref, atol=5e-3, rtol=5e-3)

    print("KERNEL_OK")
</pallas_src>

<mosaic_0001>
module attributes {stable_mosaic.version = 11 : i64} {
  func.func @_tnet_kernel(%arg0: i32, %arg1: i32, %arg2: memref<1x16x4xf32, #tpu.memory_space<vmem>>, %arg3: memref<1x4x16xf32, #tpu.memory_space<vmem>>, %arg4: memref<4x64xf32, #tpu.memory_space<vmem>>, %arg5: memref<1x64xf32, #tpu.memory_space<vmem>>, %arg6: memref<64x128xbf16, #tpu.memory_space<vmem>>, %arg7: memref<1x128xf32, #tpu.memory_space<vmem>>, %arg8: memref<128x1024xbf16, #tpu.memory_space<vmem>>, %arg9: memref<1x1024xf32, #tpu.memory_space<vmem>>, %arg10: memref<1024x512xbf16, #tpu.memory_space<vmem>>, %arg11: memref<1x512xf32, #tpu.memory_space<vmem>>, %arg12: memref<512x265xbf16, #tpu.memory_space<vmem>>, %arg13: memref<1x265xf32, #tpu.memory_space<vmem>>, %arg14: memref<4x265x4xf32, #tpu.memory_space<vmem>>, %arg15: memref<4x1x4xf32, #tpu.memory_space<vmem>>, %arg16: memref<1x4x4xf32, #tpu.memory_space<vmem>>, %arg17: memref<1x4x16xf32, #tpu.memory_space<vmem>>, %arg18: memref<1x1024xf32, #tpu.memory_space<vmem>>, %arg19: memref<4x4xf32, #tpu.memory_space<vmem>>) attributes {dimension_semantics = [#tpu.dimension_semantics<parallel>, #tpu.dimension_semantics<arbitrary>], iteration_bounds = array<i64: 2, 2>, scalar_prefetch = 0 : i64, scratch_operands = 2 : i64, tpu.core_type = #tpu.core_type<tc>, window_params = [{transform_indices = @transform_0, window_bounds = array<i64: 1, 16, 4>}, {transform_indices = @transform_1, window_bounds = array<i64: 1, 4, 16>}, {pipeline_mode = #tpu.pipeline_mode<synchronous>, transform_indices = @transform_2, window_bounds = array<i64: 4, 64>}, {pipeline_mode = #tpu.pipeline_mode<synchronous>, transform_indices = @transform_3, window_bounds = array<i64: 1, 64>}, {pipeline_mode = #tpu.pipeline_mode<synchronous>, transform_indices = @transform_4, window_bounds = array<i64: 64, 128>}, {pipeline_mode = #tpu.pipeline_mode<synchronous>, transform_indices = @transform_5, window_bounds = array<i64: 1, 128>}, {pipeline_mode = #tpu.pipeline_mode<synchronous>, transform_indices = @transform_6, window_bounds = array<i64: 128, 1024>}, {pipeline_mode = #tpu.pipeline_mode<synchronous>, transform_indices = @transform_7, window_bounds = array<i64: 1, 1024>}, {pipeline_mode = #tpu.pipeline_mode<synchronous>, transform_indices = @transform_8, window_bounds = array<i64: 1024, 512>}, {pipeline_mode = #tpu.pipeline_mode<synchronous>, transform_indices = @transform_9, window_bounds = array<i64: 1, 512>}, {pipeline_mode = #tpu.pipeline_mode<synchronous>, transform_indices = @transform_10, window_bounds = array<i64: 512, 265>}, {pipeline_mode = #tpu.pipeline_mode<synchronous>, transform_indices = @transform_11, window_bounds = array<i64: 1, 265>}, {pipeline_mode = #tpu.pipeline_mode<synchronous>, transform_indices = @transform_12, window_bounds = array<i64: 4, 265, 4>}, {pipeline_mode = #tpu.pipeline_mode<synchronous>, transform_indices = @transform_13, window_bounds = array<i64: 4, 1, 4>}, {transform_indices = @transform_14, window_bounds = array<i64: 1, 4, 4>}, {transform_indices = @transform_15, window_bounds = array<i64: 1, 4, 16>}]} {
    %c0_i32 = arith.constant 0 : i32
    %0 = arith.cmpi eq, %arg1, %c0_i32 : i32
    %1 = arith.extui %0 : i1 to i32
    %c0_i32_0 = arith.constant 0 : i32
    %2 = arith.cmpi ne, %1, %c0_i32_0 : i32
    scf.if %2 {
      %cst = arith.constant 0xFF800000 : f32
      %12 = vector.broadcast %cst : f32 to vector<1x1024xf32>
      %c0 = arith.constant 0 : index
      %c0_6 = arith.constant 0 : index
      %13 = vector.load %arg18[%c0, %c0_6] : memref<1x1024xf32, #tpu.memory_space<vmem>>, vector<1x1024xf32>
      tpu.vector_store %arg18[%c0, %c0_6], %12 {strides = array<i32>} : memref<1x1024xf32, #tpu.memory_space<vmem>>, vector<1x1024xf32>,
    } else {
    }
    %c1_i32 = arith.constant 1 : i32
    %3 = arith.cmpi slt, %arg1, %c1_i32 : i32
    %4 = arith.extui %3 : i1 to i32
    %c0_i32_1 = arith.constant 0 : i32
    %5 = arith.cmpi ne, %4, %c0_i32_1 : i32
    scf.if %5 {
      %c0 = arith.constant 0 : index
      %c0_6 = arith.constant 0 : index
      %c0_7 = arith.constant 0 : index
      %12 = vector.load %arg2[%c0, %c0_6, %c0_7] : memref<1x16x4xf32, #tpu.memory_space<vmem>>, vector<1x16x4xf32>
      %13 = vector.shape_cast %12 : vector<1x16x4xf32> to vector<16x4xf32>
      %c0_8 = arith.constant 0 : index
      %c0_9 = arith.constant 0 : index
      %14 = vector.load %arg4[%c0_8, %c0_9] : memref<4x64xf32, #tpu.memory_space<vmem>>, vector<4x64xf32>
      %cst = arith.constant dense<0.000000e+00> : vector<16x64xf32>
      %15 = tpu.matmul %13, %14, %cst {dimension_numbers = #tpu.dot_dimension_numbers<[1], [0], [0], [1], [0, 0, 1, 1], [], []>} : vector<16x4xf32>, vector<4x64xf32>, vector<16x64xf32> -> vector<16x64xf32>
      %c0_10 = arith.constant 0 : index
      %c0_11 = arith.constant 0 : index
      %16 = vector.load %arg5[%c0_10, %c0_11] : memref<1x64xf32, #tpu.memory_space<vmem>>, vector<1x64xf32>
      %17 = vector.broadcast %16 : vector<1x64xf32> to vector<16x64xf32>
      %18 = arith.addf %15, %17 : vector<16x64xf32>
      %cst_12 = arith.constant 0.000000e+00 : f32
      %19 = vector.broadcast %cst_12 : f32 to vector<16x64xf32>
      %20 = arith.maximumf %18, %19 : vector<16x64xf32>
      %21 = arith.truncf %20 : vector<16x64xf32> to vector<16x64xbf16>
      %c0_13 = arith.constant 0 : index
      %c0_14 = arith.constant 0 : index
      %22 = vector.load %arg6[%c0_13, %c0_14] : memref<64x128xbf16, #tpu.memory_space<vmem>>, vector<64x128xbf16>
      %cst_15 = arith.constant dense<0.000000e+00> : vector<16x128xf32>
      %23 = tpu.matmul %21, %22, %cst_15 {dimension_numbers = #tpu.dot_dimension_numbers<[1], [0], [0], [1], [0, 0, 1, 1], [], []>} : vector<16x64xbf16>, vector<64x128xbf16>, vector<16x128xf32> -> vector<16x128xf32>
      %c0_16 = arith.constant 0 : index
      %c0_17 = arith.constant 0 : index
      %24 = vector.load %arg7[%c0_16, %c0_17] : memref<1x128xf32, #tpu.memory_space<vmem>>, vector<1x128xf32>
      %25 = vector.broadcast %24 : vector<1x128xf32> to vector<16x128xf32>
      %26 = arith.addf %23, %25 : vector<16x128xf32>
      %cst_18 = arith.constant 0.000000e+00 : f32
      %27 = vector.broadcast %cst_18 : f32 to vector<16x128xf32>
      %28 = arith.maximumf %26, %27 : vector<16x128xf32>
      %29 = arith.truncf %28 : vector<16x128xf32> to vector<16x128xbf16>
      %c0_19 = arith.constant 0 : index
      %c0_20 = arith.constant 0 : index
      %30 = vector.load %arg8[%c0_19, %c0_20] : memref<128x1024xbf16, #tpu.memory_space<vmem>>, vector<128x1024xbf16>
      %cst_21 = arith.constant dense<0.000000e+00> : vector<16x1024xf32>
      %31 = tpu.matmul %29, %30, %cst_21 {dimension_numbers = #tpu.dot_dimension_numbers<[1], [0], [0], [1], [0, 0, 1, 1], [], []>} : vector<16x128xbf16>, vector<128x1024xbf16>, vector<16x1024xf32> -> vector<16x1024xf32>
      %c0_22 = arith.constant 0 : index
      %c0_23 = arith.constant 0 : index
      %32 = vector.load %arg9[%c0_22, %c0_23] : memref<1x1024xf32, #tpu.memory_space<vmem>>, vector<1x1024xf32>
      %33 = vector.broadcast %32 : vector<1x1024xf32> to vector<16x1024xf32>
      %34 = arith.addf %31, %33 : vector<16x1024xf32>
      %cst_24 = arith.constant 0.000000e+00 : f32
      %35 = vector.broadcast %cst_24 : f32 to vector<16x1024xf32>
      %36 = arith.maximumf %34, %35 : vector<16x1024xf32>
      %c0_25 = arith.constant 0 : index
      %c0_26 = arith.constant 0 : index
      %37 = vector.load %arg18[%c0_25, %c0_26] : memref<1x1024xf32, #tpu.memory_space<vmem>>, vector<1x1024xf32>
      %cst_27 = arith.constant dense<0xFF800000> : vector<1024xf32>
      %38 = vector.multi_reduction <maximumf>, %36, %cst_27 [0] : vector<16x1024xf32> to vector<1024xf32>
      %39 = vector.shape_cast %38 : vector<1024xf32> to vector<1x1024xf32>
      %40 = arith.maximumf %37, %39 : vector<1x1024xf32>
      %c0_28 = arith.constant 0 : index
      %c0_29 = arith.constant 0 : index
      %41 = vector.load %arg18[%c0_28, %c0_29] : memref<1x1024xf32, #tpu.memory_space<vmem>>, vector<1x1024xf32>
      tpu.vector_store %arg18[%c0_28, %c0_29], %40 {strides = array<i32>} : memref<1x1024xf32, #tpu.memory_space<vmem>>, vector<1x1024xf32>,
    } else {
    }
    %c0_i32_2 = arith.constant 0 : i32
    %6 = arith.cmpi eq, %arg1, %c0_i32_2 : i32
    %7 = arith.extui %6 : i1 to i32
    %c0_i32_3 = arith.constant 0 : i32
    %8 = arith.cmpi ne, %7, %c0_i32_3 : i32
    scf.if %8 {
      %c0 = arith.constant 0 : index
      %c0_6 = arith.constant 0 : index
      %12 = vector.load %arg18[%c0, %c0_6] : memref<1x1024xf32, #tpu.memory_space<vmem>>, vector<1x1024xf32>
      %13 = arith.truncf %12 : vector<1x1024xf32> to vector<1x1024xbf16>
      %c0_7 = arith.constant 0 : index
      %c0_8 = arith.constant 0 : index
      %14 = vector.load %arg10[%c0_7, %c0_8] : memref<1024x512xbf16, #tpu.memory_space<vmem>>, vector<1024x512xbf16>
      %cst = arith.constant dense<0.000000e+00> : vector<1x512xf32>
      %15 = tpu.matmul %13, %14, %cst {dimension_numbers = #tpu.dot_dimension_numbers<[1], [0], [0], [1], [0, 0, 1, 1], [], []>} : vector<1x1024xbf16>, vector<1024x512xbf16>, vector<1x512xf32> -> vector<1x512xf32>
      %c0_9 = arith.constant 0 : index
      %c0_10 = arith.constant 0 : index
      %16 = vector.load %arg11[%c0_9, %c0_10] : memref<1x512xf32, #tpu.memory_space<vmem>>, vector<1x512xf32>
      %17 = arith.addf %15, %16 : vector<1x512xf32>
      %cst_11 = arith.constant 0.000000e+00 : f32
      %18 = vector.broadcast %cst_11 : f32 to vector<1x512xf32>
      %19 = arith.maximumf %17, %18 : vector<1x512xf32>
      %20 = arith.truncf %19 : vector<1x512xf32> to vector<1x512xbf16>
      %c0_12 = arith.constant 0 : index
      %c0_13 = arith.constant 0 : index
      %21 = vector.load %arg12[%c0_12, %c0_13] : memref<512x265xbf16, #tpu.memory_space<vmem>>, vector<512x265xbf16>
      %cst_14 = arith.constant dense<0.000000e+00> : vector<1x265xf32>
      %22 = tpu.matmul %20, %21, %cst_14 {dimension_numbers = #tpu.dot_dimension_numbers<[1], [0], [0], [1], [0, 0, 1, 1], [], []>} : vector<1x512xbf16>, vector<512x265xbf16>, vector<1x265xf32> -> vector<1x265xf32>
      %c0_15 = arith.constant 0 : index
      %c0_16 = arith.constant 0 : index
      %23 = vector.load %arg13[%c0_15, %c0_16] : memref<1x265xf32, #tpu.memory_space<vmem>>, vector<1x265xf32>
      %24 = arith.addf %22, %23 : vector<1x265xf32>
      %cst_17 = arith.constant 0.000000e+00 : f32
      %25 = vector.broadcast %cst_17 : f32 to vector<1x265xf32>
      %26 = arith.maximumf %24, %25 : vector<1x265xf32>
      %c0_18 = arith.constant 0 : index
      %c0_19 = arith.constant 0 : index
      %c0_20 = arith.constant 0 : index
      %27 = vector.load %arg14[%c0_18, %c0_19, %c0_20] : memref<4x265x4xf32, #tpu.memory_space<vmem>>, vector<1x265x4xf32>
      %28 = vector.shape_cast %27 : vector<1x265x4xf32> to vector<265x4xf32>
      %cst_21 = arith.constant dense<0.000000e+00> : vector<1x4xf32>
      %29 = tpu.matmul %26, %28, %cst_21 {dimension_numbers = #tpu.dot_dimension_numbers<[1], [0], [0], [1], [0, 0, 1, 1], [], []>} : vector<1x265xf32>, vector<265x4xf32>, vector<1x4xf32> -> vector<1x4xf32>
      %c0_22 = arith.constant 0 : index
      %c0_23 = arith.constant 0 : index
      %c0_24 = arith.constant 0 : index
      %30 = vector.load %arg15[%c0_22, %c0_23, %c0_24] : memref<4x1x4xf32, #tpu.memory_space<vmem>>, vector<1x1x4xf32>
      %31 = vector.shape_cast %30 : vector<1x1x4xf32> to vector<1x4xf32>
      %32 = arith.addf %29, %31 : vector<1x4xf32>
      %c0_25 = arith.constant 0 : index
      %c0_26 = arith.constant 0 : index
      %33 = vector.load %arg19[%c0_25, %c0_26] : memref<4x4xf32, #tpu.memory_space<vmem>>, vector<1x4xf32>
      tpu.vector_store %arg19[%c0_25, %c0_26], %32 {strides = array<i32>} : memref<4x4xf32, #tpu.memory_space<vmem>>, vector<1x4xf32>,
      %c1 = arith.constant 1 : index
      %c0_27 = arith.constant 0 : index
      %c0_28 = arith.constant 0 : index
      %34 = vector.load %arg14[%c1, %c0_27, %c0_28] : memref<4x265x4xf32, #tpu.memory_space<vmem>>, vector<1x265x4xf32>
      %35 = vector.shape_cast %34 : vector<1x265x4xf32> to vector<265x4xf32>
      %cst_29 = arith.constant dense<0.000000e+00> : vector<1x4xf32>
      %36 = tpu.matmul %26, %35, %cst_29 {dimension_numbers = #tpu.dot_dimension_numbers<[1], [0], [0], [1], [0, 0, 1, 1], [], []>} : vector<1x265xf32>, vector<265x4xf32>, vector<1x4xf32> -> vector<1x4xf32>
      %c1_30 = arith.constant 1 : index
      %c0_31 = arith.constant 0 : index
      %c0_32 = arith.constant 0 : index
      %37 = vector.load %arg15[%c1_30, %c0_31, %c0_32] : memref<4x1x4xf32, #tpu.memory_space<vmem>>, vector<1x1x4xf32>
      %38 = vector.shape_cast %37 : vector<1x1x4xf32> to vector<1x4xf32>
      %39 = arith.addf %36, %38 : vector<1x4xf32>
      %c1_33 = arith.constant 1 : index
      %c0_34 = arith.constant 0 : index
      %40 = vector.load %arg19[%c1_33, %c0_34] : memref<4x4xf32, #tpu.memory_space<vmem>>, vector<1x4xf32>
      tpu.vector_store %arg19[%c1_33, %c0_34], %39 {strides = array<i32>} : memref<4x4xf32, #tpu.memory_space<vmem>>, vector<1x4xf32>,
      %c2 = arith.constant 2 : index
      %c0_35 = arith.constant 0 : index
      %c0_36 = arith.constant 0 : index
      %41 = vector.load %arg14[%c2, %c0_35, %c0_36] : memref<4x265x4xf32, #tpu.memory_space<vmem>>, vector<1x265x4xf32>
      %42 = vector.shape_cast %41 : vector<1x265x4xf32> to vector<265x4xf32>
      %cst_37 = arith.constant dense<0.000000e+00> : vector<1x4xf32>
      %43 = tpu.matmul %26, %42, %cst_37 {dimension_numbers = #tpu.dot_dimension_numbers<[1], [0], [0], [1], [0, 0, 1, 1], [], []>} : vector<1x265xf32>, vector<265x4xf32>, vector<1x4xf32> -> vector<1x4xf32>
      %c2_38 = arith.constant 2 : index
      %c0_39 = arith.constant 0 : index
      %c0_40 = arith.constant 0 : index
      %44 = vector.load %arg15[%c2_38, %c0_39, %c0_40] : memref<4x1x4xf32, #tpu.memory_space<vmem>>, vector<1x1x4xf32>
      %45 = vector.shape_cast %44 : vector<1x1x4xf32> to vector<1x4xf32>
      %46 = arith.addf %43, %45 : vector<1x4xf32>
      %c2_41 = arith.constant 2 : index
      %c0_42 = arith.constant 0 : index
      %47 = vector.load %arg19[%c2_41, %c0_42] : memref<4x4xf32, #tpu.memory_space<vmem>>, vector<1x4xf32>
      tpu.vector_store %arg19[%c2_41, %c0_42], %46 {strides = array<i32>} : memref<4x4xf32, #tpu.memory_space<vmem>>, vector<1x4xf32>,
      %c3 = arith.constant 3 : index
      %c0_43 = arith.constant 0 : index
      %c0_44 = arith.constant 0 : index
      %48 = vector.load %arg14[%c3, %c0_43, %c0_44] : memref<4x265x4xf32, #tpu.memory_space<vmem>>, vector<1x265x4xf32>
      %49 = vector.shape_cast %48 : vector<1x265x4xf32> to vector<265x4xf32>
      %cst_45 = arith.constant dense<0.000000e+00> : vector<1x4xf32>
      %50 = tpu.matmul %26, %49, %cst_45 {dimension_numbers = #tpu.dot_dimension_numbers<[1], [0], [0], [1], [0, 0, 1, 1], [], []>} : vector<1x265xf32>, vector<265x4xf32>, vector<1x4xf32> -> vector<1x4xf32>
      %c3_46 = arith.constant 3 : index
      %c0_47 = arith.constant 0 : index
      %c0_48 = arith.constant 0 : index
      %51 = vector.load %arg15[%c3_46, %c0_47, %c0_48] : memref<4x1x4xf32, #tpu.memory_space<vmem>>, vector<1x1x4xf32>
      %52 = vector.shape_cast %51 : vector<1x1x4xf32> to vector<1x4xf32>
      %53 = arith.addf %50, %52 : vector<1x4xf32>
      %c3_49 = arith.constant 3 : index
      %c0_50 = arith.constant 0 : index
      %54 = vector.load %arg19[%c3_49, %c0_50] : memref<4x4xf32, #tpu.memory_space<vmem>>, vector<1x4xf32>
      tpu.vector_store %arg19[%c3_49, %c0_50], %53 {strides = array<i32>} : memref<4x4xf32, #tpu.memory_space<vmem>>, vector<1x4xf32>,
      %c0_51 = arith.constant 0 : index
      %c0_52 = arith.constant 0 : index
      %55 = vector.load %arg19[%c0_51, %c0_52] : memref<4x4xf32, #tpu.memory_space<vmem>>, vector<4x4xf32>
      %c0_53 = arith.constant 0 : index
      %c0_54 = arith.constant 0 : index
      %c0_55 = arith.constant 0 : index
      %56 = vector.load %arg16[%c0_53, %c0_54, %c0_55] : memref<1x4x4xf32, #tpu.memory_space<vmem>>, vector<1x4x4xf32>
      %57 = vector.shape_cast %56 : vector<1x4x4xf32> to vector<4x4xf32>
      %58 = vector.shape_cast %55 : vector<4x4xf32> to vector<1x4x4xf32>
      tpu.vector_store %arg16[%c0_53, %c0_54, %c0_55], %58 {strides = array<i32>} : memref<1x4x4xf32, #tpu.memory_space<vmem>>, vector<1x4x4xf32>,
    } else {
    }
    %c1_i32_4 = arith.constant 1 : i32
    %9 = arith.cmpi sge, %arg1, %c1_i32_4 : i32
    %10 = arith.extui %9 : i1 to i32
    %c0_i32_5 = arith.constant 0 : i32
    %11 = arith.cmpi ne, %10, %c0_i32_5 : i32
    scf.if %11 {
      %c0 = arith.constant 0 : index
      %c0_6 = arith.constant 0 : index
      %12 = vector.load %arg19[%c0, %c0_6] : memref<4x4xf32, #tpu.memory_space<vmem>>, vector<4x4xf32>
      %c0_7 = arith.constant 0 : index
      %c0_8 = arith.constant 0 : index
      %c0_9 = arith.constant 0 : index
      %13 = vector.load %arg3[%c0_7, %c0_8, %c0_9] : memref<1x4x16xf32, #tpu.memory_space<vmem>>, vector<1x4x16xf32>
      %14 = vector.shape_cast %13 : vector<1x4x16xf32> to vector<4x16xf32>
      %15 = vector.extract_strided_slice %12 {offsets = [0, 0], sizes = [4, 1], strides = [1, 1]} : vector<4x4xf32> to vector<4x1xf32>
      %16 = vector.extract_strided_slice %14 {offsets = [0, 0], sizes = [1, 16], strides = [1, 1]} : vector<4x16xf32> to vector<1x16xf32>
      %17 = vector.broadcast %15 : vector<4x1xf32> to vector<4x16xf32>
      %18 = vector.broadcast %16 : vector<1x16xf32> to vector<4x16xf32>
      %19 = arith.mulf %17, %18 : vector<4x16xf32>
      %20 = vector.extract_strided_slice %12 {offsets = [0, 1], sizes = [4, 1], strides = [1, 1]} : vector<4x4xf32> to vector<4x1xf32>
      %21 = vector.extract_strided_slice %14 {offsets = [1, 0], sizes = [1, 16], strides = [1, 1]} : vector<4x16xf32> to vector<1x16xf32>
      %22 = vector.broadcast %20 : vector<4x1xf32> to vector<4x16xf32>
      %23 = vector.broadcast %21 : vector<1x16xf32> to vector<4x16xf32>
      %24 = arith.mulf %22, %23 : vector<4x16xf32>
      %25 = arith.addf %19, %24 : vector<4x16xf32>
      %26 = vector.extract_strided_slice %12 {offsets = [0, 2], sizes = [4, 1], strides = [1, 1]} : vector<4x4xf32> to vector<4x1xf32>
      %27 = vector.extract_strided_slice %14 {offsets = [2, 0], sizes = [1, 16], strides = [1, 1]} : vector<4x16xf32> to vector<1x16xf32>
      %28 = vector.broadcast %26 : vector<4x1xf32> to vector<4x16xf32>
      %29 = vector.broadcast %27 : vector<1x16xf32> to vector<4x16xf32>
      %30 = arith.mulf %28, %29 : vector<4x16xf32>
      %31 = arith.addf %25, %30 : vector<4x16xf32>
      %32 = vector.extract_strided_slice %12 {offsets = [0, 3], sizes = [4, 1], strides = [1, 1]} : vector<4x4xf32> to vector<4x1xf32>
      %33 = vector.extract_strided_slice %14 {offsets = [3, 0], sizes = [1, 16], strides = [1, 1]} : vector<4x16xf32> to vector<1x16xf32>
      %34 = vector.broadcast %32 : vector<4x1xf32> to vector<4x16xf32>
      %35 = vector.broadcast %33 : vector<1x16xf32> to vector<4x16xf32>
      %36 = arith.mulf %34, %35 : vector<4x16xf32>
      %37 = arith.addf %31, %36 : vector<4x16xf32>
      %c0_10 = arith.constant 0 : index
      %c0_11 = arith.constant 0 : index
      %c0_12 = arith.constant 0 : index
      %38 = vector.load %arg17[%c0_10, %c0_11, %c0_12] : memref<1x4x16xf32, #tpu.memory_space<vmem>>, vector<1x4x16xf32>
      %39 = vector.shape_cast %38 : vector<1x4x16xf32> to vector<4x16xf32>
      %40 = vector.shape_cast %37 : vector<4x16xf32> to vector<1x4x16xf32>
      tpu.vector_store %arg17[%c0_10, %c0_11, %c0_12], %40 {strides = array<i32>} : memref<1x4x16xf32, #tpu.memory_space<vmem>>, vector<1x4x16xf32>,
    } else {
    }
    return
  }
  func.func @transform_0(%arg0: i32, %arg1: i32) -> (i32, i32, i32) {
    %c0_i32 = arith.constant 0 : i32
    %0 = arith.minsi %arg1, %c0_i32 : i32
    %c0_i32_0 = arith.constant 0 : i32
    %c0_i32_1 = arith.constant 0 : i32
    return %arg0, %0, %c0_i32_0 : i32, i32, i32
  }
  func.func @transform_1(%arg0: i32, %arg1: i32) -> (i32, i32, i32) {
    %c1_i32 = arith.constant 1 : i32
    %0 = arith.subi %arg1, %c1_i32 : i32
    %c0_i32 = arith.constant 0 : i32
    %1 = arith.maxsi %0, %c0_i32 : i32
    %c0_i32_0 = arith.constant 0 : i32
    %c0_i32_1 = arith.constant 0 : i32
    return %arg0, %c0_i32_0, %1 : i32, i32, i32
  }
  func.func @transform_2(%arg0: i32, %arg1: i32) -> (i32, i32) {
    %c0_i32 = arith.constant 0 : i32
    %c0_i32_0 = arith.constant 0 : i32
    %c0_i32_1 = arith.constant 0 : i32
    return %c0_i32, %c0_i32_0 : i32, i32
  }
  func.func @transform_3(%arg0: i32, %arg1: i32) -> (i32, i32) {
    %c0_i32 = arith.constant 0 : i32
    %c0_i32_0 = arith.constant 0 : i32
    %c0_i32_1 = arith.constant 0 : i32
    return %c0_i32, %c0_i32_0 : i32, i32
  }
  func.func @transform_4(%arg0: i32, %arg1: i32) -> (i32, i32) {
    %c0_i32 = arith.constant 0 : i32
    %c0_i32_0 = arith.constant 0 : i32
    %c0_i32_1 = arith.constant 0 : i32
    return %c0_i32, %c0_i32_0 : i32, i32
  }
  func.func @transform_5(%arg0: i32, %arg1: i32) -> (i32, i32) {
    %c0_i32 = arith.constant 0 : i32
    %c0_i32_0 = arith.constant 0 : i32
    %c0_i32_1 = arith.constant 0 : i32
    return %c0_i32, %c0_i32_0 : i32, i32
  }
  func.func @transform_6(%arg0: i32, %arg1: i32) -> (i32, i32) {
    %c0_i32 = arith.constant 0 : i32
    %c0_i32_0 = arith.constant 0 : i32
    %c0_i32_1 = arith.constant 0 : i32
    return %c0_i32, %c0_i32_0 : i32, i32
  }
  func.func @transform_7(%arg0: i32, %arg1: i32) -> (i32, i32) {
    %c0_i32 = arith.constant 0 : i32
    %c0_i32_0 = arith.constant 0 : i32
    %c0_i32_1 = arith.constant 0 : i32
    return %c0_i32, %c0_i32_0 : i32, i32
  }
  func.func @transform_8(%arg0: i32, %arg1: i32) -> (i32, i32) {
    %c0_i32 = arith.constant 0 : i32
    %c0_i32_0 = arith.constant 0 : i32
    %c0_i32_1 = arith.constant 0 : i32
    return %c0_i32, %c0_i32_0 : i32, i32
  }
  func.func @transform_9(%arg0: i32, %arg1: i32) -> (i32, i32) {
    %c0_i32 = arith.constant 0 : i32
    %c0_i32_0 = arith.constant 0 : i32
    %c0_i32_1 = arith.constant 0 : i32
    return %c0_i32, %c0_i32_0 : i32, i32
  }
  func.func @transform_10(%arg0: i32, %arg1: i32) -> (i32, i32) {
    %c0_i32 = arith.constant 0 : i32
    %c0_i32_0 = arith.constant 0 : i32
    %c0_i32_1 = arith.constant 0 : i32
    return %c0_i32, %c0_i32_0 : i32, i32
  }
  func.func @transform_11(%arg0: i32, %arg1: i32) -> (i32, i32) {
    %c0_i32 = arith.constant 0 : i32
    %c0_i32_0 = arith.constant 0 : i32
    %c0_i32_1 = arith.constant 0 : i32
    return %c0_i32, %c0_i32_0 : i32, i32
  }
  func.func @transform_12(%arg0: i32, %arg1: i32) -> (i32, i32, i32) {
    %c0_i32 = arith.constant 0 : i32
    %c0_i32_0 = arith.constant 0 : i32
    %c0_i32_1 = arith.constant 0 : i32
    %c0_i32_2 = arith.constant 0 : i32
    return %c0_i32, %c0_i32_0, %c0_i32_1 : i32, i32, i32
  }
  func.func @transform_13(%arg0: i32, %arg1: i32) -> (i32, i32, i32) {
    %c0_i32 = arith.constant 0 : i32
    %c0_i32_0 = arith.constant 0 : i32
    %c0_i32_1 = arith.constant 0 : i32
    %c0_i32_2 = arith.constant 0 : i32
    return %c0_i32, %c0_i32_0, %c0_i32_1 : i32, i32, i32
  }
  func.func @transform_14(%arg0: i32, %arg1: i32) -> (i32, i32, i32) {
    %c0_i32 = arith.constant 0 : i32
    %c0_i32_0 = arith.constant 0 : i32
    %c0_i32_1 = arith.constant 0 : i32
    return %arg0, %c0_i32, %c0_i32_0 : i32, i32, i32
  }
  func.func @transform_15(%arg0: i32, %arg1: i32) -> (i32, i32, i32) {
    %c1_i32 = arith.constant 1 : i32
    %0 = arith.subi %arg1, %c1_i32 : i32
    %c0_i32 = arith.constant 0 : i32
    %1 = arith.maxsi %0, %c0_i32 : i32
    %c0_i32_0 = arith.constant 0 : i32
    %c0_i32_1 = arith.constant 0 : i32
    return %arg0, %c0_i32_0, %1 : i32, i32, i32
  }
}

</mosaic_0001>

<bundles_post_ra>
// kernel: tpu_custom_call.1
= control target key start
LH: loop header
LB: loop body
LE: loop exit
PB: predicated region body
PF: predicated region fallthrough
CT: control target
= control target key end

     0   :  { %s8911_s0 = inlined_call_operand.vmem [shape: f32[2,16,4], index: 0, kind: input, shape index: {}]   ;;  %s8912_s1 = inlined_call_operand.vmem [shape: f32[2,4,16], index: 1, kind: input, shape index: {}]   ;;  %s8913_s2 = inlined_call_operand.vmem [shape: f32[4,64], index: 2, kind: input, shape index: {}]   ;;  %s8914_s3 = inlined_call_operand.vmem [shape: f32[1,64], index: 3, kind: input, shape index: {}]   ;;  %s8915_s4 = inlined_call_operand.vmem [shape: bf16[64,128], index: 4, kind: input, shape index: {}]   ;;  %s8916_s5 = inlined_call_operand.vmem [shape: f32[1,128], index: 5, kind: input, shape index: {}]   ;;  %s8917_s6 = inlined_call_operand.hbm [shape: bf16[128,1024], index: 6, kind: input, shape index: {}]   ;;  %s8918_s7 = inlined_call_operand.vmem [shape: f32[1,1024], index: 7, kind: input, shape index: {}]   ;;  %s8919_s8 = inlined_call_operand.vmem [shape: bf16[1024,512], index: 8, kind: input, shape index: {}]   ;;  %s8920_s9 = inlined_call_operand.vmem [shape: f32[1,512], index: 9, kind: input, shape index: {}]   ;;  %s8921_s10 = inlined_call_operand.vmem [shape: bf16[512,265], index: 10, kind: input, shape index: {}]   ;;  %s8922_s11 = inlined_call_operand.vmem [shape: f32[1,265], index: 11, kind: input, shape index: {}]   ;;  %s8923_s12 = inlined_call_operand.vmem [shape: f32[4,265,4], index: 12, kind: input, shape index: {}]   ;;  %s8924_s13 = inlined_call_operand.vmem [shape: f32[4,1,4], index: 13, kind: input, shape index: {}]   ;;  %s8925_s14 = inlined_call_operand.hbm [shape: f32[2,4,4], index: 14, kind: output, shape index: {0}]   ;;  %s8926_s15 = inlined_call_operand.hbm [shape: f32[2,4,16], index: 15, kind: output, shape index: {1}]  }
   0x1   :  { %8949 = sst [smem:[#allocation28_spill]] %s8911_s0 }
   0x2   :  { %8950 = sst [smem:[#allocation29_spill]] %s8912_s1 }
   0x3   :  { %8951 = sst [smem:[#allocation30_spill]] %s8913_s2 }
   0x4   :  { %8952 = sst [smem:[#allocation31_spill]] %s8917_s6 }
   0x5   :  { %8953 = sst [smem:[#allocation32_spill]] %s8922_s11 }
   0x6   :  { %8954 = sst [smem:[#allocation33_spill]] %s8923_s12 }
   0x7   :  { %8955 = sst [smem:[#allocation34_spill]] %s8924_s13 }
   0x8   :  { %8956 = sst [smem:[#allocation35_spill]] %s8925_s14 }
   0x9   :  { %8957 = sst [smem:[#allocation36_spill]] %s8926_s15 }
   0xa   :  { %21 = vsyncpa [#allocation5], 0 }
   0xb   :  { %22 = vsyncpa [#allocation6], 0 }
   0xc   :  { %24 = vsyncpa [#allocation6 + $0x1], 0 }
   0xd   :  { %25 = vsyncpa [#allocation9], 0 }
   0xe   :  { %27 = vsyncpa [#allocation9 + $0x1], 0  ;;  %s7009_s18 = smov 0   ;;  %s7011_s19 = smov 0  }
   0xf   :  { %s7013_s20 = smov 0   ;;  %s7015_s21 = smov 0  }
  0x10   :  { %s7017_s22 = smov 0   ;;  %s7019_s23 = smov 0  }
  0x11   :  { %s7021_s24 = smov 0   ;;  %s7023_s25 = smov 0  }
  0x12   :  { %s7025_s26 = smov 0   ;;  %s7027_s27 = smov 0  }
  0x13   :  { %s7029_s28 = smov 0  }
  0x14 LB: > { %8958 = sst [smem:[#allocation13_spill]] %s6871_s18  ;;  %s5268_s29 = sadd.s32 4294967295, %s6911_s28   ;;  %s6911_s28 = sphi %s7029_s28, %s33_s28   ;;  %s6907_s27 = sphi %s7027_s27, %s9008_s27   ;;  %s6903_s26 = sphi %s7025_s26, %s9007_s26   ;;  %s6899_s25 = sphi %s7023_s25, %s9013_s25   ;;  %s6895_s24 = sphi %s7021_s24, %s9005_s24   ;;  %s6891_s23 = sphi %s7019_s23, %s9004_s23   ;;  %s6887_s22 = sphi %s7017_s22, %s9012_s22   ;;  %s6883_s21 = sphi %s7015_s21, %s9011_s21   ;;  %s6879_s20 = sphi %s7013_s20, %s9002_s20   ;;  %s6875_s19 = sphi %s7011_s19, %s9010_s19   ;;  %s6871_s18 = sphi %s7009_s18, %s9009_s18  }
  0x15   : > { %8959 = sst [smem:[#allocation14_spill]] %s6879_s20  ;;  %s5269_s30 = sadd.s32 4294967294, %s6911_s28  }
  0x16   : > { %8960 = sst [smem:[#allocation15_spill]] %s6883_s21  ;;  %s42_s16 = sadd.s32 1, %s6903_s26 }
  0x17   : > { %8961 = sst [smem:[#allocation16_spill]] %s6891_s23  ;;  %s45_s17 = sadd.s32 1, %s6907_s27 }
  0x18   : > { %8962 = sst [smem:[#allocation17_spill]] %s6903_s26  ;;  %p43_p0 = scmp.ge.s32.totalorder %s42_s16, 2 }
  0x19   : > { %8963 = sst [smem:[#allocation18_spill]] %s6907_s27  ;;  %s370_s15 = sadd.s32 1, %s6891_s23 }
  0x1a   : > { %8964 = sst [smem:[#allocation19_spill]] %s6911_s28  ;;  %p380_p1 = scmp.ne.s32.totalorder %s6891_s23, %s6887_s22 }
  0x1b   : > { %p7071_p2 = scmp.eq.s32.totalorder %s5268_s29, 3  ;;  %s9015_s16 = smov (%p43_p0, %s42_s16), 0 }
  0x1c   : > { %8966 = sst [smem:[#allocation20_spill]] %s9015_s16  ;;  %s9017_s17 = smov (!%p43_p0, %s45_s17), %s6907_s27 }
  0x1d   : > { %p7080_p3 = por %p7071_p2, %p380_p1  ;;  %p386_p4 = scmp.ne.s32.totalorder %s6887_s22, %s6883_s21 }
  0x1e   : > { %p47_p5 = scmp.ge.s32.totalorder %s9017_s17, 2  ;;  %p387_p6 = scmp.eq.s32.totalorder %s5269_s30, 3 }
  0x1f   : > { %s8967_s26 = scalar_select %p7080_p3, 1, 0 }
  0x20   : > { %s9019_s17 = smov (%p47_p5, %s9017_s17), 0  ;;  %p7088_p7 = por %p387_p6, %p386_p4 }
  0x21   : > { %8968 = sst [smem:[#allocation21_spill]] %s8967_s26  ;;  %s367_s11 = ssub.s32 %s6907_s27, %s9019_s17 }
  0x22   : > { %8969 = sst [smem:[#allocation22_spill]] %s9019_s17  ;;  %p368_p8 = scmp.eq.s32.totalorder %s367_s11, 0 }
  0x23   : > { %s8970_s13 = scalar_select %p7088_p7, 1, 0 }
  0x24   : > { %s404_s16 = sadd.s32 1, %s6879_s20  ;;  %p414_p9 = scmp.ne.s32.totalorder %s6879_s20, %s6875_s19 }
  0x25   : > { %8971 = sst [smem:[#allocation23_spill]] %s8970_s13  ;;  %p420_p10 = scmp.ne.s32.totalorder %s6875_s19, %s6871_s18 }
  0x26   : > { %s7096_s12 = scalar_select %p368_p8, %s6891_s23, %s370_s15  }
  0x27   : > { %p5274_p11 = scmp.ge.s32.totalorder %s6911_s28, 1  ;;  %p7105_p12 = por %p414_p9, %p7071_p2 }
  0x28   : > { %8972 = sst [smem:[#allocation24_spill]] %s7096_s12  ;;  %p7109_p13 = por %p420_p10, %p387_p6 }
  0x29   : > { %s8973_s21 = scalar_select %p7105_p12, 1, 0 }
  0x2a   : > { %s8975_s30 = scalar_select %p7109_p13, 1, 0 }
  0x2b   : > { %8974 = sst [smem:[#allocation25_spill]] %s8973_s21  ;;  %p428_p0 = scmp.lt.s32.totalorder %s6911_s28, 5 }
  0x2c   : > { %8976 = sst [smem:[#allocation26_spill]] %s8975_s30  ;;  %p7121_p4 = scmp.eq.s32.totalorder %s5268_s29, 0 }
  0x2d   : > { %s7115_s26 = scalar_select %p368_p8, %s6879_s20, %s404_s16  }
  0x2e   : > { %p7117_p1 = pnand %p5274_p11, %p428_p0  ;;  %s6913_s14 = smov [#allocation4]  }
  0x2f   : > { %8977 = sst [smem:[#allocation27_spill]] %s7115_s26  ;;  %s452_s17 = sshll.u32 %s6913_s14, 4  ;;  %s453_s17 = int_to_ptr.vmem [resolvable:$true] %s452_s17 }
  0x30   : > { %p6098_p2 = pneg %p7117_p1  ;;  %s6746_s16 = scalar_lea.vmem %s453_s17, 8192 }
  0x31   : > { %p6747_p8 = scmp.ne.s32.totalorder %s453_s17, %s6746_s16  ;;  %p6754_p11 = scmp.lt.s32.totalorder %s453_s17, %s453_s17 }
  0x32   : > { %p6099_p5 = pnand %p7121_p4, %p6098_p2  ;;  %p6755_p0 = scmp.lt.s32.totalorder %s6746_s16, %s6746_s16 }
  0x34   : > { %p6737_p6 = pneg %p6099_p5  ;;  %p6756_p13 = por %p6755_p0, %p6754_p11 }
  0x36   : > { %p6749_p9 = pnand %p6747_p8, %p6737_p6 }
  0x38   : > { %p6750_p10 = pneg %p6749_p9 }
  0x3a   : > { %p6757_p7 = pnand %p6756_p13, %p6750_p10 }
  0x3c   : > { %6760 = shalt.err (!%p6757_p7)
}
  0x3d   : > { %s6914_s29 = smov 512   ;;  %s6915_s27 = smov 32  }
  0x3e   : > { %s8980_s6 = sld [smem:[#allocation31_spill]] }
  0x40   : > { %522 = sbr.rel (%p7117_p1) target bundleno = 1945 (0x799), region = 76 }
  0x44   : > { %6101 = dma.hbm_to_vmem [thread:$0]  (!%p6099_p5), %s8980_s6, 8192, %s453_s17, [#allocation5], %s6914_s29, %s6914_s29, %s6915_s27  }
  0x45   : > { %6858 = dma.done.wait (%p7121_p4), [#allocation5], 8192  }
  0x46   : > { %6860 = vsyncadd (%p7121_p4), [#allocation5], 4294959104  ;;  %s8939_s14 = sand.u32 1, %s6887_s22   ;;  %s8942_s12 = sand.u32 1, %s6875_s19  }
  0x47   : > { %s7142_s23 = sshll.u32 %s8939_s14, 2  ;;  %s7146_s27 = sshll.u32 %s8942_s12, 2 }
  0x48   : > { %p591_p7 = scmp.lt.s32.totalorder %s6895_s24, 0  ;;  %p594_p13 = scmp.lt.s32.totalorder %s6899_s25, 1 }
  0x49   : > { %s8981_s1 = sld [smem:[#allocation29_spill]]  ;;  %s583_s28 = scalar_lea.vmem [#allocation7], %s7142_s23 }
  0x4a   : > { %s592_s17 = scalar_select %p591_p7, %s6895_s24, 0 }
  0x4b   : > { %s595_s11 = scalar_select %p594_p13, %s6899_s25, 1 }
  0x4c   : > { %s5281_s15 = sshll.u32 %s592_s17, 1  ;;  %s8982_s0 = sld [smem:[#allocation28_spill]] }
  0x4d   : > { %p596_p1 = scmp.lt.s32.totalorder %s5281_s15, 1  ;;  %s5282_s16 = sshll.u32 %s595_s11, 1 }
  0x4e   : > { %s5290_s29 = sshll.u32 %s595_s11, 2  ;;  %s8948_s21 = scalar_lea.vmem [#allocation8], %s7146_s27 }
  0x4f   : > { %s9021_s15 = smov (!%p596_p1, %s5281_s15), 1  ;;  %s7155_s20 = scalar_lea.vmem %s8981_s1, %s5290_s29 }
  0x50   : > { %s599_s14 = sadd.s32 %s5282_s16, %s9021_s15  ;;  %p5291_p4 = scmp.ne.s32.totalorder %s6895_s24, 0 }
  0x51   : > { %s5283_s30 = sshll.u32 %s599_s14, 3 }
  0x52   : > { %s601_s13 = scalar_lea.vmem %s8982_s0, %s5283_s30  ;;  %625 = sbr.rel (%p5291_p4) target bundleno = 89 (0x59), region = 84 }
  0x57   : > { %v6916_v0 = vmov -inf  }
  0x58   : > { %626 = vst [vmem:[#allocation2] sm:$0xff] %v6916_v0 }
  0x59 PF: > { %p5292_p2 = scmp.ge.s32.totalorder %s6895_s24, 1 }
  0x5a   : > { %s8983_s2 = sld [smem:[#allocation30_spill]] (!%p5292_p2) }
  0x5b   : > { %630 = sbr.rel (%p5292_p2) target bundleno = 765 (0x2fd), region = 88 }
  0x60   : > { %v633_v1 = vld [vmem:[%s8983_s2] sm:$0xf]  ;;  %vm648_vm0 = vcmask 1043456   ;;  %vm641_vm1 = vcmask 31744   ;;  %v632_v3 = vld [vmem:[%s601_s13 + $0x8] sm:$0xff]  ;;  %v6214_v4 = vld [vmem:[%s8915_s4 + $0x18] sm:$0xff]  }
  0x61   : > { %v631_v2 = vld [vmem:[%s601_s13] sm:$0xff]  ;;  %6045 = vmatprep.subr.msk.mxu0 %vm648_vm0, %v633_v1  ;;  %v6917_v5 = vmov 0.0   ;;  %v6215_v6 = vld [vmem:[%s8915_s4 + $0x10] sm:$0xff]   ;;  %v6216_v7 = vld [vmem:[%s8915_s4 + $0x8] sm:$0xff]   ;;  %vm6918_vm2 = vmmov 0   ;;  %vm769_vm3 = vcmask 523264  }
  0x62   : > { %6047 = vmatprep.mubr.msk.f32.mxu0 %vm641_vm1, %v631_v2  ;;  %6046 = vmatpush3.msk.msra.mxu0 %vm648_vm0, %v633_v1  ;;  %v6217_v8 = vld [vmem:[%s8915_s4] sm:$0xff]   ;;  %v873_v9 = vld [vmem:[#allocation4 + $0x1c0] sm:$0xff]  ;;  %v874_v11 = vld [vmem:[#allocation4 + $0x1c8] sm:$0xff] }
  0x63   : > { %6050 = vmatprep.subr.bf16.mxu1 %v6917_v5  ;;  %6048 = vmatmul.mubr.msk.f32.vlgmr.msra.gmra.mxu0 %vm641_vm1, %v632_v3  ;;  %v877_v10 = vld [vmem:[#allocation4 + $0x1e0] sm:$0xff]  ;;  %v878_v14 = vld [vmem:[#allocation4 + $0x1e8] sm:$0xff]  ;;  %v5293_v37 = vld [vmem:[%s8914_s3] ss:$0 sm:$0xff] }
  0x64   : > { %6051 = vmatpush3.bf16.msra.mxu1 %v6214_v4  ;;  %6058 = vmatprep.mubr.msk.bf16.mxu1 %vm6918_vm2, %v6917_v5  ;;  %v5359_v12 = vcombine.low %v873_v9, %v877_v10  ;;  %v5360_v13 = vcombine.high %v873_v9, %v877_v10  ;;  %v865_v15 = vld [vmem:[#allocation4 + $0x180] sm:$0xff]  ;;  %v5361_v17 = vcombine.low %v874_v11, %v878_v14  ;;  %v866_v42 = vld [vmem:[#allocation4 + $0x188] sm:$0xff] }
  0x65   : > { %6052 = vmatprep.subr.bf16.mxu1 %v6917_v5  ;;  %v869_v16 = vld [vmem:[#allocation4 + $0x1a0] sm:$0xff]  ;;  %v5362_v18 = vcombine.high %v874_v11, %v878_v14  ;;  %v870_v43 = vld [vmem:[#allocation4 + $0x1a8] sm:$0xff] }
  0x66   : > { %v5352_v19 = vcombine.high %v865_v15, %v869_v16  ;;  %1243 = vmatprep.subr.bf16.mxu0 %v5360_v13  ;;  %v5351_v20 = vcombine.low %v865_v15, %v869_v16  ;;  %v857_v21 = vld [vmem:[#allocation4 + $0x140] sm:$0xff]  ;;  %v5354_v47 = vcombine.high %v866_v42, %v870_v43  ;;  %v858_v48 = vld [vmem:[#allocation4 + $0x148] sm:$0xff]  ;;  %v5353_v50 = vcombine.low %v866_v42, %v870_v43  ;;  %v859_v42 = vld [vmem:[#allocation4 + $0x150] sm:$0xff] }
  0x67   : > { %1244 = vmatpush1.bf16.msra.mxu0 %v5359_v12  ;;  %v861_v22 = vld [vmem:[#allocation4 + $0x160] sm:$0xff]  ;;  %v862_v49 = vld [vmem:[#allocation4 + $0x168] sm:$0xff]  ;;  %v863_v43 = vld [vmem:[#allocation4 + $0x170] sm:$0xff] }
  0x68   : > { %6053 = vmatpush3.bf16.msra.mxu1 %v6215_v6  ;;  %1245 = vmatprep.subr.bf16.mxu0 %v5352_v19  ;;  %v5344_v23 = vcombine.high %v857_v21, %v861_v22  ;;  %v5343_v24 = vcombine.low %v857_v21, %v861_v22  ;;  %v849_v25 = vld [vmem:[#allocation4 + $0x100] sm:$0xff]  ;;  %v5346_v51 = vcombine.high %v858_v48, %v862_v49  ;;  %v850_v52 = vld [vmem:[#allocation4 + $0x108] sm:$0xff]  ;;  %v876_v19 = vld [vmem:[#allocation4 + $0x1d8] sm:$0xff] }
  0x69   : > { %6054 = vmatprep.subr.bf16.mxu1 %v6917_v5  ;;  %v853_v26 = vld [vmem:[#allocation4 + $0x120] sm:$0xff]  ;;  %v854_v53 = vld [vmem:[#allocation4 + $0x128] sm:$0xff]  ;;  %v5345_v54 = vcombine.low %v858_v48, %v862_v49  ;;  %v880_v21 = vld [vmem:[#allocation4 + $0x1f8] sm:$0xff]  ;;  %v5348_v48 = vcombine.high %v859_v42, %v863_v43 }
  0x6a   : > { %v5336_v27 = vcombine.high %v849_v25, %v853_v26  ;;  %v5335_v28 = vcombine.low %v849_v25, %v853_v26  ;;  %v841_v29 = vld [vmem:[#allocation4 + $0xc0] sm:$0xff]  ;;  %v5338_v55 = vcombine.high %v850_v52, %v854_v53  ;;  %v842_v56 = vld [vmem:[#allocation4 + $0xc8] sm:$0xff]  ;;  %v5337_v58 = vcombine.low %v850_v52, %v854_v53  ;;  %v5297_v26 = vld [vmem:[%s8916_s5] ss:$0 sm:$0xff] }
  0x6b   : > { %1246 = vmatpush1.bf16.msra.mxu0 %v5351_v20  ;;  %v845_v30 = vld [vmem:[#allocation4 + $0xe0] sm:$0xff]  ;;  %v846_v57 = vld [vmem:[#allocation4 + $0xe8] sm:$0xff]  ;;  %v6919_v25 = vmov 0   ;;  %v852_v52 = vld [vmem:[#allocation4 + $0x118] sm:$0xff] }
  0x6c   : > { %6055 = vmatpush3.bf16.msra.mxu1 %v6216_v7  ;;  %1247 = vmatprep.subr.bf16.mxu0 %v5344_v23  ;;  %v5328_v31 = vcombine.high %v841_v29, %v845_v30  ;;  %v5327_v32 = vcombine.low %v841_v29, %v845_v30  ;;  %v833_v33 = vld [vmem:[#allocation4 + $0x80] sm:$0xff]  ;;  %v5330_v59 = vcombine.high %v842_v56, %v846_v57  ;;  %v834_v60 = vld [vmem:[#allocation4 + $0x88] sm:$0xff]  ;;  %v856_v53 = vld [vmem:[#allocation4 + $0x138] sm:$0xff] }
  0x6d   : > { %6056 = vmatprep.subr.bf16.mxu1 %v6917_v5  ;;  %v837_v34 = vld [vmem:[#allocation4 + $0xa0] sm:$0xff]  ;;  %v838_v61 = vld [vmem:[#allocation4 + $0xa8] sm:$0xff]  ;;  %v5329_v62 = vcombine.low %v842_v56, %v846_v57  ;;  %v5365_v23 = vcombine.low %v876_v19, %v880_v21  ;;  %1275 = vmatprep.mubr.bf16.mxu0 %v6919_v25  ;;  %v5342_v57 = vcombine.high %v852_v52, %v856_v53 }
  0x6e   : > { %v5320_v35 = vcombine.high %v833_v33, %v837_v34  ;;  %v5319_v36 = vcombine.low %v833_v33, %v837_v34  ;;  %v5322_v63 = vcombine.high %v834_v60, %v838_v61  ;;  %v5321_v0 = vcombine.low %v834_v60, %v838_v61  ;;  %v825_v1 = vld [vmem:[#allocation4 + $0x40] sm:$0xff]  ;;  %v826_v3 = vld [vmem:[#allocation4 + $0x48] sm:$0xff]  ;;  %v871_v34 = vld [vmem:[#allocation4 + $0x1b0] sm:$0xff] }
  0x6f   : > { %1248 = vmatpush1.bf16.msra.mxu0 %v5343_v24  ;;  %v829_v2 = vld [vmem:[#allocation4 + $0x60] sm:$0xff]  ;;  %v830_v5 = vld [vmem:[#allocation4 + $0x68] sm:$0xff]  ;;  %v5366_v24 = vcombine.high %v876_v19, %v880_v21  ;;  %v844_v60 = vld [vmem:[#allocation4 + $0xd8] sm:$0xff] }
  0x70   : > { %6057 = vmatpush3.bf16.msra.mxu1 %v6217_v8  ;;  %1249 = vmatprep.subr.bf16.mxu0 %v5336_v27  ;;  %v5312_v4 = vcombine.high %v825_v1, %v829_v2  ;;  %v5311_v6 = vcombine.low %v825_v1, %v829_v2  ;;  %v5313_v7 = vcombine.low %v826_v3, %v830_v5  ;;  %v817_v9 = vld [vmem:[#allocation4] sm:$0xff]  ;;  %v818_v11 = vld [vmem:[#allocation4 + $0x8] sm:$0xff]  ;;  %v848_v61 = vld [vmem:[#allocation4 + $0xf8] sm:$0xff] }
  0x71   : > { %1286 = vmatprep.subr.bf16.mxu1 %v5362_v18  ;;  %v5314_v8 = vcombine.high %v826_v3, %v830_v5  ;;  %v821_v10 = vld [vmem:[#allocation4 + $0x20] sm:$0xff]  ;;  %v822_v13 = vld [vmem:[#allocation4 + $0x28] sm:$0xff]  ;;  %v879_v18 = vld [vmem:[#allocation4 + $0x1f0] sm:$0xff]  ;;  %v5334_v1 = vcombine.high %v844_v60, %v848_v61 }
  0x72   : > { %v5304_v12 = vcombine.high %v817_v9, %v821_v10  ;;  %v5303_v14 = vcombine.low %v817_v9, %v821_v10  ;;  %v5305_v15 = vcombine.low %v818_v11, %v822_v13  ;;  %v5306_v16 = vcombine.high %v818_v11, %v822_v13  ;;  %v835_v2 = vld [vmem:[#allocation4 + $0x90] sm:$0xff]  ;;  %v840_v5 = vld [vmem:[#allocation4 + $0xb8] sm:$0xff] }
  0x73   : > { %1250 = vmatpush1.bf16.msra.mxu0 %v5335_v28  ;;  %v839_v3 = vld [vmem:[#allocation4 + $0xb0] sm:$0xff]  ;;  %v832_v13 = vld [vmem:[#allocation4 + $0x78] sm:$0xff] }
  0x74   : > { %1251 = vmatprep.subr.bf16.mxu0 %v5328_v31  ;;  %v827_v10 = vld [vmem:[#allocation4 + $0x50] sm:$0xff]  ;;  %v824_v21 = vld [vmem:[#allocation4 + $0x38] sm:$0xff] }
  0x75   : > { %v831_v11 = vld [vmem:[#allocation4 + $0x70] sm:$0xff] }
  0x76   : > { %v823_v19 = vld [vmem:[#allocation4 + $0x30] sm:$0xff] }
  0x77   : > { %1252 = vmatpush1.bf16.msra.mxu0 %v5327_v32  ;;  %v867_v32 = vld [vmem:[#allocation4 + $0x190] sm:$0xff] }
  0x78   : > { %1253 = vmatprep.subr.bf16.mxu0 %v5320_v35  ;;  %v868_v35 = vld [vmem:[#allocation4 + $0x198] sm:$0xff] }
  0x7b   : > { %1254 = vmatpush1.bf16.msra.mxu0 %v5319_v36  ;;  %v872_v36 = vld [vmem:[#allocation4 + $0x1b8] sm:$0xff] }
  0x7c   : > { %1255 = vmatprep.subr.bf16.mxu0 %v5312_v4  ;;  %v836_v4 = vld [vmem:[#allocation4 + $0x98] sm:$0xff] }
  0x7d   : > { %v5326_v9 = vcombine.high %v836_v4, %v840_v5 }
  0x7f   : > { %1256 = vmatpush1.bf16.msra.mxu0 %v5311_v6 }
  0x80   : > { %1257 = vmatprep.subr.bf16.mxu0 %v5304_v12  ;;  %v828_v12 = vld [vmem:[#allocation4 + $0x58] sm:$0xff] }
  0x83   : > { %1258 = vmatpush1.bf16.msra.mxu0 %v5303_v14  ;;  %v5323_v14 = vcombine.low %v835_v2, %v839_v3 }
 0x123   : > { %v6049_v38 = vpop.f32.mrf.mxu0 }
 0x124   : > { %v724_v39 = vadd.f32 %v6049_v38, %v5293_v37 }
 0x125   : > { %v718_v40 = vpop.f32.mrf.mxu0 }
 0x126   : > { %v719_v41 = vadd.f32 %v5293_v37, %v718_v40  ;;  %v728_v44 = vmax.f32 %v724_v39, 0.0  ;;  %v5356_v40 = vcombine.high %v867_v32, %v871_v34 }
 0x128   : > { %v727_v45 = vmax.f32 %v719_v41, 0.0  ;;  %v5358_v41 = vcombine.high %v868_v35, %v872_v36 }
 0x12a   : > { %v729_v46 = vpack.c.bf16 %v728_v44, %v727_v45  ;;  %v860_v44 = vld [vmem:[#allocation4 + $0x158] sm:$0xff] }
 0x12b   : > { %v864_v45 = vld [vmem:[#allocation4 + $0x178] sm:$0xff] }
 0x12c   : > { %6059 = vmatmul.mubr.msk.bf16.vlgmr.msra.gmra.mxu1 %vm769_vm3, %v729_v46  ;;  %v5355_v46 = vcombine.low %v867_v32, %v871_v34  ;;  %v5350_v49 = vcombine.high %v860_v44, %v864_v45 }
 0x12d   : > { %1287 = vmatpush1.bf16.msra.mxu1 %v5361_v17  ;;  %v875_v17 = vld [vmem:[#allocation4 + $0x1d0] sm:$0xff]  ;;  %1318 = vmatprep.mubr.bf16.mxu1 %v6919_v25 }
 0x12e   : > { %1288 = vmatprep.subr.bf16.mxu1 %v5354_v47  ;;  %v5364_v20 = vcombine.high %v875_v17, %v879_v18  ;;  %v5363_v22 = vcombine.low %v875_v17, %v879_v18  ;;  %v5357_v47 = vcombine.low %v868_v35, %v872_v36  ;;  %v5318_v17 = vcombine.high %v828_v12, %v832_v13  ;;  %v819_v18 = vld [vmem:[#allocation4 + $0x10] sm:$0xff] }
 0x130   : > { %1329 = vmatprep.subr.bf16.mxu0 %v5364_v20  ;;  %v820_v20 = vld [vmem:[#allocation4 + $0x18] sm:$0xff] }
 0x131   : > { %1289 = vmatpush1.bf16.msra.mxu1 %v5353_v50  ;;  %v851_v50 = vld [vmem:[#allocation4 + $0x110] sm:$0xff] }
 0x132   : > { %1290 = vmatprep.subr.bf16.mxu1 %v5346_v51  ;;  %v855_v51 = vld [vmem:[#allocation4 + $0x130] sm:$0xff] }
 0x133   : > { %v5340_v56 = vcombine.high %v851_v50, %v855_v51 }
 0x135   : > { %1291 = vmatpush1.bf16.msra.mxu1 %v5345_v54  ;;  %v5347_v54 = vcombine.low %v859_v42, %v863_v43 }
 0x136   : > { %1292 = vmatprep.subr.bf16.mxu1 %v5338_v55  ;;  %v5349_v55 = vcombine.low %v860_v44, %v864_v45 }
 0x139   : > { %1293 = vmatpush1.bf16.msra.mxu1 %v5337_v58  ;;  %v843_v58 = vld [vmem:[#allocation4 + $0xd0] sm:$0xff] }
 0x13a   : > { %1294 = vmatprep.subr.bf16.mxu1 %v5330_v59  ;;  %v847_v59 = vld [vmem:[#allocation4 + $0xf0] sm:$0xff] }
 0x13b   : > { %v5331_v6 = vcombine.low %v843_v58, %v847_v59 }
 0x13d   : > { %1295 = vmatpush1.bf16.msra.mxu1 %v5329_v62  ;;  %v5339_v62 = vcombine.low %v851_v50, %v855_v51 }
 0x13e   : > { %1296 = vmatprep.subr.bf16.mxu1 %v5322_v63  ;;  %v5341_v63 = vcombine.low %v852_v52, %v856_v53 }
 0x141   : > { %1297 = vmatpush1.bf16.msra.mxu1 %v5321_v0  ;;  %v5332_v0 = vcombine.high %v843_v58, %v847_v59 }
 0x142   : > { %1298 = vmatprep.subr.bf16.mxu1 %v5314_v8  ;;  %v5324_v8 = vcombine.high %v835_v2, %v839_v3 }
 0x145   : > { %1299 = vmatpush1.bf16.msra.mxu1 %v5313_v7  ;;  %v5333_v7 = vcombine.low %v844_v60, %v848_v61 }
 0x146   : > { %1300 = vmatprep.subr.bf16.mxu1 %v5306_v16  ;;  %v5316_v16 = vcombine.high %v827_v10, %v831_v11 }
 0x149   : > { %1301 = vmatpush1.bf16.msra.mxu1 %v5305_v15  ;;  %v5325_v15 = vcombine.low %v836_v4, %v840_v5 }
 0x14a   : > { %1372 = vmatprep.subr.bf16.mxu1 %v5366_v24  ;;  %v5308_v24 = vcombine.high %v819_v18, %v823_v19 }
 0x1ec   : > { %v807_v27 = vpop.f32.mrf.mxu1 }
 0x1ed   : > { %v808_v29 = vadd.f32 %v5297_v26, %v807_v27  ;;  %v5309_v27 = vcombine.low %v820_v20, %v824_v21 }
 0x1ee   : > { %v6060_v28 = vpop.f32.mrf.mxu1 }
 0x1ef   : > { %v814_v37 = vmax.f32 %v808_v29, 0.0 }
 0x1f0   : > { %v810_v30 = vpop.f32.mrf.mxu1 }
 0x1f1   : > { %v811_v31 = vadd.f32 %v5297_v26, %v810_v30  ;;  %v5307_v26 = vcombine.low %v819_v18, %v823_v19  ;;  %v883_v30 = vlaneseq }
 0x1f2   : > { %v6061_v33 = vpop.f32.mrf.mxu1 }
 0x1f3   : > { %v815_v38 = vmax.f32 %v811_v31, 0.0  ;;  %v7193_v33 = vshrl.u32 %v883_v30, 7 }
 0x1f5   : > { %v7187_v39 = vpack.c.bf16 %v815_v38, %v814_v37  ;;  %v889_v36 = vsub.s32 1, %v7193_v33  ;;  %v897_v37 = vsub.s32 3, %v7193_v33  ;;  %v885_v38 = vsub.s32 0, %v7193_v33 }
 0x1f6   : > { %v901_v5 = vsub.s32 4, %v7193_v33 }
 0x1f7   : > { %1276 = vmatmul.mubr.bf16.vlgmr.msra.gmra.mxu0 %v7187_v39  ;;  %1319 = vmatmul.mubr.bf16.vlgmr.msra.gmra.mxu1 %v7187_v39 }
 0x1f8   : > { %1330 = vmatpush1.bf16.msra.mxu0 %v5363_v22  ;;  %1373 = vmatpush1.bf16.msra.mxu1 %v5365_v23  ;;  %v5315_v22 = vcombine.low %v827_v10, %v831_v11  ;;  %v5317_v23 = vcombine.low %v828_v12, %v832_v13  ;;  %v913_v10 = vsub.s32 7, %v7193_v33 }
 0x1f9   : > { %1331 = vmatprep.subr.bf16.mxu0 %v5356_v40  ;;  %1374 = vmatprep.subr.bf16.mxu1 %v5358_v41  ;;  %v893_v40 = vsub.s32 2, %v7193_v33 }
 0x1fa   : > { %1361 = vmatprep.mubr.bf16.mxu0 %v6919_v25  ;;  %1404 = vmatprep.mubr.bf16.mxu1 %v6919_v25  ;;  %v5310_v25 = vcombine.high %v820_v20, %v824_v21 }
 0x1fc   : > { %1332 = vmatpush1.bf16.msra.mxu0 %v5355_v46  ;;  %1375 = vmatpush1.bf16.msra.mxu1 %v5357_v47 }
 0x1fd   : > { %1333 = vmatprep.subr.bf16.mxu0 %v5348_v48  ;;  %1376 = vmatprep.subr.bf16.mxu1 %v5350_v49 }
 0x200   : > { %1334 = vmatpush1.bf16.msra.mxu0 %v5347_v54  ;;  %1377 = vmatpush1.bf16.msra.mxu1 %v5349_v55 }
 0x201   : > { %1335 = vmatprep.subr.bf16.mxu0 %v5340_v56  ;;  %1378 = vmatprep.subr.bf16.mxu1 %v5342_v57 }
 0x204   : > { %1336 = vmatpush1.bf16.msra.mxu0 %v5339_v62  ;;  %1379 = vmatpush1.bf16.msra.mxu1 %v5341_v63 }
 0x205   : > { %1337 = vmatprep.subr.bf16.mxu0 %v5332_v0  ;;  %1380 = vmatprep.subr.bf16.mxu1 %v5334_v1 }
 0x208   : > { %1338 = vmatpush1.bf16.msra.mxu0 %v5331_v6  ;;  %1381 = vmatpush1.bf16.msra.mxu1 %v5333_v7  ;;  %v909_v6 = vsub.s32 6, %v7193_v33 }
 0x209   : > { %1339 = vmatprep.subr.bf16.mxu0 %v5324_v8  ;;  %1382 = vmatprep.subr.bf16.mxu1 %v5326_v9  ;;  %v905_v9 = vsub.s32 5, %v7193_v33 }
 0x20c   : > { %1340 = vmatpush1.bf16.msra.mxu0 %v5323_v14  ;;  %1383 = vmatpush1.bf16.msra.mxu1 %v5325_v15 }
 0x20d   : > { %1341 = vmatprep.subr.bf16.mxu0 %v5316_v16  ;;  %1384 = vmatprep.subr.bf16.mxu1 %v5318_v17 }
 0x210   : > { %1342 = vmatpush1.bf16.msra.mxu0 %v5315_v22  ;;  %1385 = vmatpush1.bf16.msra.mxu1 %v5317_v23 }
 0x211   : > { %1343 = vmatprep.subr.bf16.mxu0 %v5308_v24  ;;  %1386 = vmatprep.subr.bf16.mxu1 %v5310_v25 }
 0x214   : > { %1344 = vmatpush1.bf16.msra.mxu0 %v5307_v26  ;;  %1387 = vmatpush1.bf16.msra.mxu1 %v5309_v27 }
 0x217   : > { %1362 = vmatmul.mubr.bf16.vlgmr.msra.gmra.mxu0 %v7187_v39  ;;  %1405 = vmatmul.mubr.bf16.vlgmr.msra.gmra.mxu1 %v7187_v39  ;;  %v881_v39 = vld [vmem:[%s8918_s7] sm:$0xff] }
 0x218   : > { %v890_v43 = vrot.slane %v881_v39, %v889_v36  ;;  %v898_v44 = vrot.slane %v881_v39, %v897_v37  ;;  %v886_v45 = vrot.slane %v881_v39, %v885_v38  ;;  %v894_v46 = vrot.slane %v881_v39, %v893_v40 }
 0x219   : > { %v902_v13 = vrot.slane %v881_v39, %v901_v5  ;;  %v910_v14 = vrot.slane %v881_v39, %v909_v6  ;;  %v906_v19 = vrot.slane %v881_v39, %v905_v9  ;;  %v914_v20 = vrot.slane %v881_v39, %v913_v10 }
 0x2b7   : > { %v1277_v28 = vpop.f32.mrf.mxu0  ;;  %v1320_v29 = vpop.f32.mrf.mxu1 }
 0x2b8   : > { %v1278_v53 = vadd.f32 %v1277_v28, %v886_v45  ;;  %v1321_v54 = vadd.f32 %v1320_v29, %v894_v46 }
 0x2b9   : > { %v1279_v31 = vpop.f32.mrf.mxu0  ;;  %v1322_v32 = vpop.f32.mrf.mxu1 }
 0x2ba   : > { %v1280_v49 = vadd.f32 %v1279_v31, %v890_v43  ;;  %v1323_v50 = vadd.f32 %v1322_v32, %v898_v44  ;;  %v1415_v61 = vmax.f32 %v1278_v53, 0.0  ;;  %v1417_v62 = vmax.f32 %v1321_v54, 0.0 }
 0x2bb   : > { %v1281_v34 = vpop.f32.mrf.mxu0  ;;  %v1324_v35 = vpop.f32.mrf.mxu1 }
 0x2bc   : > { %v1282_v51 = vadd.f32 %v1281_v34, %v886_v45  ;;  %v1325_v52 = vadd.f32 %v1324_v35, %v894_v46  ;;  %v1416_v57 = vmax.f32 %v1280_v49, 0.0  ;;  %v1418_v58 = vmax.f32 %v1323_v50, 0.0 }
 0x2bd   : > { %v1283_v41 = vpop.f32.mrf.mxu0  ;;  %v1326_v42 = vpop.f32.mrf.mxu1 }
 0x2be   : > { %v1284_v47 = vadd.f32 %v1283_v41, %v890_v43  ;;  %v1327_v48 = vadd.f32 %v1326_v42, %v898_v44  ;;  %v1423_v59 = vmax.f32 %v1282_v51, 0.0  ;;  %v1425_v60 = vmax.f32 %v1325_v52, 0.0 }
 0x2c0   : > { %v1424_v55 = vmax.f32 %v1284_v47, 0.0  ;;  %v1426_v56 = vmax.f32 %v1327_v48, 0.0  ;;  %v1432_v1 = vmax.f32 %v1415_v61, %v1423_v59  ;;  %v1446_v2 = vmax.f32 %v1417_v62, %v1425_v60 }
 0x2c2   : > { %v1439_v63 = vmax.f32 %v1416_v57, %v1424_v55  ;;  %v1453_v0 = vmax.f32 %v1418_v58, %v1426_v56  ;;  %v1433_v7 = vrot.slane %v1432_v1, 4  ;;  %v1447_v8 = vrot.slane %v1446_v2, 4 }
 0x2c3   : > { %v6920_v55 = vmov 1966171168  }
 0x2c4   : > { %v1440_v3 = vrot.slane %v1439_v63, 4  ;;  %v1454_v4 = vrot.slane %v1453_v0, 4  ;;  %v1434_v15 = vmax.f32 %v1432_v1, %v1433_v7  ;;  %v1448_v16 = vmax.f32 %v1446_v2, %v1447_v8 }
 0x2c5   : > { %v1501_v56 = vunpack.c.l.s4 %v6920_v55 }
 0x2c6   : > { %v1441_v11 = vmax.f32 %v1439_v63, %v1440_v3  ;;  %v1455_v12 = vmax.f32 %v1453_v0, %v1454_v4  ;;  %v1435_v27 = vrot.slane %v1434_v15, 2  ;;  %v1449_v28 = vrot.slane %v1448_v16, 2 }
 0x2c7   : > { %v1502_v5 = vunpack.c.0.s8 %v1501_v56 }
 0x2c8   : > { %v1442_v21 = vrot.slane %v1441_v11, 2  ;;  %v1456_v22 = vrot.slane %v1455_v12, 2  ;;  %v1436_v46 = vmax.f32 %v1434_v15, %v1435_v27  ;;  %v1450_v47 = vmax.f32 %v1448_v16, %v1449_v28 }
 0x2ca   : > { %v1443_v36 = vmax.f32 %v1441_v11, %v1442_v21  ;;  %v1457_v37 = vmax.f32 %v1455_v12, %v1456_v22  ;;  %v1437_v62 = vrot.slane %v1436_v46, 1  ;;  %v1451_v63 = vrot.slane %v1450_v47, 1 }
 0x2cc   : > { %v1444_v54 = vrot.slane %v1443_v36, 1  ;;  %v1458_v57 = vrot.slane %v1457_v37, 1  ;;  %v1438_v11 = vmax.f32 %v1436_v46, %v1437_v62  ;;  %v1452_v12 = vmax.f32 %v1450_v47, %v1451_v63 }
 0x2ce   : > { %v1445_v4 = vmax.f32 %v1443_v36, %v1444_v54  ;;  %v1459_v6 = vmax.f32 %v1457_v37, %v1458_v57 }
 0x2d7   : > { %v1363_v17 = vpop.f32.mrf.mxu0  ;;  %v1406_v18 = vpop.f32.mrf.mxu1 }
 0x2d8   : > { %v1364_v23 = vadd.f32 %v1363_v17, %v902_v13  ;;  %v1407_v24 = vadd.f32 %v1406_v18, %v910_v14  ;;  %v1496_v17 = vcombine.low %v1438_v11, %v1445_v4  ;;  %v1505_v18 = vsub.s32 %v1502_v5, %v7193_v33 }
 0x2d9   : > { %v1365_v25 = vpop.f32.mrf.mxu0  ;;  %v1408_v26 = vpop.f32.mrf.mxu1 }
 0x2da   : > { %v1366_v29 = vadd.f32 %v1365_v25, %v906_v19  ;;  %v1409_v30 = vadd.f32 %v1408_v26, %v914_v20  ;;  %v1419_v38 = vmax.f32 %v1364_v23, 0.0  ;;  %v1421_v40 = vmax.f32 %v1407_v24, 0.0 }
 0x2db   : > { %v1367_v31 = vpop.f32.mrf.mxu0  ;;  %v1410_v32 = vpop.f32.mrf.mxu1  ;;  %v1506_v26 = vrot.slane %v1496_v17, %v1505_v18 }
 0x2dc   : > { %v1368_v34 = vadd.f32 %v1367_v31, %v902_v13  ;;  %v1411_v35 = vadd.f32 %v1410_v32, %v910_v14  ;;  %v1420_v48 = vmax.f32 %v1366_v29, 0.0  ;;  %v1422_v49 = vmax.f32 %v1409_v30, 0.0 }
 0x2dd   : > { %v1369_v41 = vpop.f32.mrf.mxu0  ;;  %v1412_v39 = vpop.f32.mrf.mxu1 }
 0x2de   : > { %v1427_v42 = vmax.f32 %v1368_v34, 0.0  ;;  %v1429_v43 = vmax.f32 %v1411_v35, 0.0  ;;  %v1370_v44 = vadd.f32 %v1369_v41, %v906_v19  ;;  %v1413_v45 = vadd.f32 %v1412_v39, %v914_v20  ;;  %v1431_v41 = vld [vmem:[#allocation2] sm:$0xff] }
 0x2df   : > { %v1497_v19 = vcombine.low %v1452_v12, %v1459_v6 }
 0x2e0   : > { %v1460_v50 = vmax.f32 %v1419_v38, %v1427_v42  ;;  %v1474_v51 = vmax.f32 %v1421_v40, %v1429_v43  ;;  %v1428_v52 = vmax.f32 %v1370_v44, 0.0  ;;  %v1430_v53 = vmax.f32 %v1413_v45, 0.0 }
 0x2e1   : > { %v1513_v27 = vrot.slane %v1497_v19, %v1505_v18 }
 0x2e2   : > { %v1461_v58 = vrot.slane %v1460_v50, 4  ;;  %v1475_v59 = vrot.slane %v1474_v51, 4  ;;  %v1467_v60 = vmax.f32 %v1420_v48, %v1428_v52  ;;  %v1481_v61 = vmax.f32 %v1422_v49, %v1430_v53 }
 0x2e3   : > { %v1528_v35 = vcombine.low %v1506_v26, %v1513_v27 }
 0x2e4   : > { %v1462_v0 = vmax.f32 %v1460_v50, %v1461_v58  ;;  %v1476_v1 = vmax.f32 %v1474_v51, %v1475_v59  ;;  %v1468_v2 = vrot.slane %v1467_v60, 4  ;;  %v1482_v3 = vrot.slane %v1481_v61, 4 }
 0x2e5   : > { %v1536_v33 = vrot.slane %v1528_v35, %v1505_v18 }
 0x2e6   : > { %v1463_v7 = vrot.slane %v1462_v0, 2  ;;  %v1477_v8 = vrot.slane %v1476_v1, 2  ;;  %v1469_v9 = vmax.f32 %v1467_v60, %v1468_v2  ;;  %v1483_v10 = vmax.f32 %v1481_v61, %v1482_v3 }
 0x2e8   : > { %v1464_v13 = vmax.f32 %v1462_v0, %v1463_v7  ;;  %v1478_v14 = vmax.f32 %v1476_v1, %v1477_v8  ;;  %v1470_v15 = vrot.slane %v1469_v9, 2  ;;  %v1484_v16 = vrot.slane %v1483_v10, 2 }
 0x2ea   : > { %v1465_v20 = vrot.slane %v1464_v13, 1  ;;  %v1479_v21 = vrot.slane %v1478_v14, 1  ;;  %v1471_v22 = vmax.f32 %v1469_v9, %v1470_v15  ;;  %v1485_v23 = vmax.f32 %v1483_v10, %v1484_v16 }
 0x2ec   : > { %v1472_v24 = vrot.slane %v1471_v22, 1  ;;  %v1486_v25 = vrot.slane %v1485_v23, 1  ;;  %v1466_v28 = vmax.f32 %v1464_v13, %v1465_v20  ;;  %v1480_v29 = vmax.f32 %v1478_v14, %v1479_v21 }
 0x2ee   : > { %v1473_v30 = vmax.f32 %v1471_v22, %v1472_v24  ;;  %v1487_v31 = vmax.f32 %v1485_v23, %v1486_v25 }
 0x2f0   : > { %v1498_v32 = vcombine.low %v1466_v28, %v1473_v30  ;;  %v1499_v34 = vcombine.low %v1480_v29, %v1487_v31 }
 0x2f2   : > { %v1520_v36 = vrot.slane %v1498_v32, %v1505_v18  ;;  %v1527_v37 = vrot.slane %v1499_v34, %v1505_v18 }
 0x2f4   : > { %v1529_v38 = vcombine.low %v1520_v36, %v1527_v37 }
 0x2f6   : > { %v1543_v40 = vrot.slane %v1529_v38, %v1505_v18 }
 0x2f8   : > { %v1544_v39 = vcombine.low %v1536_v33, %v1543_v40 }
 0x2fa   : > { %v1546_v42 = vmax.f32 %v1431_v41, %v1544_v39 }
 0x2fc   : > { %1547 = vst [vmem:[#allocation2] sm:$0xff] %v1546_v42 }
 0x2fd PF: > { %1550 = sbr.rel (%p5291_p4) target bundleno = 1745 (0x6d1), region = 92  ;;  %s8984_s16 = sld [smem:[#allocation33_spill]] (!%p5291_p4) }
 0x2fe   : > { %s8985_s6 = sld [smem:[#allocation32_spill]] (!%p5291_p4) }
 0x2ff   : > { %s8986_s13 = sld [smem:[#allocation34_spill]] (!%p5291_p4) }
 0x302   : > { %v6218_v43 = vld [vmem:[%s8919_s8 + $0xe4] ss:$16 sps:$4 sm:$0xff]   ;;  %v6222_v45 = vld [vmem:[%s8919_s8 + $0xe0] ss:$16 sps:$4 sm:$0xff]   ;;  %v1553_v15 = vlaneseq  ;;  %vm4356_vm4 = vcmask 1040384   ;;  %vm6922_vm5 = vmmov 0  }
 0x303   : > { %v6220_v44 = vld [vmem:[%s8919_s8 + $0x2e4] ss:$16 sps:$4 sm:$0xff]   ;;  %3159 = vmatprep.subr.bf16.mxu0 %v6218_v43  ;;  %v6223_v46 = vld [vmem:[%s8919_s8 + $0x2e0] ss:$16 sps:$4 sm:$0xff]   ;;  %vm4352_vm6 = vcmask 72704   ;;  %vm4500_vm7 = vcmask 24576  }
 0x304   : > { %3200 = vmatprep.subr.bf16.mxu1 %v6220_v44  ;;  %v6224_v47 = vld [vmem:[%s8919_s8 + $0xc4] ss:$16 sps:$4 sm:$0xff]   ;;  %3160 = vmatpush1.bf16.msra.mxu0 %v6222_v45  ;;  %v6228_v49 = vld [vmem:[%s8919_s8 + $0xc0] ss:$16 sps:$4 sm:$0xff]   ;;  %v7326_v19 = vshrl.u32 %v1553_v15, 7  ;;  %vm5046_vm8 = vcmask 27648  }
 0x305   : > { %3201 = vmatpush1.bf16.msra.mxu1 %v6223_v46  ;;  %v6226_v48 = vld [vmem:[%s8919_s8 + $0x2c4] ss:$16 sps:$4 sm:$0xff]   ;;  %3161 = vmatprep.subr.bf16.mxu0 %v6224_v47  ;;  %v6229_v50 = vld [vmem:[%s8919_s8 + $0x2c0] ss:$16 sps:$4 sm:$0xff]  }
 0x306   : > { %3202 = vmatprep.subr.bf16.mxu1 %v6226_v48  ;;  %v6230_v51 = vld [vmem:[%s8919_s8 + $0xa4] ss:$16 sps:$4 sm:$0xff]   ;;  %v6234_v53 = vld [vmem:[%s8919_s8 + $0xa0] ss:$16 sps:$4 sm:$0xff]   ;;  %v7344_v25 = vsub.s32 1, %v7326_v19  ;;  %v1567_v26 = vsub.s32 3, %v7326_v19 }
 0x307   : > { %v6232_v52 = vld [vmem:[%s8919_s8 + $0x2a4] ss:$16 sps:$4 sm:$0xff]   ;;  %v6235_v54 = vld [vmem:[%s8919_s8 + $0x2a0] ss:$16 sps:$4 sm:$0xff]   ;;  %v1571_v28 = vsub.s32 4, %v7326_v19  ;;  %v1579_v35 = vsub.s32 6, %v7326_v19 }
 0x308   : > { %3162 = vmatpush1.bf16.msra.mxu0 %v6228_v49  ;;  %v6236_v55 = vld [vmem:[%s8919_s8 + $0x84] ss:$16 sps:$4 sm:$0xff]   ;;  %v6240_v57 = vld [vmem:[%s8919_s8 + $0x80] ss:$16 sps:$4 sm:$0xff]  }
 0x309   : > { %3203 = vmatpush1.bf16.msra.mxu1 %v6229_v50  ;;  %3163 = vmatprep.subr.bf16.mxu0 %v6230_v51  ;;  %v6238_v56 = vld [vmem:[%s8919_s8 + $0x284] ss:$16 sps:$4 sm:$0xff]   ;;  %v6241_v58 = vld [vmem:[%s8919_s8 + $0x280] ss:$16 sps:$4 sm:$0xff]   ;;  %v7408_v51 = vsub.s32 0, %v7326_v19 }
 0x30a   : > { %3204 = vmatprep.subr.bf16.mxu1 %v6232_v52  ;;  %v6242_v59 = vld [vmem:[%s8919_s8 + $0x64] ss:$16 sps:$4 sm:$0xff]   ;;  %v6246_v61 = vld [vmem:[%s8919_s8 + $0x60] ss:$16 sps:$4 sm:$0xff]   ;;  %v7411_v52 = vsub.s32 2, %v7326_v19 }
 0x30b   : > { %v6244_v60 = vld [vmem:[%s8919_s8 + $0x264] ss:$16 sps:$4 sm:$0xff]   ;;  %v6247_v62 = vld [vmem:[%s8919_s8 + $0x260] ss:$16 sps:$4 sm:$0xff]  }
 0x30c   : > { %3164 = vmatpush1.bf16.msra.mxu0 %v6234_v53  ;;  %v6248_v63 = vld [vmem:[%s8919_s8 + $0x44] ss:$16 sps:$4 sm:$0xff]   ;;  %v6252_v1 = vld [vmem:[%s8919_s8 + $0x40] ss:$16 sps:$4 sm:$0xff]  }
 0x30d   : > { %3205 = vmatpush1.bf16.msra.mxu1 %v6235_v54  ;;  %3165 = vmatprep.subr.bf16.mxu0 %v6236_v55  ;;  %v6250_v0 = vld [vmem:[%s8919_s8 + $0x244] ss:$16 sps:$4 sm:$0xff]   ;;  %v6253_v2 = vld [vmem:[%s8919_s8 + $0x240] ss:$16 sps:$4 sm:$0xff]  }
 0x30e   : > { %3206 = vmatprep.subr.bf16.mxu1 %v6238_v56  ;;  %v6254_v3 = vld [vmem:[%s8919_s8 + $0x24] ss:$16 sps:$4 sm:$0xff]   ;;  %v6258_v5 = vld [vmem:[%s8919_s8 + $0x20] ss:$16 sps:$4 sm:$0xff]   ;;  %v1575_v56 = vsub.s32 5, %v7326_v19 }
 0x30f   : > { %v6256_v4 = vld [vmem:[%s8919_s8 + $0x224] ss:$16 sps:$4 sm:$0xff]   ;;  %v6259_v6 = vld [vmem:[%s8919_s8 + $0x220] ss:$16 sps:$4 sm:$0xff]  }
 0x310   : > { %3166 = vmatpush1.bf16.msra.mxu0 %v6240_v57  ;;  %v6260_v7 = vld [vmem:[%s8919_s8 + $0x4] ss:$16 sps:$4 sm:$0xff]   ;;  %v6264_v9 = vld [vmem:[%s8919_s8] ss:$16 sps:$4 sm:$0xff]   ;;  %v1583_v57 = vsub.s32 7, %v7326_v19  ;;  %v4342_v19 = vld [vmem:[%s8984_s16 + $0xc8] sm:$0xff] }
 0x311   : > { %3207 = vmatpush1.bf16.msra.mxu1 %v6241_v58  ;;  %3167 = vmatprep.subr.bf16.mxu0 %v6242_v59  ;;  %v6262_v8 = vld [vmem:[%s8919_s8 + $0x204] ss:$16 sps:$4 sm:$0xff]   ;;  %v6265_v10 = vld [vmem:[%s8919_s8 + $0x200] ss:$16 sps:$4 sm:$0xff]  }
 0x312   : > { %3208 = vmatprep.subr.bf16.mxu1 %v6244_v60  ;;  %v6266_v11 = vld [vmem:[%s8919_s8 + $0x1e4] ss:$16 sps:$4 sm:$0xff]   ;;  %v6270_v13 = vld [vmem:[%s8919_s8 + $0x1e0] ss:$16 sps:$4 sm:$0xff]  }
 0x313   : > { %v6268_v12 = vld [vmem:[%s8919_s8 + $0x3e4] ss:$16 sps:$4 sm:$0xff]   ;;  %v6271_v14 = vld [vmem:[%s8919_s8 + $0x3e0] ss:$16 sps:$4 sm:$0xff]  }
 0x314   : > { %3168 = vmatpush1.bf16.msra.mxu0 %v6246_v61  ;;  %v6272_v16 = vld [vmem:[%s8919_s8 + $0x1c4] ss:$16 sps:$4 sm:$0xff]   ;;  %v6276_v18 = vld [vmem:[%s8919_s8 + $0x1c0] ss:$16 sps:$4 sm:$0xff]  }
 0x315   : > { %3209 = vmatpush1.bf16.msra.mxu1 %v6247_v62  ;;  %3169 = vmatprep.subr.bf16.mxu0 %v6248_v63  ;;  %v6274_v17 = vld [vmem:[%s8919_s8 + $0x3c4] ss:$16 sps:$4 sm:$0xff]   ;;  %v6277_v20 = vld [vmem:[%s8919_s8 + $0x3c0] ss:$16 sps:$4 sm:$0xff]  }
 0x316   : > { %3210 = vmatprep.subr.bf16.mxu1 %v6250_v0  ;;  %v6278_v21 = vld [vmem:[%s8919_s8 + $0x1a4] ss:$16 sps:$4 sm:$0xff]   ;;  %v6282_v23 = vld [vmem:[%s8919_s8 + $0x1a0] ss:$16 sps:$4 sm:$0xff]  }
 0x317   : > { %v6280_v22 = vld [vmem:[%s8919_s8 + $0x3a4] ss:$16 sps:$4 sm:$0xff]   ;;  %v6283_v24 = vld [vmem:[%s8919_s8 + $0x3a0] ss:$16 sps:$4 sm:$0xff]  }
 0x318   : > { %3170 = vmatpush1.bf16.msra.mxu0 %v6252_v1  ;;  %v6284_v27 = vld [vmem:[%s8919_s8 + $0x184] ss:$16 sps:$4 sm:$0xff]   ;;  %v6288_v31 = vld [vmem:[%s8919_s8 + $0x180] ss:$16 sps:$4 sm:$0xff]  }
 0x319   : > { %3211 = vmatpush1.bf16.msra.mxu1 %v6253_v2  ;;  %3171 = vmatprep.subr.bf16.mxu0 %v6254_v3  ;;  %v6286_v29 = vld [vmem:[%s8919_s8 + $0x384] ss:$16 sps:$4 sm:$0xff]   ;;  %v6289_v36 = vld [vmem:[%s8919_s8 + $0x380] ss:$16 sps:$4 sm:$0xff]  }
 0x31a   : > { %3212 = vmatprep.subr.bf16.mxu1 %v6256_v4  ;;  %v1551_v30 = vld [vmem:[#allocation2] sm:$0xff] }
 0x31b   : > { %v1560_v32 = vrot.slane %v1551_v30, %v7344_v25  ;;  %v1568_v34 = vrot.slane %v1551_v30, %v1567_v26  ;;  %v7364_v37 = vrot.slane %v1551_v30, %v1571_v28  ;;  %v6290_v38 = vld [vmem:[%s8919_s8 + $0x164] ss:$16 sps:$4 sm:$0xff]   ;;  %v6294_v39 = vld [vmem:[%s8919_s8 + $0x160] ss:$16 sps:$4 sm:$0xff]   ;;  %v7381_v42 = vrot.slane %v1551_v30, %v1579_v35 }
 0x31c   : > { %3172 = vmatpush1.bf16.msra.mxu0 %v6258_v5  ;;  %v6292_v33 = vld [vmem:[%s8919_s8 + $0x364] ss:$16 sps:$4 sm:$0xff]   ;;  %v6295_v43 = vld [vmem:[%s8919_s8 + $0x360] ss:$16 sps:$4 sm:$0xff]   ;;  %v1556_v59 = vrot.slane %v1551_v30, %v7408_v51  ;;  %v1564_v60 = vrot.slane %v1551_v30, %v7411_v52  ;;  %v1576_v0 = vrot.slane %v1551_v30, %v1575_v56  ;;  %v1584_v1 = vrot.slane %v1551_v30, %v1583_v57 }
 0x31d   : > { %3213 = vmatpush1.bf16.msra.mxu1 %v6259_v6  ;;  %3173 = vmatprep.subr.bf16.mxu0 %v6260_v7  ;;  %v7372_v40 = vpack.c.bf16 %v1560_v32, %v1560_v32  ;;  %v7374_v41 = vpack.c.bf16 %v1568_v34, %v1568_v34  ;;  %v6296_v44 = vld [vmem:[%s8919_s8 + $0x144] ss:$16 sps:$4 sm:$0xff]   ;;  %v6300_v46 = vld [vmem:[%s8919_s8 + $0x140] ss:$16 sps:$4 sm:$0xff]  }
 0x31e   : > { %3214 = vmatprep.subr.bf16.mxu1 %v6262_v8  ;;  %v6298_v45 = vld [vmem:[%s8919_s8 + $0x344] ss:$16 sps:$4 sm:$0xff]   ;;  %v6301_v47 = vld [vmem:[%s8919_s8 + $0x340] ss:$16 sps:$4 sm:$0xff]   ;;  %v7438_v2 = vpack.c.bf16 %v1556_v59, %v1556_v59  ;;  %v7440_v3 = vpack.c.bf16 %v1564_v60, %v1564_v60  ;;  %v7454_v8 = vpack.c.bf16 %v1576_v0, %v1576_v0 }
 0x31f   : > { %3191 = vmatprep.mubr.bf16.mxu0 %v7372_v40  ;;  %3232 = vmatprep.mubr.bf16.mxu1 %v7374_v41  ;;  %v6302_v48 = vld [vmem:[%s8919_s8 + $0x124] ss:$16 sps:$4 sm:$0xff]   ;;  %v6306_v50 = vld [vmem:[%s8919_s8 + $0x120] ss:$16 sps:$4 sm:$0xff]  }
 0x320   : > { %3174 = vmatpush1.bf16.msra.mxu0 %v6264_v9  ;;  %v6304_v49 = vld [vmem:[%s8919_s8 + $0x324] ss:$16 sps:$4 sm:$0xff]   ;;  %v6307_v53 = vld [vmem:[%s8919_s8 + $0x320] ss:$16 sps:$4 sm:$0xff]   ;;  %v7456_v9 = vpack.c.bf16 %v1584_v1, %v1584_v1 }
 0x321   : > { %3215 = vmatpush1.bf16.msra.mxu1 %v6265_v10  ;;  %3175 = vmatprep.subr.bf16.mxu0 %v6266_v11  ;;  %v6308_v54 = vld [vmem:[%s8919_s8 + $0x104] ss:$16 sps:$4 sm:$0xff]   ;;  %v6312_v58 = vld [vmem:[%s8919_s8 + $0x100] ss:$16 sps:$4 sm:$0xff]  }
 0x322   : > { %3216 = vmatprep.subr.bf16.mxu1 %v6268_v12  ;;  %v6310_v55 = vld [vmem:[%s8919_s8 + $0x304] ss:$16 sps:$4 sm:$0xff]   ;;  %v6313_v61 = vld [vmem:[%s8919_s8 + $0x300] ss:$16 sps:$4 sm:$0xff]  }
 0x323   : > { %v6316_v62 = vld [vmem:[%s8919_s8 + $0x4e4] ss:$16 sps:$4 sm:$0xff]   ;;  %v6314_v4 = vld [vmem:[%s8919_s8 + $0x4e0] ss:$16 sps:$4 sm:$0xff]  }
 0x324   : > { %3176 = vmatpush2.bf16.msra.mxu0 %v6270_v13  ;;  %v6319_v63 = vld [vmem:[%s8919_s8 + $0x6e4] ss:$16 sps:$4 sm:$0xff]   ;;  %v6317_v5 = vld [vmem:[%s8919_s8 + $0x6e0] ss:$16 sps:$4 sm:$0xff]  }
 0x325   : > { %3217 = vmatpush2.bf16.msra.mxu1 %v6271_v14  ;;  %3177 = vmatprep.subr.bf16.mxu0 %v6272_v16  ;;  %v6322_v6 = vld [vmem:[%s8919_s8 + $0x4c4] ss:$16 sps:$4 sm:$0xff]   ;;  %v6320_v10 = vld [vmem:[%s8919_s8 + $0x4c0] ss:$16 sps:$4 sm:$0xff]  }
 0x326   : > { %3218 = vmatprep.subr.bf16.mxu1 %v6274_v17  ;;  %v6325_v7 = vld [vmem:[%s8919_s8 + $0x6c4] ss:$16 sps:$4 sm:$0xff]   ;;  %v6323_v11 = vld [vmem:[%s8919_s8 + $0x6c0] ss:$16 sps:$4 sm:$0xff]  }
 0x327   : > { %v6328_v12 = vld [vmem:[%s8919_s8 + $0x4a4] ss:$16 sps:$4 sm:$0xff]   ;;  %v6326_v14 = vld [vmem:[%s8919_s8 + $0x4a0] ss:$16 sps:$4 sm:$0xff]  }
 0x328   : > { %3178 = vmatpush2.bf16.msra.mxu0 %v6276_v18  ;;  %v6331_v13 = vld [vmem:[%s8919_s8 + $0x6a4] ss:$16 sps:$4 sm:$0xff]   ;;  %v6329_v15 = vld [vmem:[%s8919_s8 + $0x6a0] ss:$16 sps:$4 sm:$0xff]  }
 0x329   : > { %3219 = vmatpush2.bf16.msra.mxu1 %v6277_v20  ;;  %3179 = vmatprep.subr.bf16.mxu0 %v6278_v21  ;;  %v6334_v16 = vld [vmem:[%s8919_s8 + $0x484] ss:$16 sps:$4 sm:$0xff]   ;;  %v6332_v18 = vld [vmem:[%s8919_s8 + $0x480] ss:$16 sps:$4 sm:$0xff]  }
 0x32a   : > { %3220 = vmatprep.subr.bf16.mxu1 %v6280_v22  ;;  %v6337_v17 = vld [vmem:[%s8919_s8 + $0x684] ss:$16 sps:$4 sm:$0xff]   ;;  %v6335_v20 = vld [vmem:[%s8919_s8 + $0x680] ss:$16 sps:$4 sm:$0xff]  }
 0x32b   : > { %v6340_v21 = vld [vmem:[%s8919_s8 + $0x464] ss:$16 sps:$4 sm:$0xff]   ;;  %v6347_v30 = vld [vmem:[%s8919_s8 + $0x640] ss:$16 sps:$4 sm:$0xff]  }
 0x32c   : > { %3180 = vmatpush2.bf16.msra.mxu0 %v6282_v23  ;;  %v6343_v22 = vld [vmem:[%s8919_s8 + $0x664] ss:$16 sps:$4 sm:$0xff]   ;;  %v6338_v23 = vld [vmem:[%s8919_s8 + $0x460] ss:$16 sps:$4 sm:$0xff]  }
 0x32d   : > { %3221 = vmatpush2.bf16.msra.mxu1 %v6283_v24  ;;  %3181 = vmatprep.subr.bf16.mxu0 %v6284_v27  ;;  %v6341_v24 = vld [vmem:[%s8919_s8 + $0x660] ss:$16 sps:$4 sm:$0xff]   ;;  %v6346_v27 = vld [vmem:[%s8919_s8 + $0x444] ss:$16 sps:$4 sm:$0xff]  }
 0x32e   : > { %3222 = vmatprep.subr.bf16.mxu1 %v6286_v29  ;;  %v6349_v28 = vld [vmem:[%s8919_s8 + $0x644] ss:$16 sps:$4 sm:$0xff]   ;;  %v6344_v29 = vld [vmem:[%s8919_s8 + $0x440] ss:$16 sps:$4 sm:$0xff]  }
 0x32f   : > { %v6355_v32 = vld [vmem:[%s8919_s8 + $0x624] ss:$16 sps:$4 sm:$0xff]   ;;  %v6350_v34 = vld [vmem:[%s8919_s8 + $0x420] ss:$16 sps:$4 sm:$0xff]  }
 0x330   : > { %3182 = vmatpush2.bf16.msra.mxu0 %v6288_v31  ;;  %v6352_v31 = vld [vmem:[%s8919_s8 + $0x424] ss:$16 sps:$4 sm:$0xff]   ;;  %v6353_v35 = vld [vmem:[%s8919_s8 + $0x620] ss:$16 sps:$4 sm:$0xff]  }
 0x331   : > { %3223 = vmatpush2.bf16.msra.mxu1 %v6289_v36  ;;  %3183 = vmatprep.subr.bf16.mxu0 %v6290_v38  ;;  %v6358_v36 = vld [vmem:[%s8919_s8 + $0x404] ss:$16 sps:$4 sm:$0xff]   ;;  %v6377_v56 = vld [vmem:[%s8919_s8 + $0x7a0] ss:$16 sps:$4 sm:$0xff]  }
 0x332   : > { %3224 = vmatprep.subr.bf16.mxu1 %v6292_v33  ;;  %v6361_v38 = vld [vmem:[%s8919_s8 + $0x604] ss:$16 sps:$4 sm:$0xff]   ;;  %v6356_v33 = vld [vmem:[%s8919_s8 + $0x400] ss:$16 sps:$4 sm:$0xff]  }
 0x333   : > { %v6382_v57 = vld [vmem:[%s8919_s8 + $0x584] ss:$16 sps:$4 sm:$0xff]   ;;  %v6380_v59 = vld [vmem:[%s8919_s8 + $0x580] ss:$16 sps:$4 sm:$0xff]  }
 0x334   : > { %3184 = vmatpush2.bf16.msra.mxu0 %v6294_v39  ;;  %v6359_v39 = vld [vmem:[%s8919_s8 + $0x600] ss:$16 sps:$4 sm:$0xff]   ;;  %v6394_v1 = vld [vmem:[%s8919_s8 + $0x544] ss:$16 sps:$4 sm:$0xff]  }
 0x335   : > { %3225 = vmatpush2.bf16.msra.mxu1 %v6295_v43  ;;  %3185 = vmatprep.subr.bf16.mxu0 %v6296_v44  ;;  %v6364_v43 = vld [vmem:[%s8919_s8 + $0x5e4] ss:$16 sps:$4 sm:$0xff]   ;;  %v6383_v60 = vld [vmem:[%s8919_s8 + $0x780] ss:$16 sps:$4 sm:$0xff]  }
 0x336   : > { %3226 = vmatprep.subr.bf16.mxu1 %v6298_v45  ;;  %v6367_v44 = vld [vmem:[%s8919_s8 + $0x7e4] ss:$16 sps:$4 sm:$0xff]   ;;  %v6362_v45 = vld [vmem:[%s8919_s8 + $0x5e0] ss:$16 sps:$4 sm:$0xff]  }
 0x337   : > { %v6389_v0 = vld [vmem:[%s8919_s8 + $0x760] ss:$16 sps:$4 sm:$0xff]  }
 0x338   : > { %3186 = vmatpush2.bf16.msra.mxu0 %v6300_v46  ;;  %v6365_v46 = vld [vmem:[%s8919_s8 + $0x7e0] ss:$16 sps:$4 sm:$0xff]  }
 0x339   : > { %3227 = vmatpush2.bf16.msra.mxu1 %v6301_v47  ;;  %3187 = vmatprep.subr.bf16.mxu0 %v6302_v48  ;;  %v6370_v47 = vld [vmem:[%s8919_s8 + $0x5c4] ss:$16 sps:$4 sm:$0xff]  }
 0x33a   : > { %3228 = vmatprep.subr.bf16.mxu1 %v6304_v49  ;;  %v6373_v48 = vld [vmem:[%s8919_s8 + $0x7c4] ss:$16 sps:$4 sm:$0xff]   ;;  %v6368_v49 = vld [vmem:[%s8919_s8 + $0x5c0] ss:$16 sps:$4 sm:$0xff]  }
 0x33c   : > { %3188 = vmatpush2.bf16.msra.mxu0 %v6306_v50  ;;  %v6371_v50 = vld [vmem:[%s8919_s8 + $0x7c0] ss:$16 sps:$4 sm:$0xff]  }
 0x33d   : > { %3229 = vmatpush2.bf16.msra.mxu1 %v6307_v53  ;;  %3189 = vmatprep.subr.bf16.mxu0 %v6308_v54  ;;  %v6376_v53 = vld [vmem:[%s8919_s8 + $0x5a4] ss:$16 sps:$4 sm:$0xff]  }
 0x33e   : > { %3230 = vmatprep.subr.bf16.mxu1 %v6310_v55  ;;  %v6379_v54 = vld [vmem:[%s8919_s8 + $0x7a4] ss:$16 sps:$4 sm:$0xff]   ;;  %v6374_v55 = vld [vmem:[%s8919_s8 + $0x5a0] ss:$16 sps:$4 sm:$0xff]  }
 0x340   : > { %3190 = vmatpush2.bf16.msra.mxu0 %v6312_v58  ;;  %v6385_v58 = vld [vmem:[%s8919_s8 + $0x784] ss:$16 sps:$4 sm:$0xff]  }
 0x341   : > { %3231 = vmatpush2.bf16.msra.mxu1 %v6313_v61  ;;  %3241 = vmatprep.subr.bf16.mxu0 %v6316_v62  ;;  %v6388_v61 = vld [vmem:[%s8919_s8 + $0x564] ss:$16 sps:$4 sm:$0xff]  }
 0x342   : > { %3282 = vmatprep.subr.bf16.mxu1 %v6319_v63  ;;  %v6391_v62 = vld [vmem:[%s8919_s8 + $0x764] ss:$16 sps:$4 sm:$0xff]   ;;  %v6386_v63 = vld [vmem:[%s8919_s8 + $0x560] ss:$16 sps:$4 sm:$0xff]  }
 0x343   : > { %3192 = vmatmul.mubr.bf16.vlgmr.msra.gmra.mxu0 %v7438_v2 }
 0x344   : > { %3233 = vmatmul.mubr.bf16.vlgmr.msra.gmra.mxu1 %v7440_v3  ;;  %3242 = vmatpush1.bf16.msra.mxu0 %v6314_v4  ;;  %v6397_v4 = vld [vmem:[%s8919_s8 + $0x744] ss:$16 sps:$4 sm:$0xff]  }
 0x345   : > { %3283 = vmatpush1.bf16.msra.mxu1 %v6317_v5  ;;  %3243 = vmatprep.subr.bf16.mxu0 %v6322_v6  ;;  %v6392_v5 = vld [vmem:[%s8919_s8 + $0x540] ss:$16 sps:$4 sm:$0xff]  }
 0x346   : > { %3284 = vmatprep.subr.bf16.mxu1 %v6325_v7  ;;  %3273 = vmatprep.mubr.bf16.mxu0 %v7454_v8  ;;  %v6395_v6 = vld [vmem:[%s8919_s8 + $0x740] ss:$16 sps:$4 sm:$0xff]   ;;  %v6400_v7 = vld [vmem:[%s8919_s8 + $0x524] ss:$16 sps:$4 sm:$0xff]  }
 0x347   : > { %3314 = vmatprep.mubr.bf16.mxu1 %v7456_v9 }
 0x348   : > { %3244 = vmatpush1.bf16.msra.mxu0 %v6320_v10  ;;  %v6403_v10 = vld [vmem:[%s8919_s8 + $0x724] ss:$16 sps:$4 sm:$0xff]  }
 0x349   : > { %3285 = vmatpush1.bf16.msra.mxu1 %v6323_v11  ;;  %3245 = vmatprep.subr.bf16.mxu0 %v6328_v12  ;;  %v6398_v11 = vld [vmem:[%s8919_s8 + $0x520] ss:$16 sps:$4 sm:$0xff]  }
 0x34a   : > { %3286 = vmatprep.subr.bf16.mxu1 %v6331_v13  ;;  %v6401_v12 = vld [vmem:[%s8919_s8 + $0x720] ss:$16 sps:$4 sm:$0xff]   ;;  %v6406_v13 = vld [vmem:[%s8919_s8 + $0x504] ss:$16 sps:$4 sm:$0xff]  }
 0x34c   : > { %3246 = vmatpush1.bf16.msra.mxu0 %v6326_v14  ;;  %v6409_v14 = vld [vmem:[%s8919_s8 + $0x704] ss:$16 sps:$4 sm:$0xff]  }
 0x34d   : > { %3287 = vmatpush1.bf16.msra.mxu1 %v6329_v15  ;;  %3247 = vmatprep.subr.bf16.mxu0 %v6334_v16  ;;  %v6404_v15 = vld [vmem:[%s8919_s8 + $0x500] ss:$16 sps:$4 sm:$0xff]  }
 0x34e   : > { %3288 = vmatprep.subr.bf16.mxu1 %v6337_v17  ;;  %v6407_v16 = vld [vmem:[%s8919_s8 + $0x700] ss:$16 sps:$4 sm:$0xff]   ;;  %v6412_v17 = vld [vmem:[%s8919_s8 + $0xec] ss:$16 sps:$4 sm:$0xff]  }
 0x350   : > { %3248 = vmatpush1.bf16.msra.mxu0 %v6332_v18  ;;  %v6415_v18 = vld [vmem:[%s8919_s8 + $0x2ec] ss:$16 sps:$4 sm:$0xff]  }
 0x351   : > { %3289 = vmatpush1.bf16.msra.mxu1 %v6335_v20  ;;  %3249 = vmatprep.subr.bf16.mxu0 %v6340_v21  ;;  %v7644_v20 = vpack.c.bf16 %v7364_v37, %v7364_v37  ;;  %v7648_v21 = vpack.c.bf16 %v7381_v42, %v7381_v42  ;;  %v6418_v37 = vld [vmem:[%s8919_s8 + $0xcc] ss:$16 sps:$4 sm:$0xff]  }
 0x352   : > { %3290 = vmatprep.subr.bf16.mxu1 %v6343_v22  ;;  %v6410_v22 = vld [vmem:[%s8919_s8 + $0xe8] ss:$16 sps:$4 sm:$0xff]   ;;  %v6421_v42 = vld [vmem:[%s8919_s8 + $0x2cc] ss:$16 sps:$4 sm:$0xff]  }
 0x354   : > { %3250 = vmatpush1.bf16.msra.mxu0 %v6338_v23  ;;  %v6413_v23 = vld [vmem:[%s8919_s8 + $0x2e8] ss:$16 sps:$4 sm:$0xff]  }
 0x355   : > { %3291 = vmatpush1.bf16.msra.mxu1 %v6341_v24  ;;  %3251 = vmatprep.subr.bf16.mxu0 %v6346_v27  ;;  %v6416_v24 = vld [vmem:[%s8919_s8 + $0xc8] ss:$16 sps:$4 sm:$0xff]  }
 0x356   : > { %3292 = vmatprep.subr.bf16.mxu1 %v6349_v28  ;;  %v6419_v27 = vld [vmem:[%s8919_s8 + $0x2c8] ss:$16 sps:$4 sm:$0xff]   ;;  %v6424_v28 = vld [vmem:[%s8919_s8 + $0xac] ss:$16 sps:$4 sm:$0xff]  }
 0x358   : > { %3252 = vmatpush1.bf16.msra.mxu0 %v6344_v29  ;;  %v6427_v29 = vld [vmem:[%s8919_s8 + $0x2ac] ss:$16 sps:$4 sm:$0xff]  }
 0x359   : > { %3293 = vmatpush1.bf16.msra.mxu1 %v6347_v30  ;;  %3253 = vmatprep.subr.bf16.mxu0 %v6352_v31  ;;  %v6422_v30 = vld [vmem:[%s8919_s8 + $0xa8] ss:$16 sps:$4 sm:$0xff]  }
 0x35a   : > { %3294 = vmatprep.subr.bf16.mxu1 %v6355_v32  ;;  %v6425_v31 = vld [vmem:[%s8919_s8 + $0x2a8] ss:$16 sps:$4 sm:$0xff]   ;;  %v6430_v32 = vld [vmem:[%s8919_s8 + $0x8c] ss:$16 sps:$4 sm:$0xff]  }
 0x35c   : > { %3254 = vmatpush1.bf16.msra.mxu0 %v6350_v34  ;;  %v6431_v34 = vld [vmem:[%s8919_s8 + $0x288] ss:$16 sps:$4 sm:$0xff]  }
 0x35d   : > { %3295 = vmatpush1.bf16.msra.mxu1 %v6353_v35  ;;  %3255 = vmatprep.subr.bf16.mxu0 %v6358_v36  ;;  %v6436_v35 = vld [vmem:[%s8919_s8 + $0x6c] ss:$16 sps:$4 sm:$0xff]  }
 0x35e   : > { %3296 = vmatprep.subr.bf16.mxu1 %v6361_v38  ;;  %v6439_v36 = vld [vmem:[%s8919_s8 + $0x26c] ss:$16 sps:$4 sm:$0xff]   ;;  %v6434_v38 = vld [vmem:[%s8919_s8 + $0x68] ss:$16 sps:$4 sm:$0xff]  }
 0x360   : > { %3256 = vmatpush1.bf16.msra.mxu0 %v6356_v33  ;;  %v6437_v33 = vld [vmem:[%s8919_s8 + $0x268] ss:$16 sps:$4 sm:$0xff]  }
 0x361   : > { %3297 = vmatpush1.bf16.msra.mxu1 %v6359_v39  ;;  %3257 = vmatprep.subr.bf16.mxu0 %v6364_v43  ;;  %v6442_v39 = vld [vmem:[%s8919_s8 + $0x4c] ss:$16 sps:$4 sm:$0xff]  }
 0x362   : > { %3298 = vmatprep.subr.bf16.mxu1 %v6367_v44  ;;  %v6445_v43 = vld [vmem:[%s8919_s8 + $0x24c] ss:$16 sps:$4 sm:$0xff]   ;;  %v6440_v44 = vld [vmem:[%s8919_s8 + $0x48] ss:$16 sps:$4 sm:$0xff]  }
 0x364   : > { %3258 = vmatpush2.bf16.msra.mxu0 %v6362_v45  ;;  %v6443_v45 = vld [vmem:[%s8919_s8 + $0x248] ss:$16 sps:$4 sm:$0xff]  }
 0x365   : > { %3299 = vmatpush2.bf16.msra.mxu1 %v6365_v46  ;;  %3259 = vmatprep.subr.bf16.mxu0 %v6370_v47  ;;  %v6448_v46 = vld [vmem:[%s8919_s8 + $0x2c] ss:$16 sps:$4 sm:$0xff]  }
 0x366   : > { %3300 = vmatprep.subr.bf16.mxu1 %v6373_v48  ;;  %v6451_v47 = vld [vmem:[%s8919_s8 + $0x22c] ss:$16 sps:$4 sm:$0xff]   ;;  %v6446_v48 = vld [vmem:[%s8919_s8 + $0x28] ss:$16 sps:$4 sm:$0xff]  }
 0x368   : > { %3260 = vmatpush2.bf16.msra.mxu0 %v6368_v49  ;;  %v6449_v49 = vld [vmem:[%s8919_s8 + $0x228] ss:$16 sps:$4 sm:$0xff]  }
 0x369   : > { %3301 = vmatpush2.bf16.msra.mxu1 %v6371_v50  ;;  %3261 = vmatprep.subr.bf16.mxu0 %v6376_v53  ;;  %v6454_v50 = vld [vmem:[%s8919_s8 + $0xc] ss:$16 sps:$4 sm:$0xff]  }
 0x36a   : > { %3302 = vmatprep.subr.bf16.mxu1 %v6379_v54  ;;  %v6457_v53 = vld [vmem:[%s8919_s8 + $0x20c] ss:$16 sps:$4 sm:$0xff]   ;;  %v6452_v54 = vld [vmem:[%s8919_s8 + $0x8] ss:$16 sps:$4 sm:$0xff]  }
 0x36c   : > { %3262 = vmatpush2.bf16.msra.mxu0 %v6374_v55  ;;  %v6455_v55 = vld [vmem:[%s8919_s8 + $0x208] ss:$16 sps:$4 sm:$0xff]  }
 0x36d   : > { %3303 = vmatpush2.bf16.msra.mxu1 %v6377_v56  ;;  %3263 = vmatprep.subr.bf16.mxu0 %v6382_v57  ;;  %v6460_v56 = vld [vmem:[%s8919_s8 + $0x1ec] ss:$16 sps:$4 sm:$0xff]  }
 0x36e   : > { %3304 = vmatprep.subr.bf16.mxu1 %v6385_v58  ;;  %v6463_v57 = vld [vmem:[%s8919_s8 + $0x3ec] ss:$16 sps:$4 sm:$0xff]   ;;  %v6458_v58 = vld [vmem:[%s8919_s8 + $0x1e8] ss:$16 sps:$4 sm:$0xff]  }
 0x370   : > { %3264 = vmatpush2.bf16.msra.mxu0 %v6380_v59  ;;  %v6461_v59 = vld [vmem:[%s8919_s8 + $0x3e8] ss:$16 sps:$4 sm:$0xff]  }
 0x371   : > { %3305 = vmatpush2.bf16.msra.mxu1 %v6383_v60  ;;  %3265 = vmatprep.subr.bf16.mxu0 %v6388_v61  ;;  %v6466_v60 = vld [vmem:[%s8919_s8 + $0x1cc] ss:$16 sps:$4 sm:$0xff]  }
 0x372   : > { %3306 = vmatprep.subr.bf16.mxu1 %v6391_v62  ;;  %v6469_v61 = vld [vmem:[%s8919_s8 + $0x3cc] ss:$16 sps:$4 sm:$0xff]   ;;  %v6464_v62 = vld [vmem:[%s8919_s8 + $0x1c8] ss:$16 sps:$4 sm:$0xff]  }
 0x374   : > { %3266 = vmatpush2.bf16.msra.mxu0 %v6386_v63  ;;  %v6467_v63 = vld [vmem:[%s8919_s8 + $0x3c8] ss:$16 sps:$4 sm:$0xff]  }
 0x375   : > { %3307 = vmatpush2.bf16.msra.mxu1 %v6389_v0  ;;  %3267 = vmatprep.subr.bf16.mxu0 %v6394_v1  ;;  %v6472_v0 = vld [vmem:[%s8919_s8 + $0x1ac] ss:$16 sps:$4 sm:$0xff]  }
 0x376   : > { %3308 = vmatprep.subr.bf16.mxu1 %v6397_v4  ;;  %v6475_v1 = vld [vmem:[%s8919_s8 + $0x3ac] ss:$16 sps:$4 sm:$0xff]   ;;  %v6470_v4 = vld [vmem:[%s8919_s8 + $0x1a8] ss:$16 sps:$4 sm:$0xff]  }
 0x378   : > { %3268 = vmatpush2.bf16.msra.mxu0 %v6392_v5  ;;  %v6473_v5 = vld [vmem:[%s8919_s8 + $0x3a8] ss:$16 sps:$4 sm:$0xff]  }
 0x379   : > { %3309 = vmatpush2.bf16.msra.mxu1 %v6395_v6  ;;  %3269 = vmatprep.subr.bf16.mxu0 %v6400_v7  ;;  %v6478_v6 = vld [vmem:[%s8919_s8 + $0x18c] ss:$16 sps:$4 sm:$0xff]  }
 0x37a   : > { %3310 = vmatprep.subr.bf16.mxu1 %v6403_v10  ;;  %v6481_v7 = vld [vmem:[%s8919_s8 + $0x38c] ss:$16 sps:$4 sm:$0xff]   ;;  %v6476_v10 = vld [vmem:[%s8919_s8 + $0x188] ss:$16 sps:$4 sm:$0xff]  }
 0x37c   : > { %3270 = vmatpush2.bf16.msra.mxu0 %v6398_v11  ;;  %v6479_v11 = vld [vmem:[%s8919_s8 + $0x388] ss:$16 sps:$4 sm:$0xff]  }
 0x37d   : > { %3311 = vmatpush2.bf16.msra.mxu1 %v6401_v12  ;;  %3271 = vmatprep.subr.bf16.mxu0 %v6406_v13  ;;  %v6484_v12 = vld [vmem:[%s8919_s8 + $0x16c] ss:$16 sps:$4 sm:$0xff]  }
 0x37e   : > { %3312 = vmatprep.subr.bf16.mxu1 %v6409_v14  ;;  %v6487_v13 = vld [vmem:[%s8919_s8 + $0x36c] ss:$16 sps:$4 sm:$0xff]   ;;  %v6482_v14 = vld [vmem:[%s8919_s8 + $0x168] ss:$16 sps:$4 sm:$0xff]  }
 0x380   : > { %3272 = vmatpush2.bf16.msra.mxu0 %v6404_v15  ;;  %v6485_v15 = vld [vmem:[%s8919_s8 + $0x368] ss:$16 sps:$4 sm:$0xff]  }
 0x381   : > { %3313 = vmatpush2.bf16.msra.mxu1 %v6407_v16  ;;  %3323 = vmatprep.subr.bf16.mxu0 %v6412_v17  ;;  %v6490_v16 = vld [vmem:[%s8919_s8 + $0x14c] ss:$16 sps:$4 sm:$0xff]  }
 0x382   : > { %3364 = vmatprep.subr.bf16.mxu1 %v6415_v18  ;;  %v6493_v17 = vld [vmem:[%s8919_s8 + $0x34c] ss:$16 sps:$4 sm:$0xff]   ;;  %v6488_v18 = vld [vmem:[%s8919_s8 + $0x148] ss:$16 sps:$4 sm:$0xff]  }
 0x383   : > { %3274 = vmatmul.mubr.bf16.vlgmr.msra.gmra.mxu0 %v7644_v20 }
 0x384   : > { %3315 = vmatmul.mubr.bf16.vlgmr.msra.gmra.mxu1 %v7648_v21  ;;  %3324 = vmatpush1.bf16.msra.mxu0 %v6410_v22  ;;  %v6491_v22 = vld [vmem:[%s8919_s8 + $0x348] ss:$16 sps:$4 sm:$0xff]  }
 0x385   : > { %3365 = vmatpush1.bf16.msra.mxu1 %v6413_v23  ;;  %3325 = vmatprep.subr.bf16.mxu0 %v6418_v37  ;;  %v6496_v23 = vld [vmem:[%s8919_s8 + $0x12c] ss:$16 sps:$4 sm:$0xff]  }
 0x386   : > { %3366 = vmatprep.subr.bf16.mxu1 %v6421_v42  ;;  %3355 = vmatprep.mubr.bf16.mxu0 %v7372_v40  ;;  %v6433_v40 = vld [vmem:[%s8919_s8 + $0x28c] ss:$16 sps:$4 sm:$0xff]   ;;  %v6494_v42 = vld [vmem:[%s8919_s8 + $0x128] ss:$16 sps:$4 sm:$0xff]  }
 0x387   : > { %3396 = vmatprep.mubr.bf16.mxu1 %v7374_v41  ;;  %v6428_v41 = vld [vmem:[%s8919_s8 + $0x88] ss:$16 sps:$4 sm:$0xff]   ;;  %v6499_v37 = vld [vmem:[%s8919_s8 + $0x32c] ss:$16 sps:$4 sm:$0xff]  }
 0x388   : > { %3326 = vmatpush1.bf16.msra.mxu0 %v6416_v24  ;;  %v6497_v24 = vld [vmem:[%s8919_s8 + $0x328] ss:$16 sps:$4 sm:$0xff]  }
 0x389   : > { %3367 = vmatpush1.bf16.msra.mxu1 %v6419_v27  ;;  %3327 = vmatprep.subr.bf16.mxu0 %v6424_v28  ;;  %v6502_v27 = vld [vmem:[%s8919_s8 + $0x10c] ss:$16 sps:$4 sm:$0xff]  }
 0x38a   : > { %3368 = vmatprep.subr.bf16.mxu1 %v6427_v29  ;;  %v6505_v28 = vld [vmem:[%s8919_s8 + $0x30c] ss:$16 sps:$4 sm:$0xff]   ;;  %v6500_v29 = vld [vmem:[%s8919_s8 + $0x108] ss:$16 sps:$4 sm:$0xff]  }
 0x38c   : > { %3328 = vmatpush1.bf16.msra.mxu0 %v6422_v30  ;;  %v6503_v30 = vld [vmem:[%s8919_s8 + $0x308] ss:$16 sps:$4 sm:$0xff]  }
 0x38d   : > { %3369 = vmatpush1.bf16.msra.mxu1 %v6425_v31  ;;  %3329 = vmatprep.subr.bf16.mxu0 %v6430_v32  ;;  %v6508_v31 = vld [vmem:[%s8919_s8 + $0x4ec] ss:$16 sps:$4 sm:$0xff]  }
 0x38e   : > { %3370 = vmatprep.subr.bf16.mxu1 %v6433_v40  ;;  %v6511_v32 = vld [vmem:[%s8919_s8 + $0x6ec] ss:$16 sps:$4 sm:$0xff]   ;;  %v6506_v40 = vld [vmem:[%s8919_s8 + $0x4e8] ss:$16 sps:$4 sm:$0xff]  }
 0x390   : > { %3330 = vmatpush1.bf16.msra.mxu0 %v6428_v41  ;;  %v6509_v41 = vld [vmem:[%s8919_s8 + $0x6e8] ss:$16 sps:$4 sm:$0xff]  }
 0x391   : > { %3371 = vmatpush1.bf16.msra.mxu1 %v6431_v34  ;;  %3331 = vmatprep.subr.bf16.mxu0 %v6436_v35  ;;  %v6514_v34 = vld [vmem:[%s8919_s8 + $0x4cc] ss:$16 sps:$4 sm:$0xff]  }
 0x392   : > { %3372 = vmatprep.subr.bf16.mxu1 %v6439_v36  ;;  %v6517_v35 = vld [vmem:[%s8919_s8 + $0x6cc] ss:$16 sps:$4 sm:$0xff]   ;;  %v6512_v36 = vld [vmem:[%s8919_s8 + $0x4c8] ss:$16 sps:$4 sm:$0xff]  }
 0x394   : > { %3332 = vmatpush1.bf16.msra.mxu0 %v6434_v38  ;;  %v6515_v38 = vld [vmem:[%s8919_s8 + $0x6c8] ss:$16 sps:$4 sm:$0xff]  }
 0x395   : > { %3373 = vmatpush1.bf16.msra.mxu1 %v6437_v33  ;;  %3333 = vmatprep.subr.bf16.mxu0 %v6442_v39  ;;  %v6520_v33 = vld [vmem:[%s8919_s8 + $0x4ac] ss:$16 sps:$4 sm:$0xff]  }
 0x396   : > { %3374 = vmatprep.subr.bf16.mxu1 %v6445_v43  ;;  %v6523_v39 = vld [vmem:[%s8919_s8 + $0x6ac] ss:$16 sps:$4 sm:$0xff]   ;;  %v6518_v43 = vld [vmem:[%s8919_s8 + $0x4a8] ss:$16 sps:$4 sm:$0xff]  }
 0x398   : > { %3334 = vmatpush1.bf16.msra.mxu0 %v6440_v44  ;;  %v6529_v44 = vld [vmem:[%s8919_s8 + $0x68c] ss:$16 sps:$4 sm:$0xff]  }
 0x399   : > { %3375 = vmatpush1.bf16.msra.mxu1 %v6443_v45  ;;  %3335 = vmatprep.subr.bf16.mxu0 %v6448_v46  ;;  %v6524_v45 = vld [vmem:[%s8919_s8 + $0x488] ss:$16 sps:$4 sm:$0xff]   ;;  %v6535_v46 = vld [vmem:[%s8919_s8 + $0x66c] ss:$16 sps:$4 sm:$0xff]  }
 0x39a   : > { %3376 = vmatprep.subr.bf16.mxu1 %v6451_v47  ;;  %v6530_v47 = vld [vmem:[%s8919_s8 + $0x468] ss:$16 sps:$4 sm:$0xff]  }
 0x39c   : > { %3336 = vmatpush1.bf16.msra.mxu0 %v6446_v48  ;;  %v6533_v48 = vld [vmem:[%s8919_s8 + $0x668] ss:$16 sps:$4 sm:$0xff]  }
 0x39d   : > { %3377 = vmatpush1.bf16.msra.mxu1 %v6449_v49  ;;  %3337 = vmatprep.subr.bf16.mxu0 %v6454_v50  ;;  %v6538_v49 = vld [vmem:[%s8919_s8 + $0x44c] ss:$16 sps:$4 sm:$0xff]  }
 0x39e   : > { %3378 = vmatprep.subr.bf16.mxu1 %v6457_v53  ;;  %v6541_v50 = vld [vmem:[%s8919_s8 + $0x64c] ss:$16 sps:$4 sm:$0xff]   ;;  %v6536_v53 = vld [vmem:[%s8919_s8 + $0x448] ss:$16 sps:$4 sm:$0xff]  }
 0x3a0   : > { %3338 = vmatpush1.bf16.msra.mxu0 %v6452_v54  ;;  %v6539_v54 = vld [vmem:[%s8919_s8 + $0x648] ss:$16 sps:$4 sm:$0xff]  }
 0x3a1   : > { %3379 = vmatpush1.bf16.msra.mxu1 %v6455_v55  ;;  %3339 = vmatprep.subr.bf16.mxu0 %v6460_v56  ;;  %v6544_v55 = vld [vmem:[%s8919_s8 + $0x42c] ss:$16 sps:$4 sm:$0xff]  }
 0x3a2   : > { %3380 = vmatprep.subr.bf16.mxu1 %v6463_v57  ;;  %v6547_v56 = vld [vmem:[%s8919_s8 + $0x62c] ss:$16 sps:$4 sm:$0xff]   ;;  %v6542_v57 = vld [vmem:[%s8919_s8 + $0x428] ss:$16 sps:$4 sm:$0xff]  }
 0x3a4   : > { %3340 = vmatpush2.bf16.msra.mxu0 %v6458_v58  ;;  %v6545_v58 = vld [vmem:[%s8919_s8 + $0x628] ss:$16 sps:$4 sm:$0xff]  }
 0x3a5   : > { %3381 = vmatpush2.bf16.msra.mxu1 %v6461_v59  ;;  %3341 = vmatprep.subr.bf16.mxu0 %v6466_v60  ;;  %v6550_v59 = vld [vmem:[%s8919_s8 + $0x40c] ss:$16 sps:$4 sm:$0xff]  }
 0x3a6   : > { %3382 = vmatprep.subr.bf16.mxu1 %v6469_v61  ;;  %v6553_v60 = vld [vmem:[%s8919_s8 + $0x60c] ss:$16 sps:$4 sm:$0xff]   ;;  %v6548_v61 = vld [vmem:[%s8919_s8 + $0x408] ss:$16 sps:$4 sm:$0xff]  }
 0x3a8   : > { %3342 = vmatpush2.bf16.msra.mxu0 %v6464_v62  ;;  %v6551_v62 = vld [vmem:[%s8919_s8 + $0x608] ss:$16 sps:$4 sm:$0xff]  }
 0x3a9   : > { %3383 = vmatpush2.bf16.msra.mxu1 %v6467_v63  ;;  %3343 = vmatprep.subr.bf16.mxu0 %v6472_v0  ;;  %v6556_v63 = vld [vmem:[%s8919_s8 + $0x5ec] ss:$16 sps:$4 sm:$0xff]  }
 0x3aa   : > { %3384 = vmatprep.subr.bf16.mxu1 %v6475_v1  ;;  %v6559_v0 = vld [vmem:[%s8919_s8 + $0x7ec] ss:$16 sps:$4 sm:$0xff]   ;;  %v6554_v1 = vld [vmem:[%s8919_s8 + $0x5e8] ss:$16 sps:$4 sm:$0xff]  }
 0x3ac   : > { %3344 = vmatpush2.bf16.msra.mxu0 %v6470_v4  ;;  %v6557_v4 = vld [vmem:[%s8919_s8 + $0x7e8] ss:$16 sps:$4 sm:$0xff]  }
 0x3ad   : > { %3385 = vmatpush2.bf16.msra.mxu1 %v6473_v5  ;;  %3345 = vmatprep.subr.bf16.mxu0 %v6478_v6  ;;  %v6562_v5 = vld [vmem:[%s8919_s8 + $0x5cc] ss:$16 sps:$4 sm:$0xff]  }
 0x3ae   : > { %3386 = vmatprep.subr.bf16.mxu1 %v6481_v7  ;;  %v6565_v6 = vld [vmem:[%s8919_s8 + $0x7cc] ss:$16 sps:$4 sm:$0xff]   ;;  %v6560_v7 = vld [vmem:[%s8919_s8 + $0x5c8] ss:$16 sps:$4 sm:$0xff]  }
 0x3b0   : > { %3346 = vmatpush2.bf16.msra.mxu0 %v6476_v10  ;;  %v6563_v10 = vld [vmem:[%s8919_s8 + $0x7c8] ss:$16 sps:$4 sm:$0xff]  }
 0x3b1   : > { %3387 = vmatpush2.bf16.msra.mxu1 %v6479_v11  ;;  %3347 = vmatprep.subr.bf16.mxu0 %v6484_v12  ;;  %v6568_v11 = vld [vmem:[%s8919_s8 + $0x5ac] ss:$16 sps:$4 sm:$0xff]  }
 0x3b2   : > { %3388 = vmatprep.subr.bf16.mxu1 %v6487_v13  ;;  %v6571_v12 = vld [vmem:[%s8919_s8 + $0x7ac] ss:$16 sps:$4 sm:$0xff]   ;;  %v6566_v13 = vld [vmem:[%s8919_s8 + $0x5a8] ss:$16 sps:$4 sm:$0xff]  }
 0x3b4   : > { %3348 = vmatpush2.bf16.msra.mxu0 %v6482_v14  ;;  %v6569_v14 = vld [vmem:[%s8919_s8 + $0x7a8] ss:$16 sps:$4 sm:$0xff]  }
 0x3b5   : > { %3389 = vmatpush2.bf16.msra.mxu1 %v6485_v15  ;;  %3349 = vmatprep.subr.bf16.mxu0 %v6490_v16  ;;  %v6574_v15 = vld [vmem:[%s8919_s8 + $0x58c] ss:$16 sps:$4 sm:$0xff]  }
 0x3b6   : > { %3390 = vmatprep.subr.bf16.mxu1 %v6493_v17  ;;  %v6577_v16 = vld [vmem:[%s8919_s8 + $0x78c] ss:$16 sps:$4 sm:$0xff]   ;;  %v6572_v17 = vld [vmem:[%s8919_s8 + $0x588] ss:$16 sps:$4 sm:$0xff]  }
 0x3b8   : > { %3350 = vmatpush2.bf16.msra.mxu0 %v6488_v18  ;;  %v6575_v18 = vld [vmem:[%s8919_s8 + $0x788] ss:$16 sps:$4 sm:$0xff]  }
 0x3b9   : > { %3391 = vmatpush2.bf16.msra.mxu1 %v6491_v22  ;;  %3351 = vmatprep.subr.bf16.mxu0 %v6496_v23  ;;  %v6580_v22 = vld [vmem:[%s8919_s8 + $0x56c] ss:$16 sps:$4 sm:$0xff]  }
 0x3ba   : > { %3392 = vmatprep.subr.bf16.mxu1 %v6499_v37  ;;  %v6583_v23 = vld [vmem:[%s8919_s8 + $0x76c] ss:$16 sps:$4 sm:$0xff]   ;;  %v6578_v37 = vld [vmem:[%s8919_s8 + $0x568] ss:$16 sps:$4 sm:$0xff]  }
 0x3bc   : > { %3352 = vmatpush2.bf16.msra.mxu0 %v6494_v42  ;;  %v6581_v42 = vld [vmem:[%s8919_s8 + $0x768] ss:$16 sps:$4 sm:$0xff]  }
 0x3bd   : > { %3393 = vmatpush2.bf16.msra.mxu1 %v6497_v24  ;;  %3353 = vmatprep.subr.bf16.mxu0 %v6502_v27  ;;  %v6586_v24 = vld [vmem:[%s8919_s8 + $0x54c] ss:$16 sps:$4 sm:$0xff]  }
 0x3be   : > { %3394 = vmatprep.subr.bf16.mxu1 %v6505_v28  ;;  %v6589_v27 = vld [vmem:[%s8919_s8 + $0x74c] ss:$16 sps:$4 sm:$0xff]   ;;  %v6584_v28 = vld [vmem:[%s8919_s8 + $0x548] ss:$16 sps:$4 sm:$0xff]  }
 0x3c0   : > { %3354 = vmatpush2.bf16.msra.mxu0 %v6500_v29  ;;  %v6587_v29 = vld [vmem:[%s8919_s8 + $0x748] ss:$16 sps:$4 sm:$0xff]  }
 0x3c1   : > { %3395 = vmatpush2.bf16.msra.mxu1 %v6503_v30  ;;  %3405 = vmatprep.subr.bf16.mxu0 %v6508_v31  ;;  %v6592_v30 = vld [vmem:[%s8919_s8 + $0x52c] ss:$16 sps:$4 sm:$0xff]  }
 0x3c2   : > { %3446 = vmatprep.subr.bf16.mxu1 %v6511_v32  ;;  %v6595_v31 = vld [vmem:[%s8919_s8 + $0x72c] ss:$16 sps:$4 sm:$0xff]   ;;  %v6590_v32 = vld [vmem:[%s8919_s8 + $0x528] ss:$16 sps:$4 sm:$0xff]  }
 0x3c3   : > { %3356 = vmatmul.mubr.bf16.vlgmr.msra.gmra.mxu0 %v7438_v2  ;;  %v6521_v2 = vld [vmem:[%s8919_s8 + $0x6a8] ss:$16 sps:$4 sm:$0xff]  }
 0x3c4   : > { %3397 = vmatmul.mubr.bf16.vlgmr.msra.gmra.mxu1 %v7440_v3  ;;  %3406 = vmatpush1.bf16.msra.mxu0 %v6506_v40  ;;  %v6526_v3 = vld [vmem:[%s8919_s8 + $0x48c] ss:$16 sps:$4 sm:$0xff]   ;;  %v6593_v40 = vld [vmem:[%s8919_s8 + $0x728] ss:$16 sps:$4 sm:$0xff]  }
 0x3c5   : > { %3447 = vmatpush1.bf16.msra.mxu1 %v6509_v41  ;;  %3407 = vmatprep.subr.bf16.mxu0 %v6514_v34  ;;  %v6598_v41 = vld [vmem:[%s8919_s8 + $0x50c] ss:$16 sps:$4 sm:$0xff]  }
 0x3c6   : > { %3448 = vmatprep.subr.bf16.mxu1 %v6517_v35  ;;  %3437 = vmatprep.mubr.bf16.mxu0 %v7454_v8  ;;  %v6527_v8 = vld [vmem:[%s8919_s8 + $0x688] ss:$16 sps:$4 sm:$0xff]   ;;  %v6601_v34 = vld [vmem:[%s8919_s8 + $0x70c] ss:$16 sps:$4 sm:$0xff]  }
 0x3c7   : > { %3478 = vmatprep.mubr.bf16.mxu1 %v7456_v9  ;;  %v6532_v9 = vld [vmem:[%s8919_s8 + $0x46c] ss:$16 sps:$4 sm:$0xff]   ;;  %v6596_v35 = vld [vmem:[%s8919_s8 + $0x508] ss:$16 sps:$4 sm:$0xff]  }
 0x3c8   : > { %3408 = vmatpush1.bf16.msra.mxu0 %v6512_v36  ;;  %v6599_v36 = vld [vmem:[%s8919_s8 + $0x708] ss:$16 sps:$4 sm:$0xff]  }
 0x3c9   : > { %3449 = vmatpush1.bf16.msra.mxu1 %v6515_v38  ;;  %3409 = vmatprep.subr.bf16.mxu0 %v6520_v33  ;;  %v6604_v38 = vld [vmem:[%s8921_s10 + $0xac] ss:$12 sps:$4 sm:$0xff]   ;;  %v6602_v33 = vld [vmem:[%s8921_s10 + $0xa8] ss:$12 sps:$4 sm:$0xff]  }
 0x3ca   : > { %3450 = vmatprep.subr.bf16.mxu1 %v6523_v39  ;;  %v6607_v39 = vld [vmem:[%s8921_s10 + $0x94] ss:$12 sps:$4 sm:$0xff]  }
 0x3cc   : > { %3410 = vmatpush1.bf16.msra.mxu0 %v6518_v43 }
 0x3cd   : > { %3451 = vmatpush1.bf16.msra.mxu1 %v6521_v2  ;;  %3411 = vmatprep.subr.bf16.mxu0 %v6526_v3  ;;  %v6605_v3 = vld [vmem:[%s8921_s10 + $0x90] ss:$12 sps:$4 sm:$0xff]  }
 0x3ce   : > { %3452 = vmatprep.subr.bf16.mxu1 %v6529_v44 }
 0x3d0   : > { %3412 = vmatpush1.bf16.msra.mxu0 %v6524_v45 }
 0x3d1   : > { %3453 = vmatpush1.bf16.msra.mxu1 %v6527_v8  ;;  %3413 = vmatprep.subr.bf16.mxu0 %v6532_v9  ;;  %v6610_v8 = vld [vmem:[%s8921_s10 + $0x7c] ss:$12 sps:$4 sm:$0xff]  }
 0x3d2   : > { %3454 = vmatprep.subr.bf16.mxu1 %v6535_v46 }
 0x3d4   : > { %3414 = vmatpush1.bf16.msra.mxu0 %v6530_v47 }
 0x3d5   : > { %3455 = vmatpush1.bf16.msra.mxu1 %v6533_v48  ;;  %3415 = vmatprep.subr.bf16.mxu0 %v6538_v49  ;;  %v6613_v48 = vld [vmem:[%s8921_s10 + $0x64] ss:$12 sps:$4 sm:$0xff]   ;;  %v6666_v49 = vld [vmem:[%s8921_s10 + $0x228] ss:$12 sps:$4 sm:$0xff]  }
 0x3d6   : > { %3456 = vmatprep.subr.bf16.mxu1 %v6541_v50  ;;  %v6668_v50 = vld [vmem:[%s8921_s10 + $0x22c] ss:$12 sps:$4 sm:$0xff]  }
 0x3d8   : > { %3416 = vmatpush1.bf16.msra.mxu0 %v6536_v53  ;;  %v6671_v53 = vld [vmem:[%s8921_s10 + $0x214] ss:$12 sps:$4 sm:$0xff]  }
 0x3d9   : > { %3457 = vmatpush1.bf16.msra.mxu1 %v6539_v54  ;;  %3417 = vmatprep.subr.bf16.mxu0 %v6544_v55  ;;  %v6611_v54 = vld [vmem:[%s8921_s10 + $0x60] ss:$12 sps:$4 sm:$0xff]   ;;  %v6669_v55 = vld [vmem:[%s8921_s10 + $0x210] ss:$12 sps:$4 sm:$0xff]  }
 0x3da   : > { %3458 = vmatprep.subr.bf16.mxu1 %v6547_v56  ;;  %v6616_v56 = vld [vmem:[%s8921_s10 + $0x4c] ss:$12 sps:$4 sm:$0xff]  }
 0x3dc   : > { %3418 = vmatpush1.bf16.msra.mxu0 %v6542_v57  ;;  %v6674_v57 = vld [vmem:[%s8921_s10 + $0x1fc] ss:$12 sps:$4 sm:$0xff]  }
 0x3dd   : > { %3459 = vmatpush1.bf16.msra.mxu1 %v6545_v58  ;;  %3419 = vmatprep.subr.bf16.mxu0 %v6550_v59  ;;  %v6614_v58 = vld [vmem:[%s8921_s10 + $0x48] ss:$12 sps:$4 sm:$0xff]   ;;  %v6672_v59 = vld [vmem:[%s8921_s10 + $0x1f8] ss:$12 sps:$4 sm:$0xff]  }
 0x3de   : > { %3460 = vmatprep.subr.bf16.mxu1 %v6553_v60  ;;  %v6619_v60 = vld [vmem:[%s8921_s10 + $0x34] ss:$12 sps:$4 sm:$0xff]  }
 0x3e0   : > { %3420 = vmatpush1.bf16.msra.mxu0 %v6548_v61  ;;  %v6677_v61 = vld [vmem:[%s8921_s10 + $0x1e4] ss:$12 sps:$4 sm:$0xff]  }
 0x3e1   : > { %3461 = vmatpush1.bf16.msra.mxu1 %v6551_v62  ;;  %3421 = vmatprep.subr.bf16.mxu0 %v6556_v63  ;;  %v6617_v62 = vld [vmem:[%s8921_s10 + $0x30] ss:$12 sps:$4 sm:$0xff]   ;;  %v6675_v63 = vld [vmem:[%s8921_s10 + $0x1e0] ss:$12 sps:$4 sm:$0xff]  }
 0x3e2   : > { %3462 = vmatprep.subr.bf16.mxu1 %v6559_v0  ;;  %v6622_v0 = vld [vmem:[%s8921_s10 + $0x1c] ss:$12 sps:$4 sm:$0xff]  }
 0x3e4   : > { %3422 = vmatpush2.bf16.msra.mxu0 %v6554_v1  ;;  %v6680_v1 = vld [vmem:[%s8921_s10 + $0x1cc] ss:$12 sps:$4 sm:$0xff]  }
 0x3e5   : > { %3463 = vmatpush2.bf16.msra.mxu1 %v6557_v4  ;;  %3423 = vmatprep.subr.bf16.mxu0 %v6562_v5  ;;  %v6620_v4 = vld [vmem:[%s8921_s10 + $0x18] ss:$12 sps:$4 sm:$0xff]   ;;  %v6678_v5 = vld [vmem:[%s8921_s10 + $0x1c8] ss:$12 sps:$4 sm:$0xff]  }
 0x3e6   : > { %3464 = vmatprep.subr.bf16.mxu1 %v6565_v6  ;;  %v6625_v6 = vld [vmem:[%s8921_s10 + $0x4] ss:$12 sps:$4 sm:$0xff]  }
 0x3e8   : > { %3424 = vmatpush2.bf16.msra.mxu0 %v6560_v7  ;;  %v6683_v7 = vld [vmem:[%s8921_s10 + $0x1b4] ss:$12 sps:$4 sm:$0xff]  }
 0x3e9   : > { %3465 = vmatpush2.bf16.msra.mxu1 %v6563_v10  ;;  %3425 = vmatprep.subr.bf16.mxu0 %v6568_v11  ;;  %v6623_v10 = vld [vmem:[%s8921_s10] ss:$12 sps:$4 sm:$0xff]   ;;  %v6681_v11 = vld [vmem:[%s8921_s10 + $0x1b0] ss:$12 sps:$4 sm:$0xff]  }
 0x3ea   : > { %3466 = vmatprep.subr.bf16.mxu1 %v6571_v12  ;;  %v6628_v12 = vld [vmem:[%s8921_s10 + $0x16c] ss:$12 sps:$4 sm:$0xff]  }
 0x3ec   : > { %3426 = vmatpush2.bf16.msra.mxu0 %v6566_v13  ;;  %v6686_v13 = vld [vmem:[%s8921_s10 + $0x19c] ss:$12 sps:$4 sm:$0xff]  }
 0x3ed   : > { %3467 = vmatpush2.bf16.msra.mxu1 %v6569_v14  ;;  %3427 = vmatprep.subr.bf16.mxu0 %v6574_v15  ;;  %v6626_v14 = vld [vmem:[%s8921_s10 + $0x168] ss:$12 sps:$4 sm:$0xff]   ;;  %v6684_v15 = vld [vmem:[%s8921_s10 + $0x198] ss:$12 sps:$4 sm:$0xff]  }
 0x3ee   : > { %3468 = vmatprep.subr.bf16.mxu1 %v6577_v16  ;;  %v6631_v16 = vld [vmem:[%s8921_s10 + $0x154] ss:$12 sps:$4 sm:$0xff]  }
 0x3f0   : > { %3428 = vmatpush2.bf16.msra.mxu0 %v6572_v17  ;;  %v6689_v17 = vld [vmem:[%s8921_s10 + $0x184] ss:$12 sps:$4 sm:$0xff]  }
 0x3f1   : > { %3469 = vmatpush2.bf16.msra.mxu1 %v6575_v18  ;;  %3429 = vmatprep.subr.bf16.mxu0 %v6580_v22  ;;  %v6629_v18 = vld [vmem:[%s8921_s10 + $0x150] ss:$12 sps:$4 sm:$0xff]   ;;  %v6687_v22 = vld [vmem:[%s8921_s10 + $0x180] ss:$12 sps:$4 sm:$0xff]  }
 0x3f2   : > { %3470 = vmatprep.subr.bf16.mxu1 %v6583_v23  ;;  %v6634_v23 = vld [vmem:[%s8921_s10 + $0x13c] ss:$12 sps:$4 sm:$0xff]  }
 0x3f4   : > { %3430 = vmatpush2.bf16.msra.mxu0 %v6578_v37  ;;  %v6692_v37 = vld [vmem:[%s8921_s10 + $0x2ec] ss:$12 sps:$4 sm:$0xff]  }
 0x3f5   : > { %3471 = vmatpush2.bf16.msra.mxu1 %v6581_v42  ;;  %3431 = vmatprep.subr.bf16.mxu0 %v6586_v24  ;;  %v6632_v42 = vld [vmem:[%s8921_s10 + $0x138] ss:$12 sps:$4 sm:$0xff]   ;;  %v6690_v24 = vld [vmem:[%s8921_s10 + $0x2e8] ss:$12 sps:$4 sm:$0xff]  }
 0x3f6   : > { %3472 = vmatprep.subr.bf16.mxu1 %v6589_v27  ;;  %v6637_v27 = vld [vmem:[%s8921_s10 + $0x124] ss:$12 sps:$4 sm:$0xff]  }
 0x3f8   : > { %3432 = vmatpush2.bf16.msra.mxu0 %v6584_v28  ;;  %v6695_v28 = vld [vmem:[%s8921_s10 + $0x2d4] ss:$12 sps:$4 sm:$0xff]  }
 0x3f9   : > { %3473 = vmatpush2.bf16.msra.mxu1 %v6587_v29  ;;  %3433 = vmatprep.subr.bf16.mxu0 %v6592_v30  ;;  %v6635_v29 = vld [vmem:[%s8921_s10 + $0x120] ss:$12 sps:$4 sm:$0xff]   ;;  %v6693_v30 = vld [vmem:[%s8921_s10 + $0x2d0] ss:$12 sps:$4 sm:$0xff]  }
 0x3fa   : > { %3474 = vmatprep.subr.bf16.mxu1 %v6595_v31  ;;  %v6640_v31 = vld [vmem:[%s8921_s10 + $0x10c] ss:$12 sps:$4 sm:$0xff]  }
 0x3fc   : > { %3434 = vmatpush2.bf16.msra.mxu0 %v6590_v32  ;;  %v6698_v32 = vld [vmem:[%s8921_s10 + $0x2bc] ss:$12 sps:$4 sm:$0xff]  }
 0x3fd   : > { %3475 = vmatpush2.bf16.msra.mxu1 %v6593_v40  ;;  %3435 = vmatprep.subr.bf16.mxu0 %v6598_v41  ;;  %v6638_v40 = vld [vmem:[%s8921_s10 + $0x108] ss:$12 sps:$4 sm:$0xff]   ;;  %v6696_v41 = vld [vmem:[%s8921_s10 + $0x2b8] ss:$12 sps:$4 sm:$0xff]  }
 0x3fe   : > { %3476 = vmatprep.subr.bf16.mxu1 %v6601_v34  ;;  %v6643_v34 = vld [vmem:[%s8921_s10 + $0xf4] ss:$12 sps:$4 sm:$0xff]  }
 0x400   : > { %3436 = vmatpush2.bf16.msra.mxu0 %v6596_v35  ;;  %v6701_v35 = vld [vmem:[%s8921_s10 + $0x2a4] ss:$12 sps:$4 sm:$0xff]  }
 0x401   : > { %3477 = vmatpush2.bf16.msra.mxu1 %v6599_v36  ;;  %4152 = vmatprep.subr.bf16.mxu0 %v6604_v38  ;;  %v6641_v36 = vld [vmem:[%s8921_s10 + $0xf0] ss:$12 sps:$4 sm:$0xff]   ;;  %v6699_v38 = vld [vmem:[%s8921_s10 + $0x2a0] ss:$12 sps:$4 sm:$0xff]  }
 0x402   : > { %4193 = vmatprep.subr.bf16.mxu1 %v6668_v50  ;;  %v6650_v50 = vld [vmem:[%s8921_s10 + $0x170] ss:$12 sps:$4 sm:$0xff]  }
 0x403   : > { %v8045_v43 = vpop.f32.mrf.mxu0  ;;  %3438 = vmatmul.mubr.bf16.vlgmr.msra.gmra.mxu0 %v7644_v20  ;;  %v6608_v20 = vld [vmem:[%s8921_s10 + $0x78] ss:$12 sps:$4 sm:$0xff]  }
 0x404   : > { %v8047_v2 = vpop.f32.mrf.mxu1  ;;  %3479 = vmatmul.mubr.bf16.vlgmr.msra.gmra.mxu1 %v7648_v21  ;;  %4153 = vmatpush1.bf16.msra.mxu0 %v6602_v33  ;;  %v6646_v33 = vld [vmem:[%s8921_s10 + $0xdc] ss:$12 sps:$4 sm:$0xff]  }
 0x405   : > { %v8054_v44 = vpop.f32.mrf.mxu0  ;;  %4154 = vmatprep.subr.bf16.mxu0 %v6607_v39  ;;  %4194 = vmatpush1.bf16.msra.mxu1 %v6666_v49  ;;  %v6704_v39 = vld [vmem:[%s8921_s10 + $0x28c] ss:$12 sps:$4 sm:$0xff]   ;;  %v6705_v49 = vld [vmem:[%s8921_s10 + $0x270] ss:$12 sps:$4 sm:$0xff]  }
 0x406   : > { %v8056_v45 = vpop.f32.mrf.mxu1  ;;  %4195 = vmatprep.subr.bf16.mxu1 %v6671_v53 }
 0x407   : > { %v3197_v9 = vpop.f32.mrf.mxu0 }
 0x408   : > { %v3238_v46 = vpop.f32.mrf.mxu1  ;;  %4155 = vmatpush1.bf16.msra.mxu0 %v6605_v3  ;;  %v8211_v3 = vld [vmem:[%s8920_s9] sm:$0xf]  ;;  %v6702_v9 = vld [vmem:[%s8921_s10 + $0x288] ss:$12 sps:$4 sm:$0xff]  }
 0x409   : > { %v3198_v21 = vpop.f32.mrf.mxu0  ;;  %4156 = vmatprep.subr.bf16.mxu0 %v6610_v8  ;;  %4196 = vmatpush1.bf16.msra.mxu1 %v6669_v55  ;;  %v6644_v8 = vld [vmem:[%s8921_s10 + $0xd8] ss:$12 sps:$4 sm:$0xff]  }
 0x40a   : > { %v3239_v47 = vpop.f32.mrf.mxu1  ;;  %4197 = vmatprep.subr.bf16.mxu1 %v6674_v57  ;;  %v6649_v46 = vld [vmem:[%s8921_s10 + $0xc4] ss:$12 sps:$4 sm:$0xff]   ;;  %v3142_v21 = vrot.slane %v8211_v3, %v7408_v51 }
 0x40b   : > { %v3146_v47 = vrot.slane %v8211_v3, %v7344_v25 }
 0x40c   : > { %4157 = vmatpush1.bf16.msra.mxu0 %v6608_v20  ;;  %v6707_v20 = vld [vmem:[%s8921_s10 + $0x274] ss:$12 sps:$4 sm:$0xff]   ;;  %v3194_v53 = vadd.f32 %v8045_v43, %v3142_v21  ;;  %v4330_v21 = vld [vmem:[%s8984_s16 + $0x68] sm:$0xff] }
 0x40d   : > { %4158 = vmatprep.subr.bf16.mxu0 %v6613_v48  ;;  %4198 = vmatpush1.bf16.msra.mxu1 %v6672_v59  ;;  %v6647_v48 = vld [vmem:[%s8921_s10 + $0xc0] ss:$12 sps:$4 sm:$0xff]  }
 0x40e   : > { %4199 = vmatprep.subr.bf16.mxu1 %v6677_v61  ;;  %v3235_v55 = vadd.f32 %v8047_v2, %v3194_v53  ;;  %v3154_v53 = vrot.slane %v8211_v3, %v1567_v26 }
 0x410   : > { %4159 = vmatpush1.bf16.msra.mxu0 %v6611_v54  ;;  %v3196_v54 = vadd.f32 %v8054_v44, %v3146_v47  ;;  %v6708_v44 = vld [vmem:[%s8921_s10 + $0x258] ss:$12 sps:$4 sm:$0xff]  }
 0x411   : > { %4160 = vmatprep.subr.bf16.mxu0 %v6616_v56  ;;  %4200 = vmatpush1.bf16.msra.mxu1 %v6675_v63  ;;  %v4345_v47 = vld [vmem:[%s8984_s16 + $0xe0] sm:$0xff] }
 0x412   : > { %4201 = vmatprep.subr.bf16.mxu1 %v6680_v1 }
 0x414   : > { %4161 = vmatpush1.bf16.msra.mxu0 %v6614_v58  ;;  %v3237_v58 = vadd.f32 %v8056_v45, %v3196_v54  ;;  %v4328_v54 = vld [vmem:[%s8984_s16 + $0x58] sm:$0xff] }
 0x415   : > { %4162 = vmatprep.subr.bf16.mxu0 %v6619_v60  ;;  %4202 = vmatpush1.bf16.msra.mxu1 %v6678_v5 }
 0x416   : > { %4203 = vmatprep.subr.bf16.mxu1 %v6683_v7 }
 0x418   : > { %4163 = vmatpush1.bf16.msra.mxu0 %v6617_v62  ;;  %v6710_v62 = vld [vmem:[%s8921_s10 + $0x25c] ss:$12 sps:$4 sm:$0xff]  }
 0x419   : > { %4164 = vmatprep.subr.bf16.mxu0 %v6622_v0  ;;  %4204 = vmatpush1.bf16.msra.mxu1 %v6681_v11 }
 0x41a   : > { %4205 = vmatprep.subr.bf16.mxu1 %v6686_v13 }
 0x41c   : > { %4165 = vmatpush1.bf16.msra.mxu0 %v6620_v4 }
 0x41d   : > { %4166 = vmatprep.subr.bf16.mxu0 %v6625_v6  ;;  %4206 = vmatpush1.bf16.msra.mxu1 %v6684_v15  ;;  %v6713_v6 = vld [vmem:[%s8921_s10 + $0x244] ss:$12 sps:$4 sm:$0xff]  }
 0x41e   : > { %4207 = vmatprep.subr.bf16.mxu1 %v6689_v17  ;;  %v6714_v15 = vld [vmem:[%s8921_s10 + $0x2f0] ss:$12 sps:$4 sm:$0xff]   ;;  %v6654_v17 = vld [vmem:[%s8921_s10 + $0x140] ss:$12 sps:$4 sm:$0xff]  }
 0x420   : > { %4167 = vmatpush1.bf16.msra.mxu0 %v6623_v10  ;;  %v6711_v10 = vld [vmem:[%s8921_s10 + $0x240] ss:$12 sps:$4 sm:$0xff]  }
 0x421   : > { %4168 = vmatprep.subr.bf16.mxu0 %v6628_v12  ;;  %4208 = vmatpush1.bf16.msra.mxu1 %v6687_v22  ;;  %v6651_v12 = vld [vmem:[%s8921_s10 + $0xb0] ss:$12 sps:$4 sm:$0xff]   ;;  %v6656_v22 = vld [vmem:[%s8921_s10 + $0x128] ss:$12 sps:$4 sm:$0xff]  }
 0x422   : > { %4209 = vmatprep.subr.bf16.mxu1 %v6692_v37  ;;  %v6658_v37 = vld [vmem:[%s8921_s10 + $0x110] ss:$12 sps:$4 sm:$0xff]  }
 0x424   : > { %4169 = vmatpush2.bf16.msra.mxu0 %v6626_v14  ;;  %v6652_v14 = vld [vmem:[%s8921_s10 + $0x158] ss:$12 sps:$4 sm:$0xff]  }
 0x425   : > { %4170 = vmatprep.subr.bf16.mxu0 %v6631_v16  ;;  %4210 = vmatpush2.bf16.msra.mxu1 %v6690_v24  ;;  %v6653_v16 = vld [vmem:[%s8921_s10 + $0x98] ss:$12 sps:$4 sm:$0xff]  }
 0x426   : > { %4211 = vmatprep.subr.bf16.mxu1 %v6695_v28  ;;  %v6660_v24 = vld [vmem:[%s8921_s10 + $0xf8] ss:$12 sps:$4 sm:$0xff]   ;;  %v6662_v28 = vld [vmem:[%s8921_s10 + $0xe0] ss:$12 sps:$4 sm:$0xff]  }
 0x428   : > { %4171 = vmatpush2.bf16.msra.mxu0 %v6629_v18  ;;  %v6655_v18 = vld [vmem:[%s8921_s10 + $0x80] ss:$12 sps:$4 sm:$0xff]  }
 0x429   : > { %4172 = vmatprep.subr.bf16.mxu0 %v6634_v23  ;;  %4212 = vmatpush2.bf16.msra.mxu1 %v6693_v30  ;;  %v6657_v23 = vld [vmem:[%s8921_s10 + $0x68] ss:$12 sps:$4 sm:$0xff]  }
 0x42a   : > { %4213 = vmatprep.subr.bf16.mxu1 %v6698_v32  ;;  %v6664_v30 = vld [vmem:[%s8921_s10 + $0xc8] ss:$12 sps:$4 sm:$0xff]  }
 0x42c   : > { %4173 = vmatpush2.bf16.msra.mxu0 %v6632_v42  ;;  %v6659_v42 = vld [vmem:[%s8921_s10 + $0x50] ss:$12 sps:$4 sm:$0xff]  }
 0x42d   : > { %4174 = vmatprep.subr.bf16.mxu0 %v6637_v27  ;;  %4214 = vmatpush2.bf16.msra.mxu1 %v6696_v41  ;;  %v6661_v27 = vld [vmem:[%s8921_s10 + $0x38] ss:$12 sps:$4 sm:$0xff]  }
 0x42e   : > { %4215 = vmatprep.subr.bf16.mxu1 %v6701_v35 }
 0x430   : > { %4175 = vmatpush2.bf16.msra.mxu0 %v6635_v29  ;;  %v6663_v29 = vld [vmem:[%s8921_s10 + $0x20] ss:$12 sps:$4 sm:$0xff]  }
 0x431   : > { %4176 = vmatprep.subr.bf16.mxu0 %v6640_v31  ;;  %4216 = vmatpush2.bf16.msra.mxu1 %v6699_v38  ;;  %v6665_v31 = vld [vmem:[%s8921_s10 + $0x8] ss:$12 sps:$4 sm:$0xff]  }
 0x432   : > { %4217 = vmatprep.subr.bf16.mxu1 %v6704_v39  ;;  %v4348_v39 = vld [vmem:[%s8984_s16 + $0xf8] sm:$0xff] }
 0x434   : > { %4177 = vmatpush2.bf16.msra.mxu0 %v6638_v40 }
 0x435   : > { %4178 = vmatprep.subr.bf16.mxu0 %v6643_v34  ;;  %4218 = vmatpush2.bf16.msra.mxu1 %v6702_v9  ;;  %v4347_v9 = vld [vmem:[%s8984_s16 + $0xf0] sm:$0xff] }
 0x436   : > { %4219 = vmatprep.subr.bf16.mxu1 %v6707_v20  ;;  %v4346_v20 = vld [vmem:[%s8984_s16 + $0xe8] sm:$0xff] }
 0x438   : > { %4179 = vmatpush2.bf16.msra.mxu0 %v6641_v36 }
 0x439   : > { %4180 = vmatprep.subr.bf16.mxu0 %v6646_v33  ;;  %4220 = vmatpush2.bf16.msra.mxu1 %v6705_v49  ;;  %v4329_v49 = vld [vmem:[%s8984_s16 + $0x60] sm:$0xff] }
 0x43a   : > { %4221 = vmatprep.subr.bf16.mxu1 %v6710_v62 }
 0x43c   : > { %4181 = vmatpush2.bf16.msra.mxu0 %v6644_v8  ;;  %v4332_v8 = vld [vmem:[%s8984_s16 + $0x78] sm:$0xff] }
 0x43d   : > { %4182 = vmatprep.subr.bf16.mxu0 %v6649_v46  ;;  %4222 = vmatpush2.bf16.msra.mxu1 %v6708_v44  ;;  %v4331_v46 = vld [vmem:[%s8984_s16 + $0x70] sm:$0xff] }
 0x43e   : > { %4223 = vmatprep.subr.bf16.mxu1 %v6713_v6  ;;  %v4323_v6 = vld [vmem:[%s8984_s16 + $0x30] sm:$0xff] }
 0x440   : > { %4183 = vmatpush2.bf16.msra.mxu0 %v6647_v48  ;;  %v3150_v48 = vrot.slane %v8211_v3, %v7411_v52  ;;  %v4326_v3 = vld [vmem:[%s8984_s16 + $0x48] sm:$0xff] }
 0x441   : > { %5849 = vmatprep.subr.bf16.mxu0 %v6650_v50  ;;  %4224 = vmatpush2.bf16.msra.mxu1 %v6711_v10  ;;  %v4344_v50 = vld [vmem:[%s8984_s16 + $0xd8] sm:$0xff] }
 0x442   : > { %5871 = vmatprep.subr.bf16.mxu1 %v6714_v15 }
 0x443   : > { %v3275_v56 = vpop.f32.mrf.mxu0 }
 0x444   : > { %v3316_v57 = vpop.f32.mrf.mxu1  ;;  %v3276_v59 = vadd.f32 %v3275_v56, %v3235_v55  ;;  %v4343_v55 = vld [vmem:[%s8984_s16 + $0xd0] sm:$0xff] }
 0x445   : > { %v3277_v60 = vpop.f32.mrf.mxu0 }
 0x446   : > { %v3318_v61 = vpop.f32.mrf.mxu1  ;;  %v3317_v63 = vadd.f32 %v3316_v57, %v3276_v59  ;;  %v3278_v43 = vadd.f32 %v3277_v60, %v3237_v58  ;;  %v4327_v57 = vld [vmem:[%s8984_s16 + $0x50] sm:$0xff]  ;;  %v4341_v58 = vld [vmem:[%s8984_s16 + $0xc0] sm:$0xff] }
 0x447   : > { %v3279_v0 = vpop.f32.mrf.mxu0  ;;  %v4325_v60 = vld [vmem:[%s8984_s16 + $0x40] sm:$0xff] }
 0x448   : > { %v3320_v1 = vpop.f32.mrf.mxu1  ;;  %v3319_v2 = vadd.f32 %v3318_v61, %v3278_v43  ;;  %v3487_v4 = vmax.f32 %v3317_v63, 0.0  ;;  %v4340_v63 = vld [vmem:[%s8984_s16 + $0xb8] sm:$0xff] }
 0x449   : > { %v3280_v45 = vpop.f32.mrf.mxu0  ;;  %v4324_v0 = vld [vmem:[%s8984_s16 + $0x38] sm:$0xff] }
 0x44a   : > { %v3321_v5 = vpop.f32.mrf.mxu1  ;;  %v3488_v7 = vmax.f32 %v3319_v2, 0.0  ;;  %v3491_v13 = vpack.c.bf16 %v3487_v4, %v3487_v4  ;;  %v4339_v4 = vld [vmem:[%s8984_s16 + $0xb0] sm:$0xff] }
 0x44c   : > { %v3492_v11 = vpack.c.bf16 %v3488_v7, %v3488_v7 }
 0x44e   : > { %4184 = vmatprep.mubr.bf16.mxu0 %v3492_v11 }
 0x44f   : > { %4185 = vmatmul.mubr.bf16.vlgmr.msra.gmra.mxu0 %v3491_v13 }
 0x450   : > { %5850 = vmatpush3.bf16.msra.mxu0 %v6651_v12  ;;  %4266 = vmatprep.mubr.bf16.mxu0 %v3492_v11  ;;  %v4338_v11 = vld [vmem:[%s8984_s16 + $0xa8] sm:$0xff] }
 0x451   : > { %5851 = vmatprep.subr.bf16.mxu0 %v6652_v14 }
 0x454   : > { %5852 = vmatpush3.bf16.msra.mxu0 %v6653_v16 }
 0x455   : > { %5853 = vmatprep.subr.bf16.mxu0 %v6654_v17  ;;  %v4337_v17 = vld [vmem:[%s8984_s16 + $0xa0] sm:$0xff] }
 0x458   : > { %5854 = vmatpush3.bf16.msra.mxu0 %v6655_v18 }
 0x459   : > { %5855 = vmatprep.subr.bf16.mxu0 %v6656_v22  ;;  %v4321_v22 = vld [vmem:[%s8984_s16 + $0x20] sm:$0xff] }
 0x45c   : > { %5856 = vmatpush3.bf16.msra.mxu0 %v6657_v23 }
 0x45d   : > { %5857 = vmatprep.subr.bf16.mxu0 %v6658_v37  ;;  %v6715_v37 = vld [vmem:[%s8921_s10 + $0x230] ss:$12 sps:$4 sm:$0xff]  }
 0x460   : > { %5858 = vmatpush3.bf16.msra.mxu0 %v6659_v42 }
 0x461   : > { %5859 = vmatprep.subr.bf16.mxu0 %v6660_v24  ;;  %v6716_v24 = vld [vmem:[%s8921_s10 + $0x2d8] ss:$12 sps:$4 sm:$0xff]  }
 0x464   : > { %5860 = vmatpush3.bf16.msra.mxu0 %v6661_v27  ;;  %v6717_v27 = vld [vmem:[%s8921_s10 + $0x218] ss:$12 sps:$4 sm:$0xff]  }
 0x465   : > { %5861 = vmatprep.subr.bf16.mxu0 %v6662_v28  ;;  %v6718_v28 = vld [vmem:[%s8921_s10 + $0x2c0] ss:$12 sps:$4 sm:$0xff]  }
 0x468   : > { %5862 = vmatpush3.bf16.msra.mxu0 %v6663_v29  ;;  %v6719_v29 = vld [vmem:[%s8921_s10 + $0x200] ss:$12 sps:$4 sm:$0xff]  }
 0x469   : > { %5863 = vmatprep.subr.bf16.mxu0 %v6664_v30  ;;  %v6720_v30 = vld [vmem:[%s8921_s10 + $0x2a8] ss:$12 sps:$4 sm:$0xff]  }
 0x46c   : > { %5864 = vmatpush3.bf16.msra.mxu0 %v6665_v31  ;;  %v6721_v31 = vld [vmem:[%s8921_s10 + $0x1e8] ss:$12 sps:$4 sm:$0xff]  }
 0x46d   : > { %5893 = vmatprep.subr.mxu0 %v4348_v39 }
 0x46f   : > { %4267 = vmatmul.mubr.bf16.vlgmr.msra.gmra.mxu0 %v3491_v13  ;;  %v4322_v13 = vld [vmem:[%s8984_s16 + $0x28] sm:$0xff] }
 0x470   : > { %5894 = vmatpush3.msra.mxu0 %v4332_v8  ;;  %v4336_v8 = vld [vmem:[%s8984_s16 + $0x98] sm:$0xff] }
 0x471   : > { %5895 = vmatprep.subr.mxu0 %v4347_v9  ;;  %v4320_v9 = vld [vmem:[%s8984_s16 + $0x18] sm:$0xff] }
 0x472   : > { %5896 = vmatpush3.msra.mxu0 %v4331_v46 }
 0x473   : > { %5897 = vmatprep.subr.mxu0 %v4346_v20  ;;  %v4335_v20 = vld [vmem:[%s8984_s16 + $0x90] sm:$0xff] }
 0x474   : > { %5898 = vmatpush3.msra.mxu0 %v4330_v21  ;;  %v4319_v21 = vld [vmem:[%s8984_s16 + $0x10] sm:$0xff] }
 0x475   : > { %5899 = vmatprep.subr.mxu0 %v4345_v47 }
 0x476   : > { %5900 = vmatpush3.msra.mxu0 %v4329_v49  ;;  %v4318_v49 = vld [vmem:[%s8984_s16 + $0x8] sm:$0xff] }
 0x477   : > { %5901 = vmatprep.subr.mxu0 %v4344_v50 }
 0x478   : > { %5902 = vmatpush3.msra.mxu0 %v4328_v54  ;;  %v4317_v54 = vld [vmem:[%s8984_s16] sm:$0xff] }
 0x479   : > { %5903 = vmatprep.subr.mxu0 %v4343_v55 }
 0x47a   : > { %5904 = vmatpush3.msra.mxu0 %v4327_v57  ;;  %v6921_v57 = vmov 0.0  }
 0x47b   : > { %5905 = vmatprep.subr.mxu0 %v4342_v19 }
 0x47c   : > { %5906 = vmatpush3.msra.mxu0 %v4326_v3 }
 0x47d   : > { %5907 = vmatprep.subr.mxu0 %v4341_v58 }
 0x47e   : > { %5908 = vmatpush3.msra.mxu0 %v4325_v60  ;;  %v5753_v60 = vld [vmem:[%s8984_s16 + $0x208] sm:$0xff] }
 0x47f   : > { %5909 = vmatprep.subr.mxu0 %v4340_v63 }
 0x480   : > { %5910 = vmatpush3.msra.mxu0 %v4324_v0 }
 0x481   : > { %5911 = vmatprep.subr.mxu0 %v4339_v4 }
 0x482   : > { %5912 = vmatpush3.msra.mxu0 %v4323_v6 }
 0x483   : > { %v3357_v32 = vpop.f32.mrf.mxu0  ;;  %5913 = vmatprep.subr.mxu0 %v4338_v11 }
 0x484   : > { %v3398_v40 = vpop.f32.mrf.mxu1  ;;  %v3358_v56 = vadd.f32 %v3357_v32, %v3150_v48  ;;  %5914 = vmatpush3.msra.mxu0 %v4322_v13  ;;  %v6722_v32 = vld [vmem:[%s8921_s10 + $0x290] ss:$12 sps:$4 sm:$0xff]   ;;  %v4334_v48 = vld [vmem:[%s8984_s16 + $0x88] sm:$0xff] }
 0x485   : > { %v3359_v41 = vpop.f32.mrf.mxu0  ;;  %5915 = vmatprep.subr.mxu0 %v4337_v17 }
 0x486   : > { %v3400_v34 = vpop.f32.mrf.mxu1  ;;  %v3360_v26 = vadd.f32 %v3359_v41, %v3154_v53  ;;  %v3399_v59 = vadd.f32 %v3398_v40, %v3358_v56  ;;  %5916 = vmatpush3.msra.mxu0 %v4321_v22  ;;  %v6723_v40 = vld [vmem:[%s8921_s10 + $0x1d0] ss:$12 sps:$4 sm:$0xff]   ;;  %v6724_v41 = vld [vmem:[%s8921_s10 + $0x278] ss:$12 sps:$4 sm:$0xff]   ;;  %v4350_v56 = vld [vmem:[%s8984_s16 + $0x108] sm:$0x1] }
 0x487   : > { %v3361_v35 = vpop.f32.mrf.mxu0  ;;  %5917 = vmatprep.subr.mxu0 %v4336_v8  ;;  %v4333_v53 = vld [vmem:[%s8984_s16 + $0x80] sm:$0xff]  ;;  %v5785_v8 = vld [vmem:[%s8984_s16 + $0x2f0] sm:$0xff] }
 0x488   : > { %v3402_v36 = vpop.f32.mrf.mxu1  ;;  %v3401_v43 = vadd.f32 %v3400_v34, %v3360_v26  ;;  %v6725_v34 = vld [vmem:[%s8921_s10 + $0x1b8] ss:$12 sps:$4 sm:$0xff]   ;;  %v6726_v35 = vld [vmem:[%s8921_s10 + $0x260] ss:$12 sps:$4 sm:$0xff]   ;;  %5918 = vmatpush3.msra.mxu0 %v4320_v9 }
 0x489   : > { %v3362_v38 = vpop.f32.mrf.mxu0  ;;  %v6727_v36 = vld [vmem:[%s8921_s10 + $0x1a0] ss:$12 sps:$4 sm:$0xff]   ;;  %5919 = vmatprep.subr.mxu0 %v4335_v20  ;;  %v5747_v20 = vld [vmem:[%s8984_s16 + $0x1d8] sm:$0xff] }
 0x48a   : > { %v3403_v33 = vpop.f32.mrf.mxu1  ;;  %v6728_v38 = vld [vmem:[%s8921_s10 + $0x248] ss:$12 sps:$4 sm:$0xff]   ;;  %5920 = vmatpush3.msra.mxu0 %v4319_v21  ;;  %v5732_v9 = vld [vmem:[%s8984_s16 + $0x160] sm:$0xff] }
 0x48b   : > { %v6729_v33 = vld [vmem:[%s8921_s10 + $0x188] ss:$12 sps:$4 sm:$0xff]   ;;  %5921 = vmatprep.subr.mxu0 %v4334_v48 }
 0x48c   : > { %5922 = vmatpush3.msra.mxu0 %v4318_v49  ;;  %v5784_v21 = vld [vmem:[%s8984_s16 + $0x2e8] sm:$0xff]  ;;  %v5746_v49 = vld [vmem:[%s8984_s16 + $0x1d0] sm:$0xff] }
 0x48d   : > { %5923 = vmatprep.subr.mxu0 %v4333_v53  ;;  %v5768_v48 = vld [vmem:[%s8984_s16 + $0x268] sm:$0xff]  ;;  %v5730_v53 = vld [vmem:[%s8984_s16 + $0x150] sm:$0xff] }
 0x48e   : > { %5924 = vmatpush3.msra.mxu0 %v4317_v54  ;;  %v5767_v54 = vld [vmem:[%s8984_s16 + $0x260] sm:$0xff] }
 0x48f   : > { %6069 = vmatprep.subr.mxu0 %v6921_v57 }
 0x4c3   : > { %v3439_v61 = vpop.f32.mrf.mxu0 }
 0x4c4   : > { %v3480_v62 = vpop.f32.mrf.mxu1  ;;  %v3440_v44 = vadd.f32 %v3439_v61, %v3399_v59  ;;  %v4349_v59 = vld [vmem:[%s8984_s16 + $0x100] sm:$0xff] }
 0x4c5   : > { %v3441_v1 = vpop.f32.mrf.mxu0  ;;  %v3623_v61 = vld [vmem:[%s8985_s6] sm:$0x7] }
 0x4c6   : > { %v3482_v2 = vpop.f32.mrf.mxu1  ;;  %v3481_v45 = vadd.f32 %v3480_v62, %v3440_v44  ;;  %v3442_v5 = vadd.f32 %v3441_v1, %v3401_v43  ;;  %v4140_v62 = vrot.slane %v3623_v61, %v7408_v51  ;;  %v4144_v63 = vrot.slane %v3623_v61, %v7344_v25  ;;  %v5754_v25 = vld [vmem:[%s8984_s16 + $0x210] sm:$0xff]  ;;  %v5790_v51 = vld [vmem:[%s8984_s16 + $0x318] sm:$0xff] }
 0x4c7   : > { %v3443_v7 = vpop.f32.mrf.mxu0  ;;  %v4148_v11 = vrot.slane %v3623_v61, %v7411_v52  ;;  %v5752_v52 = vld [vmem:[%s8984_s16 + $0x200] sm:$0xff]  ;;  %v5743_v61 = vld [vmem:[%s8984_s16 + $0x1b8] sm:$0xff] }
 0x4c8   : > { %v3484_v10 = vpop.f32.mrf.mxu1  ;;  %v3483_v12 = vadd.f32 %v3482_v2, %v3442_v5  ;;  %v3489_v14 = vmax.f32 %v3481_v45, 0.0 }
 0x4c9   : > { %v3444_v15 = vpop.f32.mrf.mxu0  ;;  %v5755_v10 = vld [vmem:[%s8984_s16 + $0x218] sm:$0x1] }
 0x4ca   : > { %v3485_v16 = vpop.f32.mrf.mxu1  ;;  %v3490_v18 = vmax.f32 %v3483_v12, 0.0  ;;  %v3493_v42 = vpack.c.bf16 %v3489_v14, %v3489_v14 }
 0x4cc   : > { %v3494_v23 = vpack.c.bf16 %v3490_v18, %v3490_v18 }
 0x4ce   : > { %4225 = vmatprep.mubr.bf16.mxu1 %v3494_v23 }
 0x4cf   : > { %4226 = vmatmul.mubr.bf16.vlgmr.msra.gmra.mxu1 %v3493_v42 }
 0x4d0   : > { %5872 = vmatpush3.bf16.msra.mxu1 %v6715_v37  ;;  %4306 = vmatprep.mubr.bf16.mxu1 %v3494_v23  ;;  %v5737_v23 = vld [vmem:[%s8984_s16 + $0x188] sm:$0xff]  ;;  %v5774_v37 = vld [vmem:[%s8984_s16 + $0x298] sm:$0xff] }
 0x4d1   : > { %5873 = vmatprep.subr.bf16.mxu1 %v6716_v24  ;;  %v5736_v24 = vld [vmem:[%s8984_s16 + $0x180] sm:$0xff] }
 0x4d4   : > { %5874 = vmatpush3.bf16.msra.mxu1 %v6717_v27  ;;  %v5773_v27 = vld [vmem:[%s8984_s16 + $0x290] sm:$0xff] }
 0x4d5   : > { %5875 = vmatprep.subr.bf16.mxu1 %v6718_v28  ;;  %v5751_v28 = vld [vmem:[%s8984_s16 + $0x1f8] sm:$0xff] }
 0x4d8   : > { %5876 = vmatpush3.bf16.msra.mxu1 %v6719_v29  ;;  %v5788_v29 = vld [vmem:[%s8984_s16 + $0x308] sm:$0xff] }
 0x4d9   : > { %5877 = vmatprep.subr.bf16.mxu1 %v6720_v30  ;;  %v5735_v30 = vld [vmem:[%s8984_s16 + $0x178] sm:$0xff] }
 0x4dc   : > { %5878 = vmatpush3.bf16.msra.mxu1 %v6721_v31  ;;  %v5772_v31 = vld [vmem:[%s8984_s16 + $0x288] sm:$0xff] }
 0x4dd   : > { %5879 = vmatprep.subr.bf16.mxu1 %v6722_v32  ;;  %v5750_v32 = vld [vmem:[%s8984_s16 + $0x1f0] sm:$0xff] }
 0x4e0   : > { %5880 = vmatpush3.bf16.msra.mxu1 %v6723_v40  ;;  %v5787_v40 = vld [vmem:[%s8984_s16 + $0x300] sm:$0xff] }
 0x4e1   : > { %5881 = vmatprep.subr.bf16.mxu1 %v6724_v41  ;;  %v5734_v41 = vld [vmem:[%s8984_s16 + $0x170] sm:$0xff] }
 0x4e4   : > { %5882 = vmatpush3.bf16.msra.mxu1 %v6725_v34  ;;  %v5771_v34 = vld [vmem:[%s8984_s16 + $0x280] sm:$0xff] }
 0x4e5   : > { %5883 = vmatprep.subr.bf16.mxu1 %v6726_v35  ;;  %v5749_v35 = vld [vmem:[%s8984_s16 + $0x1e8] sm:$0xff] }
 0x4e8   : > { %5884 = vmatpush3.bf16.msra.mxu1 %v6727_v36  ;;  %v5786_v36 = vld [vmem:[%s8984_s16 + $0x2f8] sm:$0xff] }
 0x4e9   : > { %5885 = vmatprep.subr.bf16.mxu1 %v6728_v38  ;;  %v5733_v38 = vld [vmem:[%s8984_s16 + $0x168] sm:$0xff] }
 0x4ec   : > { %5886 = vmatpush3.bf16.msra.mxu1 %v6729_v33  ;;  %v5770_v33 = vld [vmem:[%s8984_s16 + $0x278] sm:$0xff] }
 0x4ed   : > { %6062 = vmatprep.subr.mxu1 %v6921_v57 }
 0x4ef   : > { %4307 = vmatmul.mubr.bf16.vlgmr.msra.gmra.mxu1 %v3493_v42  ;;  %v5789_v42 = vld [vmem:[%s8984_s16 + $0x310] sm:$0xff] }
 0x4f0   : > { %6063 = vmatpush3.msk.msra.mxu1 %vm4356_vm4, %v4350_v56  ;;  %6066 = vmatprep.mubr.msk.f32.mxu1 %vm6922_vm5, %v6921_v57  ;;  %v5782_v56 = vld [vmem:[%s8984_s16 + $0x2d8] sm:$0xff] }
 0x4f1   : > { %6064 = vmatprep.subr.mxu1 %v6921_v57 }
 0x4f2   : > { %6065 = vmatpush3.msra.mxu1 %v4349_v59  ;;  %v5728_v59 = vld [vmem:[%s8984_s16 + $0x140] sm:$0xff] }
 0x4f3   : > { %5931 = vmatprep.subr.mxu1 %v5753_v60  ;;  %v5765_v60 = vld [vmem:[%s8984_s16 + $0x250] sm:$0xff] }
 0x50f   : > { %v4186_v39 = vpop.f32.mrf.mxu0 }
 0x510   : > { %v4187_v43 = vadd.f32 %v4186_v39, %v4140_v62  ;;  %v5748_v39 = vld [vmem:[%s8984_s16 + $0x1e0] sm:$0xff]  ;;  %v5780_v62 = vld [vmem:[%s8984_s16 + $0x2c8] sm:$0xff] }
 0x511   : > { %v4188_v46 = vpop.f32.mrf.mxu0 }
 0x512   : > { %v4189_v0 = vadd.f32 %v4188_v46, %v4144_v63  ;;  %v5769_v46 = vld [vmem:[%s8984_s16 + $0x270] sm:$0xff]  ;;  %v5727_v63 = vld [vmem:[%s8984_s16 + $0x138] sm:$0xff] }
 0x513   : > { %v4190_v47 = vpop.f32.mrf.mxu0 }
 0x514   : > { %v5731_v47 = vld [vmem:[%s8984_s16 + $0x158] sm:$0xff] }
 0x515   : > { %v4191_v50 = vpop.f32.mrf.mxu0 }
 0x516   : > { %v5783_v50 = vld [vmem:[%s8984_s16 + $0x2e0] sm:$0xff] }
 0x52f   : > { %v5865_v55 = vpop.f32.mrf.mxu0 }
 0x531   : > { %v5866_v19 = vpop.f32.mrf.mxu0 }
 0x532   : > { %v5867_v26 = vadd.f32 %v5866_v19, %v5865_v55  ;;  %v5745_v55 = vld [vmem:[%s8984_s16 + $0x1c8] sm:$0xff] }
 0x533   : > { %v5868_v3 = vpop.f32.mrf.mxu0  ;;  %v5729_v19 = vld [vmem:[%s8984_s16 + $0x148] sm:$0xff] }
 0x534   : > { %v4269_v14 = vadd.f32 %v5867_v26, %v4148_v11  ;;  %v5766_v26 = vld [vmem:[%s8984_s16 + $0x258] sm:$0xff]  ;;  %v5744_v3 = vld [vmem:[%s8984_s16 + $0x1c0] sm:$0xff] }
 0x535   : > { %v5869_v58 = vpop.f32.mrf.mxu0  ;;  %v5724_v11 = vld [vmem:[%s8984_s16 + $0x120] sm:$0xff] }
 0x536   : > { %v5781_v58 = vld [vmem:[%s8984_s16 + $0x2d0] sm:$0xff] }
 0x58f   : > { %v4227_v44 = vpop.f32.mrf.mxu1 }
 0x590   : > { %v4228_v1 = vadd.f32 %v4227_v44, %v4187_v43  ;;  %v5764_v43 = vld [vmem:[%s8984_s16 + $0x248] sm:$0xff]  ;;  %v5742_v44 = vld [vmem:[%s8984_s16 + $0x1b0] sm:$0xff] }
 0x591   : > { %v4229_v2 = vpop.f32.mrf.mxu1 }
 0x592   : > { %v4230_v4 = vadd.f32 %v4229_v2, %v4189_v0  ;;  %v8470_v6 = vmax.f32 %v4228_v1, 0.0  ;;  %v5779_v0 = vld [vmem:[%s8984_s16 + $0x2c0] sm:$0xff]  ;;  %v5726_v1 = vld [vmem:[%s8984_s16 + $0x130] sm:$0xff] }
 0x593   : > { %v4231_v45 = vpop.f32.mrf.mxu1  ;;  %v5763_v2 = vld [vmem:[%s8984_s16 + $0x240] sm:$0xff] }
 0x594   : > { %v8468_v5 = vmax.f32 %v4230_v4, 0.0  ;;  %v5741_v4 = vld [vmem:[%s8984_s16 + $0x1a8] sm:$0xff]  ;;  %v5778_v45 = vld [vmem:[%s8984_s16 + $0x2b8] sm:$0xff] }
 0x595   : > { %v4232_v7 = vpop.f32.mrf.mxu1 }
 0x596   : > { %4424 = vmatprep.mubr.f32.mxu0 %v8468_v5  ;;  %v5725_v7 = vld [vmem:[%s8984_s16 + $0x128] sm:$0xff] }
 0x597   : > { %4425 = vmatmul.mubr.f32.vlgmr.msra.gmra.mxu0 %v8470_v6 }
 0x598   : > { %6070 = vmatpush3.msk.msra.mxu0 %vm4356_vm4, %v5755_v10  ;;  %6073 = vmatprep.mubr.msk.f32.mxu0 %vm6922_vm5, %v6921_v57  ;;  %v5762_v10 = vld [vmem:[%s8984_s16 + $0x238] sm:$0xff] }
 0x599   : > { %6071 = vmatprep.subr.mxu0 %v6921_v57 }
 0x59a   : > { %6072 = vmatpush3.msra.mxu0 %v5754_v25  ;;  %v5740_v25 = vld [vmem:[%s8984_s16 + $0x1a0] sm:$0xff] }
 0x59b   : > { %5969 = vmatprep.subr.mxu0 %v5790_v51  ;;  %v5777_v51 = vld [vmem:[%s8984_s16 + $0x2b0] sm:$0xff] }
 0x5af   : > { %v5887_v12 = vpop.f32.mrf.mxu1 }
 0x5b1   : > { %v5888_v13 = vpop.f32.mrf.mxu1 }
 0x5b2   : > { %v5889_v15 = vadd.f32 %v5888_v13, %v5887_v12  ;;  %v5761_v12 = vld [vmem:[%s8984_s16 + $0x230] sm:$0xff]  ;;  %v5739_v13 = vld [vmem:[%s8984_s16 + $0x198] sm:$0xff] }
 0x5b3   : > { %v5890_v16 = vpop.f32.mrf.mxu1 }
 0x5b4   : > { %v4309_v17 = vadd.f32 %v5889_v15, %v4269_v14  ;;  %v5776_v14 = vld [vmem:[%s8984_s16 + $0x2a8] sm:$0xff]  ;;  %v5723_v15 = vld [vmem:[%s8984_s16 + $0x118] sm:$0xff] }
 0x5b5   : > { %v5891_v18 = vpop.f32.mrf.mxu1  ;;  %v5760_v16 = vld [vmem:[%s8984_s16 + $0x228] sm:$0xff] }
 0x5b6   : > { %v8488_v22 = vmax.f32 %v4309_v17, 0.0  ;;  %v5738_v17 = vld [vmem:[%s8984_s16 + $0x190] sm:$0xff]  ;;  %v5775_v18 = vld [vmem:[%s8984_s16 + $0x2a0] sm:$0xff] }
 0x5b8   : > { %6067 = vmatmul.mubr.msk.f32.vlgmr.msra.gmra.mxu1 %vm4352_vm6, %v8488_v22  ;;  %6074 = vmatmul.mubr.msk.f32.vlgmr.msra.gmra.mxu0 %vm4352_vm6, %v8488_v22 }
 0x5b9   : > { %5932 = vmatpush3.msra.mxu1 %v5737_v23  ;;  %5970 = vmatpush3.msra.mxu0 %v5774_v37  ;;  %v5722_v23 = vld [vmem:[%s8984_s16 + $0x110] sm:$0xff]  ;;  %v5759_v37 = vld [vmem:[%s8984_s16 + $0x220] sm:$0xff] }
 0x5ba   : > { %5933 = vmatprep.subr.mxu1 %v5752_v52  ;;  %4606 = vmatprep.mubr.f32.mxu1 %v8468_v5  ;;  %v5792_v52 = vld [vmem:[%s8984_s16 + $0x328] sm:$0x1] }
 0x5bb   : > { %5971 = vmatprep.subr.mxu0 %v5789_v42  ;;  %4787 = vmatprep.mubr.f32.mxu0 %v8468_v5  ;;  %v5829_v42 = vld [vmem:[%s8984_s16 + $0x438] sm:$0x1] }
 0x5bc   : > { %5934 = vmatpush3.msra.mxu1 %v5736_v24  ;;  %5972 = vmatpush3.msra.mxu0 %v5773_v27  ;;  %v5791_v24 = vld [vmem:[%s8984_s16 + $0x320] sm:$0xff]  ;;  %v5828_v27 = vld [vmem:[%s8984_s16 + $0x430] sm:$0xff] }
 0x5bd   : > { %5935 = vmatprep.subr.mxu1 %v5751_v28  ;;  %5973 = vmatprep.subr.mxu0 %v5788_v29  ;;  %v5827_v28 = vld [vmem:[%s8984_s16 + $0x428] sm:$0xff] }
 0x5be   : > { %5936 = vmatpush3.msra.mxu1 %v5735_v30  ;;  %5974 = vmatpush3.msra.mxu0 %v5772_v31  ;;  %v5811_v29 = vld [vmem:[%s8984_s16 + $0x3a8] sm:$0xff]  ;;  %v5826_v30 = vld [vmem:[%s8984_s16 + $0x420] sm:$0xff] }
 0x5bf   : > { %5937 = vmatprep.subr.mxu1 %v5750_v32  ;;  %5975 = vmatprep.subr.mxu0 %v5787_v40  ;;  %v5810_v31 = vld [vmem:[%s8984_s16 + $0x3a0] sm:$0xff]  ;;  %v5809_v32 = vld [vmem:[%s8984_s16 + $0x398] sm:$0xff]  ;;  %v5824_v40 = vld [vmem:[%s8984_s16 + $0x410] sm:$0xff] }
 0x5c0   : > { %5938 = vmatpush3.msra.mxu1 %v5734_v41  ;;  %5976 = vmatpush3.msra.mxu0 %v5771_v34  ;;  %v5807_v41 = vld [vmem:[%s8984_s16 + $0x388] sm:$0xff]  ;;  %v5822_v34 = vld [vmem:[%s8984_s16 + $0x400] sm:$0xff] }
 0x5c1   : > { %5939 = vmatprep.subr.mxu1 %v5749_v35  ;;  %5977 = vmatprep.subr.mxu0 %v5786_v36  ;;  %v5806_v35 = vld [vmem:[%s8984_s16 + $0x380] sm:$0xff]  ;;  %v5821_v36 = vld [vmem:[%s8984_s16 + $0x3f8] sm:$0xff] }
 0x5c2   : > { %5940 = vmatpush3.msra.mxu1 %v5733_v38  ;;  %5978 = vmatpush3.msra.mxu0 %v5770_v33  ;;  %v5805_v38 = vld [vmem:[%s8984_s16 + $0x378] sm:$0xff]  ;;  %v5820_v33 = vld [vmem:[%s8984_s16 + $0x3f0] sm:$0xff] }
 0x5c3   : > { %5941 = vmatprep.subr.mxu1 %v5748_v39  ;;  %5979 = vmatprep.subr.mxu0 %v5785_v8  ;;  %v5804_v39 = vld [vmem:[%s8984_s16 + $0x370] sm:$0xff]  ;;  %v5819_v8 = vld [vmem:[%s8984_s16 + $0x3e8] sm:$0xff] }
 0x5c4   : > { %5942 = vmatpush3.msra.mxu1 %v5732_v9  ;;  %5980 = vmatpush3.msra.mxu0 %v5769_v46  ;;  %v5803_v9 = vld [vmem:[%s8984_s16 + $0x368] sm:$0xff]  ;;  %v5818_v46 = vld [vmem:[%s8984_s16 + $0x3e0] sm:$0xff] }
 0x5c5   : > { %5943 = vmatprep.subr.mxu1 %v5747_v20  ;;  %5981 = vmatprep.subr.mxu0 %v5784_v21  ;;  %v5802_v20 = vld [vmem:[%s8984_s16 + $0x360] sm:$0xff]  ;;  %v5817_v21 = vld [vmem:[%s8984_s16 + $0x3d8] sm:$0xff] }
 0x5c6   : > { %5944 = vmatpush3.msra.mxu1 %v5731_v47  ;;  %5982 = vmatpush3.msra.mxu0 %v5768_v48  ;;  %v5801_v47 = vld [vmem:[%s8984_s16 + $0x358] sm:$0xff]  ;;  %v5816_v48 = vld [vmem:[%s8984_s16 + $0x3d0] sm:$0xff] }
 0x5c7   : > { %5945 = vmatprep.subr.mxu1 %v5746_v49  ;;  %5983 = vmatprep.subr.mxu0 %v5783_v50  ;;  %v5800_v49 = vld [vmem:[%s8984_s16 + $0x350] sm:$0xff]  ;;  %v5815_v50 = vld [vmem:[%s8984_s16 + $0x3c8] sm:$0xff] }
 0x5c8   : > { %5946 = vmatpush3.msra.mxu1 %v5730_v53  ;;  %5984 = vmatpush3.msra.mxu0 %v5767_v54  ;;  %v5799_v53 = vld [vmem:[%s8984_s16 + $0x348] sm:$0xff]  ;;  %v5814_v54 = vld [vmem:[%s8984_s16 + $0x3c0] sm:$0xff] }
 0x5c9   : > { %5947 = vmatprep.subr.mxu1 %v5745_v55  ;;  %5985 = vmatprep.subr.mxu0 %v5782_v56  ;;  %v5798_v55 = vld [vmem:[%s8984_s16 + $0x340] sm:$0xff]  ;;  %v5813_v56 = vld [vmem:[%s8984_s16 + $0x3b8] sm:$0xff] }
 0x5ca   : > { %5948 = vmatpush3.msra.mxu1 %v5729_v19  ;;  %5986 = vmatpush3.msra.mxu0 %v5766_v26  ;;  %v5797_v19 = vld [vmem:[%s8984_s16 + $0x338] sm:$0xff]  ;;  %v5812_v26 = vld [vmem:[%s8984_s16 + $0x3b0] sm:$0xff] }
 0x5cb   : > { %5949 = vmatprep.subr.mxu1 %v5744_v3  ;;  %5987 = vmatprep.subr.mxu0 %v5781_v58  ;;  %v5796_v3 = vld [vmem:[%s8984_s16 + $0x330] sm:$0xff] }
 0x5cc   : > { %5950 = vmatpush3.msra.mxu1 %v5728_v59  ;;  %5988 = vmatpush3.msra.mxu0 %v5765_v60 }
 0x5cd   : > { %5951 = vmatprep.subr.mxu1 %v5743_v61  ;;  %5989 = vmatprep.subr.mxu0 %v5780_v62  ;;  %v4351_v61 = vld [vmem:[%s8986_s13] sm:$0x1] }
 0x5ce   : > { %5952 = vmatpush3.msra.mxu1 %v5727_v63  ;;  %5990 = vmatpush3.msra.mxu0 %v5764_v43 }
 0x5cf   : > { %5953 = vmatprep.subr.mxu1 %v5742_v44  ;;  %5991 = vmatprep.subr.mxu0 %v5779_v0 }
 0x5d0   : > { %5954 = vmatpush3.msra.mxu1 %v5726_v1  ;;  %5992 = vmatpush3.msra.mxu0 %v5763_v2 }
 0x5d1   : > { %5955 = vmatprep.subr.mxu1 %v5741_v4  ;;  %5993 = vmatprep.subr.mxu0 %v5778_v45 }
 0x5d2   : > { %5956 = vmatpush3.msra.mxu1 %v5725_v7  ;;  %5994 = vmatpush3.msra.mxu0 %v5762_v10  ;;  %v5793_v10 = vld [vmem:[%s8986_s13 + $0x2] sm:$0x1] }
 0x5d3   : > { %5957 = vmatprep.subr.mxu1 %v5740_v25  ;;  %5995 = vmatprep.subr.mxu0 %v5777_v51 }
 0x5d4   : > { %5958 = vmatpush3.msra.mxu1 %v5724_v11  ;;  %5996 = vmatpush3.msra.mxu0 %v5761_v12 }
 0x5d5   : > { %5959 = vmatprep.subr.mxu1 %v5739_v13  ;;  %5997 = vmatprep.subr.mxu0 %v5776_v14 }
 0x5d6   : > { %5960 = vmatpush3.msra.mxu1 %v5723_v15  ;;  %5998 = vmatpush3.msra.mxu0 %v5760_v16 }
 0x5d7   : > { %5961 = vmatprep.subr.mxu1 %v5738_v17  ;;  %5999 = vmatprep.subr.mxu0 %v5775_v18 }
 0x5d8   : > { %5962 = vmatpush3.msra.mxu1 %v5722_v23  ;;  %6000 = vmatpush3.msra.mxu0 %v5759_v37  ;;  %v5830_v37 = vld [vmem:[%s8986_s13 + $0x3] sm:$0x1] }
 0x5d9   : > { %4607 = vmatmul.mubr.f32.vlgmr.msra.gmra.mxu1 %v8470_v6  ;;  %4788 = vmatmul.mubr.f32.vlgmr.msra.gmra.mxu0 %v8470_v6 }
 0x5da   : > { %6076 = vmatprep.subr.mxu1 %v6921_v57  ;;  %6083 = vmatprep.subr.mxu0 %v6921_v57 }
 0x5db   : > { %6077 = vmatpush3.msk.msra.mxu1 %vm4356_vm4, %v5792_v52  ;;  %6084 = vmatpush3.msk.msra.mxu0 %vm4356_vm4, %v5829_v42 }
 0x5dc   : > { %6078 = vmatprep.subr.mxu1 %v6921_v57  ;;  %6085 = vmatprep.subr.mxu0 %v6921_v57 }
 0x5dd   : > { %6079 = vmatpush3.msra.mxu1 %v5791_v24  ;;  %6080 = vmatprep.mubr.msk.f32.mxu1 %vm6922_vm5, %v6921_v57 }
 0x5de   : > { %6086 = vmatpush3.msra.mxu0 %v5828_v27  ;;  %6087 = vmatprep.mubr.msk.f32.mxu0 %vm6922_vm5, %v6921_v57  ;;  %v5825_v57 = vld [vmem:[%s8984_s16 + $0x418] sm:$0xff] }
 0x5df   : > { %6081 = vmatmul.mubr.msk.f32.vlgmr.msra.gmra.mxu1 %vm4352_vm6, %v8488_v22  ;;  %6007 = vmatprep.subr.mxu1 %v5827_v28 }
 0x5e0   : > { %6088 = vmatmul.mubr.msk.f32.vlgmr.msra.gmra.mxu0 %vm4352_vm6, %v8488_v22  ;;  %6008 = vmatpush3.msra.mxu1 %v5811_v29  ;;  %v5808_v22 = vld [vmem:[%s8984_s16 + $0x390] sm:$0xff] }
 0x5e1   : > { %4968 = vmatprep.mubr.f32.mxu1 %v8468_v5  ;;  %6009 = vmatprep.subr.mxu1 %v5826_v30  ;;  %v5823_v5 = vld [vmem:[%s8984_s16 + $0x408] sm:$0xff] }
 0x5e2   : > { %6010 = vmatpush3.msra.mxu1 %v5810_v31 }
 0x5e3   : > { %6011 = vmatprep.subr.mxu1 %v5825_v57 }
 0x5e4   : > { %6012 = vmatpush3.msra.mxu1 %v5809_v32 }
 0x5e5   : > { %6013 = vmatprep.subr.mxu1 %v5824_v40 }
 0x5e6   : > { %6014 = vmatpush3.msra.mxu1 %v5808_v22 }
 0x5e7   : > { %6015 = vmatprep.subr.mxu1 %v5823_v5 }
 0x5e8   : > { %6016 = vmatpush3.msra.mxu1 %v5807_v41 }
 0x5e9   : > { %6017 = vmatprep.subr.mxu1 %v5822_v34 }
 0x5ea   : > { %6018 = vmatpush3.msra.mxu1 %v5806_v35 }
 0x5eb   : > { %6019 = vmatprep.subr.mxu1 %v5821_v36 }
 0x5ec   : > { %6020 = vmatpush3.msra.mxu1 %v5805_v38 }
 0x5ed   : > { %6021 = vmatprep.subr.mxu1 %v5820_v33 }
 0x5ee   : > { %6022 = vmatpush3.msra.mxu1 %v5804_v39 }
 0x5ef   : > { %6023 = vmatprep.subr.mxu1 %v5819_v8 }
 0x5f0   : > { %6024 = vmatpush3.msra.mxu1 %v5803_v9 }
 0x5f1   : > { %6025 = vmatprep.subr.mxu1 %v5818_v46 }
 0x5f2   : > { %6026 = vmatpush3.msra.mxu1 %v5802_v20 }
 0x5f3   : > { %6027 = vmatprep.subr.mxu1 %v5817_v21 }
 0x5f4   : > { %6028 = vmatpush3.msra.mxu1 %v5801_v47 }
 0x5f5   : > { %6029 = vmatprep.subr.mxu1 %v5816_v48 }
 0x5f6   : > { %6030 = vmatpush3.msra.mxu1 %v5800_v49 }
 0x5f7   : > { %6031 = vmatprep.subr.mxu1 %v5815_v50 }
 0x5f8   : > { %6032 = vmatpush3.msra.mxu1 %v5799_v53 }
 0x5f9   : > { %6033 = vmatprep.subr.mxu1 %v5814_v54 }
 0x5fa   : > { %6034 = vmatpush3.msra.mxu1 %v5798_v55 }
 0x5fb   : > { %6035 = vmatprep.subr.mxu1 %v5813_v56 }
 0x5fc   : > { %6036 = vmatpush3.msra.mxu1 %v5797_v19 }
 0x5fd   : > { %6037 = vmatprep.subr.mxu1 %v5812_v26 }
 0x5fe   : > { %6038 = vmatpush3.msra.mxu1 %v5796_v3 }
 0x5ff   : > { %4969 = vmatmul.mubr.f32.vlgmr.msra.gmra.mxu1 %v8470_v6  ;;  %v5756_v6 = vld [vmem:[%s8986_s13 + $0x1] sm:$0x1] }
 0x657   : > { %v5925_v58 = vpop.f32.mrf.mxu0 }
 0x659   : > { %v5926_v59 = vpop.f32.mrf.mxu0 }
 0x65a   : > { %v5927_v60 = vadd.f32 %v5926_v59, %v5925_v58 }
 0x65c   : > { %v4427_v62 = vadd.f32 %v5927_v60, %v4351_v61 }
 0x678   : > { %v4496_v63 = vpop.f32.mrf.mxu1  ;;  %v4678_v43 = vpop.f32.mrf.mxu0 }
 0x679   : > { %v4497_v44 = vadd.f32 %v4496_v63, %v4427_v62 }
 0x67a   : > { %v6068_v0 = vpop.f32.mrf.mxu1  ;;  %v6075_v1 = vpop.f32.mrf.mxu0 }
 0x67b   : > { %4501 = vst.msk [vmem:[#allocation3] sm:$0x1] %vm4500_vm7, %v4497_v44 }
 0x699   : > { %v5963_v2 = vpop.f32.mrf.mxu1  ;;  %v6001_v4 = vpop.f32.mrf.mxu0 }
 0x69b   : > { %v5964_v45 = vpop.f32.mrf.mxu1  ;;  %v6002_v7 = vpop.f32.mrf.mxu0 }
 0x69c   : > { %v5965_v25 = vadd.f32 %v5964_v45, %v5963_v2  ;;  %v6003_v51 = vadd.f32 %v6002_v7, %v6001_v4 }
 0x69e   : > { %v4609_v11 = vadd.f32 %v5965_v25, %v5756_v6  ;;  %v4790_v12 = vadd.f32 %v6003_v51, %v5793_v10 }
 0x69f   : > { %v4859_v13 = vpop.f32.mrf.mxu1 }
 0x6a0   : > { %v4679_v14 = vadd.f32 %v4678_v43, %v4609_v11  ;;  %v4860_v15 = vadd.f32 %v4859_v13, %v4790_v12  ;;  %v5040_v16 = vpop.f32.mrf.mxu0 }
 0x6a1   : > { %v6082_v17 = vpop.f32.mrf.mxu1 }
 0x6a2   : > { %4682 = vst.msk [vmem:[#allocation3 + $0x1] sm:$0x1] %vm4500_vm7, %v4679_v14  ;;  %4863 = vst.msk [vmem:[#allocation3 + $0x2] sm:$0x1] %vm4500_vm7, %v4860_v15  ;;  %v6089_v18 = vpop.f32.mrf.mxu0 }
 0x6bf   : > { %v6039_v23 = vpop.f32.mrf.mxu1 }
 0x6c1   : > { %v6040_v52 = vpop.f32.mrf.mxu1 }
 0x6c2   : > { %v6041_v42 = vadd.f32 %v6040_v52, %v6039_v23 }
 0x6c4   : > { %v4971_v24 = vadd.f32 %v6041_v42, %v5830_v37 }
 0x6c6   : > { %v5041_v27 = vadd.f32 %v5040_v16, %v4971_v24 }
 0x6c8   : > { %5044 = vst.msk [vmem:[#allocation3 + $0x3] sm:$0x1] %vm4500_vm7, %v5041_v27 }
 0x6cf   : > { %v5045_v28 = vld [vmem:[#allocation3] sm:$0xf] }
 0x6d0   : > { %5047 = vst.msk [vmem:[%s583_s28] sm:$0xf] %vm5046_vm8, %v5045_v28 }
 0x6d1 PF: > { %p5833_p5 = scmp.lt.s32.totalorder %s6895_s24, 1 }
 0x6d3   : > { %5051 = sbr.rel (%p5833_p5) target bundleno = 1892 (0x764), region = 96 }
 0x6d8   : > { %v5052_v29 = vld [vmem:[#allocation3] sm:$0xf]  ;;  %v6923_v30 = vmov 0   ;;  %v6924_v31 = vmov 2   ;;  %v6925_v57 = vmov 1   ;;  %v6926_v32 = vmov 3  }
 0x6d9   : > { %6730 = vset.pattern.permute.xlu0 %v6923_v30  ;;  %6732 = vset.pattern.permute.xlu1 %v6924_v31  ;;  %v5059_v40 = vlaneseq  ;;  %v5053_v34 = vld [vmem:[%s7155_s20] sm:$0xf]  ;;  %vm5094_vm9 = vcmask 125952  }
 0x6da   : > { %5056 = vperm.xlu0 %6730, %v5052_v29   ;;  %5075 = vperm.xlu1 %6732, %v5052_v29  }
 0x6db   : > { %v5060_v22 = vshrl.u32 %v5059_v40, 7 }
 0x6dd   : > { %v5061_v5 = vsub.s32 0, %v5060_v22  ;;  %v5070_v41 = vsub.s32 1, %v5060_v22  ;;  %v5080_v36 = vsub.s32 2, %v5060_v22  ;;  %v5090_v33 = vsub.s32 3, %v5060_v22 }
 0x6de   : > { %6731 = vset.pattern.permute.xlu0 %v6925_v57  ;;  %6733 = vset.pattern.permute.xlu1 %v6926_v32 }
 0x6df   : > { %5065 = vperm.xlu0 %6731, %v5052_v29   ;;  %5085 = vperm.xlu1 %6733, %v5052_v29   ;;  %v5062_v39 = vrot.slane %v5053_v34, %v5061_v5  ;;  %v5071_v8 = vrot.slane %v5053_v34, %v5070_v41  ;;  %v5081_v9 = vrot.slane %v5053_v34, %v5080_v36 }
 0x6e0   : > { %v5091_v46 = vrot.slane %v5053_v34, %v5090_v33 }
 0x6e3   : > { %6734 = vset.pattern.permute.xlu0 %v6926_v32 }
 0x755   : > { %v5057_v35 = vpop.permute.xlu0 %5056  ;;  %v5076_v38 = vpop.permute.xlu1 %5075 }
 0x756   : > { %v5063_v47 = vmul.f32 %v5062_v39, %v5057_v35  ;;  %v5082_v49 = vmul.f32 %v5081_v9, %v5076_v38 }
 0x75a   : > { %v5066_v20 = vpop.permute.xlu0 %5065  ;;  %v5086_v21 = vpop.permute.xlu1 %5085 }
 0x75b   : > { %v5072_v48 = vmul.f32 %v5071_v8, %v5066_v20  ;;  %v5092_v53 = vmul.f32 %v5091_v46, %v5086_v21 }
 0x75d   : > { %v5073_v50 = vadd.f32 %v5072_v48, %v5063_v47 }
 0x75f   : > { %v5083_v54 = vadd.f32 %v5082_v49, %v5073_v50 }
 0x761   : > { %v5093_v55 = vadd.f32 %v5092_v53, %v5083_v54 }
 0x763   : > { %5095 = vst.msk [vmem:[%s8948_s21] sm:$0xf] %vm5094_vm9, %v5093_v55 }
 0x764 PF: > { %s5836_s30 = sshll.u32 %s6899_s25, 6  ;;  %s8988_s17 = sld [smem:[#allocation35_spill]] }
 0x765   : > { %s5115_s15 = sshll.u32 %s583_s28, 4  ;;  %s8989_s29 = sand.u32 1, %s6887_s22   ;;  %s5116_s15 = int_to_ptr.vmem [resolvable:$true] %s5115_s15 }
 0x766   : > { %s5097_s6 = scalar_lea.sflag [#allocation6], %s8989_s29  ;;  %s6761_s26 = scalar_lea.vmem %s5116_s15, 64 }
 0x767   : > { %p6762_p6 = scmp.ne.s32.totalorder %s5116_s15, %s6761_s26  ;;  %s6927_s18 = smov [#allocation7]  }
 0x768   : > { %s6765_s21 = sshll.u32 %s6927_s18, 4  ;;  %s6766_s21 = int_to_ptr.vmem [resolvable:$false] %s6765_s21 }
 0x769   : > { %p6763_p8 = pnand %p6762_p6, %p7080_p3  ;;  %s6767_s0 = scalar_lea.vmem %s6766_s21, 128 }
 0x76a   : > { %s5113_s11 = scalar_lea.hbm %s8988_s17, %s5836_s30  ;;  %p6768_p10 = scmp.lt.s32.totalorder %s5116_s15, %s6766_s21 }
 0x76b   : > { %p6764_p9 = pneg %p6763_p8  ;;  %p6769_p11 = scmp.lt.s32.totalorder %s6767_s0, %s6761_s26 }
 0x76d   : > { %p6770_p0 = por %p6769_p11, %p6768_p10 }
 0x76f   : > { %p6771_p7 = pnand %p6770_p0, %p6764_p9 }
 0x771   : > { %6774 = shalt.err (!%p6771_p7)
}
 0x772   : > { %s6775_s30 = scalar_lea.hbm %s5113_s11, 64  ;;  %s6779_s14 = scalar_lea.hbm %s8988_s17, 128 }
 0x773   : > { %p6776_p13 = scmp.ne.s32.totalorder %s5113_s11, %s6775_s30  ;;  %p6780_p2 = scmp.lt.s32.totalorder %s5113_s11, %s8988_s17 }
 0x774   : > { %p6781_p5 = scmp.lt.s32.totalorder %s6779_s14, %s6775_s30 }
 0x775   : > { %p6777_p1 = pnand %p6776_p13, %p7080_p3 }
 0x776   : > { %p6782_p6 = por %p6781_p5, %p6780_p2 }
 0x777   : > { %p6778_p4 = pneg %p6777_p1 }
 0x779   : > { %p6783_p8 = pnand %p6782_p6, %p6778_p4 }
 0x77b   : > { %6786 = shalt.err (!%p6783_p8)
}
 0x77c   : > { %6094 = dma.vmem_to_hbm [thread:$0]  (%p7080_p3), %s5116_s15, 64, %s5113_s11, %s5097_s6  }
 0x77d   : > { %s5837_s21 = sadd.s32 4294967295, %s6895_s24  ;;  %s8991_s26 = scalar_lea.vmem [#allocation8], %s7146_s27 }
 0x77e   : > { %p5123_p9 = scmp.gt.s32.totalorder %s5837_s21, 0  ;;  %s5132_s18 = sshll.u32 %s8991_s26, 4  ;;  %s5133_s18 = int_to_ptr.vmem [resolvable:$true] %s5132_s18 }
 0x77f   : > { %s8992_s12 = sld [smem:[#allocation36_spill]]  ;;  %s8993_s1 = sand.u32 1, %s6875_s19  }
 0x780   : > { %s9023_s21 = smov (!%p5123_p9, %s5837_s21), 0  ;;  %s5102_s20 = scalar_lea.sflag [#allocation9], %s8993_s1 }
 0x781   : > { %s5128_s28 = sadd.s32 %s6899_s25, %s9023_s21  ;;  %s6787_s2 = scalar_lea.vmem %s5133_s18, 64 }
 0x782   : > { %s5838_s23 = sshll.u32 %s5128_s28, 6  ;;  %p6788_p10 = scmp.ne.s32.totalorder %s5133_s18, %s6787_s2 }
 0x783   : > { %s6928_s11 = smov [#allocation8]  }
 0x784   : > { %p6789_p11 = pnand %p6788_p10, %p7105_p12  ;;  %s6791_s24 = sshll.u32 %s6928_s11, 4  ;;  %s6792_s24 = int_to_ptr.vmem [resolvable:$false] %s6791_s24 }
 0x785   : > { %s5130_s29 = scalar_lea.hbm %s8992_s12, %s5838_s23  ;;  %s6793_s27 = scalar_lea.vmem %s6792_s24, 128 }
 0x786   : > { %p6790_p0 = pneg %p6789_p11  ;;  %p6794_p3 = scmp.lt.s32.totalorder %s5133_s18, %s6792_s24 }
 0x787   : > { %p6795_p7 = scmp.lt.s32.totalorder %s6793_s27, %s6787_s2 }
 0x789   : > { %p6796_p13 = por %p6795_p7, %p6794_p3 }
 0x78b   : > { %p6797_p1 = pnand %p6796_p13, %p6790_p0 }
 0x78d   : > { %6800 = shalt.err (!%p6797_p1)
}
 0x78e   : > { %s6801_s25 = scalar_lea.hbm %s5130_s29, 64  ;;  %s6805_s6 = scalar_lea.hbm %s8992_s12, 128 }
 0x78f   : > { %p6802_p4 = scmp.ne.s32.totalorder %s5130_s29, %s6801_s25  ;;  %p6806_p6 = scmp.lt.s32.totalorder %s5130_s29, %s8992_s12 }
 0x790   : > { %p6807_p8 = scmp.lt.s32.totalorder %s6805_s6, %s6801_s25 }
 0x791   : > { %p6803_p2 = pnand %p6802_p4, %p7105_p12 }
 0x792   : > { %p6808_p9 = por %p6807_p8, %p6806_p6 }
 0x793   : > { %p6804_p5 = pneg %p6803_p2 }
 0x795   : > { %p6809_p10 = pnand %p6808_p9, %p6804_p5 }
 0x797   : > { %6812 = shalt.err (!%p6809_p10)
}
 0x798   : > { %6095 = dma.vmem_to_hbm [thread:$0]  (%p7105_p12), %s5133_s18, 64, %s5130_s29, %s5102_s20  }
 0x799 PF: > { %s8994_s2 = sld [smem:[#allocation19_spill]] }
 0x79a   : > { %s8995_s28 = sld [smem:[#allocation15_spill]] }
 0x79b   : > { %s8996_s23 = sld [smem:[#allocation23_spill]] }
 0x79f   : > { %p6111_p11 = scmp.ge.s32.totalorder %s8994_s2, 2 }
 0x7a0   : > { %s5144_s30 = sand.u32 1, %s8995_s28  }
 0x7a1   : > { %p8997_p0 = scmp.ne.s32.totalorder %s8996_s23, 0  ;;  %s5145_s14 = scalar_lea.sflag [#allocation6], %s5144_s30 }
 0x7a3   : > { %p6103_p3 = pnand %p6111_p11, %p8997_p0 }
 0x7a5   : > { %p6104_p7 = pneg %p6103_p3 }
 0x7a7   : > { %6862 = dma.done.wait (%p6104_p7), %s5145_s14, 64  }
 0x7a8   : > { %6864 = vsyncadd (%p6104_p7), %s5145_s14, 4294967232  ;;  %s8998_s11 = sld [smem:[#allocation13_spill]] }
 0x7a9   : > { %s8999_s24 = sld [smem:[#allocation26_spill]] }
 0x7ae   : > { %s5153_s27 = sand.u32 1, %s8998_s11  }
 0x7af   : > { %p9000_p13 = scmp.ne.s32.totalorder %s8999_s24, 0  ;;  %s5154_s0 = scalar_lea.sflag [#allocation9], %s5153_s27 }
 0x7b1   : > { %p6106_p1 = pnand %p6111_p11, %p9000_p13 }
 0x7b3   : > { %p6107_p4 = pneg %p6106_p1 }
 0x7b5   : > { %6866 = dma.done.wait (%p6107_p4), %s5154_s0, 64  }
 0x7b6   : > { %6868 = vsyncadd (%p6107_p4), %s5154_s0, 4294967232  ;;  %s33_s28 = sadd.s32 1, %s8994_s2   ;;  %s9001_s29 = sld [smem:[#allocation14_spill]] }
 0x7b7   : > { %p30_p12 = scmp.ge.s32.totalorder %s33_s28, 6   ;;  %s9002_s20 = sld [smem:[#allocation27_spill]] }
 0x7b8   : > { %s9003_s25 = sld [smem:[#allocation16_spill]]  ;;  %s9009_s18 = smov %s6875_s19 }
 0x7b9   : > { %s9004_s23 = sld [smem:[#allocation24_spill]]  ;;  %s9011_s21 = smov %s6887_s22 }
 0x7ba   : > { %s9005_s24 = sld [smem:[#allocation17_spill]] }
 0x7bb   : > { %s9006_s1 = sld [smem:[#allocation18_spill]] }
 0x7bc   : > { %s9007_s26 = sld [smem:[#allocation20_spill]]  ;;  %s9010_s19 = smov %s9001_s29 }
 0x7bd   : > { %s9008_s27 = sld [smem:[#allocation22_spill]]  ;;  %32 = sbr.rel (!%p30_p12) target bundleno = 20 (0x14), region = 158 }
 0x7be   : > { %s9012_s22 = smov %s9003_s25 }
 0x7c1   : > { %s9013_s25 = smov %s9006_s1 }
 0x7c2   :  { %5159 = vsyncpa [#allocation5], 1 }
 0x7c3   :  { %5161 = vsyncpa [#allocation5 + $0x1], 1 }
 0x7c4   :  { %5162 = vsyncpa [#allocation6], 1 }
 0x7c5   :  { %5164 = vsyncpa [#allocation6 + $0x1], 1 }
 0x7c6   :  { %5165 = vsyncpa [#allocation9], 1 }
 0x7c7   :  { %5167 = vsyncpa [#allocation9 + $0x1], 1 }

</bundles_post_ra>
